<compile_context>
chip_gen: v7x
topology: tpu7x:2x2x1
jax: 0.10.0
libtpu: 0.0.40
codegen_flags: <defaults>
</compile_context>

<pallas_src>
import functools

import jax
import jax.numpy as jnp
from jax import lax
from jax.experimental import pallas as pl
from jax.experimental.pallas import tpu as pltpu


# ----------------------------------------------------------------------------
# helpers
# ----------------------------------------------------------------------------
def _round_up(x, m):
    return ((x + m - 1) // m) * m


def _vmem_budget():
    """Per-generation sizing: (per-X-tile byte budget, vmem_limit_bytes)."""
    cap = 64 << 20
    try:
        cap = int(getattr(pltpu.get_tpu_info(), "vmem_capacity_bytes", cap))
    except Exception:
        pass
    # ~12 MiB tiles / 96 MiB limit on 128-MiB chips (v5e/v6e),
    # ~6.4 MiB tiles / 48 MiB limit on 64-MiB chips (v7x).
    tile_budget = max(4 << 20, min(12 << 20, cap // 10))
    vmem_limit = int(min(cap * 3 // 4, 96 << 20))
    return tile_budget, vmem_limit


def _pick_tiles(m, bytes_per_row, tm_target, tile_budget):
    """Few large M tiles: (num_blocks, tile_rows, padded_rows)."""
    cap = max(128, (tile_budget // max(bytes_per_row, 1)) // 128 * 128)
    tmt = max(128, min(tm_target, cap))
    nb = pl.cdiv(m, tmt)
    tm = _round_up(pl.cdiv(m, nb), 128)
    return nb, tm, nb * tm


def _probe_single_buffering():
    """Check pipeline_mode=pl.Buffered(1) support once; degrade gracefully."""
    try:
        def k(x_ref, o_ref):
            o_ref[...] = x_ref[...]

        jax.block_until_ready(pl.pallas_call(
            k,
            out_shape=jax.ShapeDtypeStruct((8, 128), jnp.float32),
            grid=(1,),
            in_specs=[pl.BlockSpec((8, 128), lambda i: (0, 0),
                                   pipeline_mode=pl.Buffered(1))],
            out_specs=pl.BlockSpec((8, 128), lambda i: (0, 0)),
        )(jnp.zeros((8, 128), jnp.float32)))
        return True
    except Exception:
        return False


_SINGLE_BUFFER_OK = _probe_single_buffering()


def _spec(block_shape, index_map, invariant=False):
    """BlockSpec; grid-invariant blocks are single-buffered when supported."""
    if invariant and _SINGLE_BUFFER_OK:
        return pl.BlockSpec(block_shape, index_map, pipeline_mode=pl.Buffered(1))
    return pl.BlockSpec(block_shape, index_map)


# ----------------------------------------------------------------------------
# Pallas kernel 1: voxel scatter-mean (DynamicSimpleVFE)
# ----------------------------------------------------------------------------
def _voxel_mean_kernel(count_col, tile_cnt_ref, vid_ref, feat_ref, mean_ref):
    # tile_cnt_ref : (ntiles,) int32 in SMEM, points per voxel tile
    # vid_ref      : (1, P)   int32 flat voxel id per point (-1 for padding)
    # feat_ref     : (P, 128) bf16 point features, column `count_col` is all 1s
    # mean_ref     : (TV,128) bf16 per-voxel mean; column `count_col` ~= 1/0
    i = pl.program_id(0)

    @pl.when(tile_cnt_ref[i] == 0)
    def _():
        mean_ref[...] = jnp.zeros_like(mean_ref)

    @pl.when(tile_cnt_ref[i] > 0)
    def _():
        tv = mean_ref.shape[0]
        p = vid_ref.shape[1]
        # tile-local ids: (1,P) subtract instead of a (TV,P) iota + add
        local = vid_ref[...] - i * tv
        rows = lax.broadcasted_iota(jnp.int32, (tv, p), 0)
        onehot = (rows == local).astype(jnp.bfloat16)                # (TV, P)
        sums = jnp.dot(onehot, feat_ref[...],
                       preferred_element_type=jnp.float32)           # (TV,128)
        cnt = sums[:, count_col:count_col + 1]                       # (TV, 1)
        # approx reciprocal -> EUP slot; exact 1/0 mask is restored in wrapper
        inv = pl.reciprocal(jnp.maximum(cnt, 1.0), approx=True)
        mean_ref[...] = (sums * inv).astype(mean_ref.dtype)


def dynamic_voxel_mean(feats, coors, batch_size, grid_size, tv=1024):
    """Scatter-mean of point features into the dense voxel grid (Pallas)."""
    # TODO(synk): at real point counts (50-200k) the points should be bucketed
    #             by voxel tile and streamed per tile instead of keeping one
    #             resident (P,128) block compared against every voxel tile.
    dz, hy, wx = grid_size
    v = batch_size * dz * hy * wx
    p, c = feats.shape
    flat = ((coors[:, 0] * dz + coors[:, 1]) * hy + coors[:, 2]) * wx + coors[:, 3]
    flat = flat.astype(jnp.int32)

    tv = min(tv, _round_up(v, 8))
    vp = _round_up(v, tv)
    ntiles = vp // tv
    pp = _round_up(p, 128)
    cp = 128                                    # one lane-tile of feature cols

    vid = jnp.full((1, pp), -1, jnp.int32).at[0, :p].set(flat)
    featp = jnp.zeros((pp, cp), jnp.bfloat16)
    featp = featp.at[:p, :c].set(feats.astype(jnp.bfloat16))
    featp = featp.at[:p, c].set(1.0)            # ones column -> per-voxel count
    tile_cnt = jnp.zeros((ntiles,), jnp.int32).at[flat // tv].add(1)

    _, vmem_limit = _vmem_budget()
    out = pl.pallas_call(
        functools.partial(_voxel_mean_kernel, c),
        out_shape=jax.ShapeDtypeStruct((vp, cp), jnp.bfloat16),
        grid_spec=pltpu.PrefetchScalarGridSpec(
            num_scalar_prefetch=1,
            grid=(ntiles,),
            in_specs=[_spec((1, pp), lambda i, cnt: (0, 0), invariant=True),
                      _spec((pp, cp), lambda i, cnt: (0, 0), invariant=True)],
            out_specs=pl.BlockSpec((tv, cp), lambda i, cnt: (i, 0)),
        ),
        compiler_params=pltpu.CompilerParams(
            dimension_semantics=("parallel",),
            vmem_limit_bytes=vmem_limit),
    )(tile_cnt, vid, featp)

    out = out[:v]
    mean = out[:, :c].reshape(batch_size, dz, hy, wx, c)        # bf16, 0 if empty
    # count column is cnt * approx_recip(cnt); threshold -> exactly 1.0 / 0.0
    mask = (out[:, c:c + 1] > 0.5).astype(jnp.float32)
    mask = mask.reshape(batch_size, dz, hy, wx, 1)
    return mean, mask


# ----------------------------------------------------------------------------
# Pallas kernel 2: fused  X @ W + bias -> ReLU [-> row mask]
# ----------------------------------------------------------------------------
def _matmul_bn_relu_kernel(tile_cnt_ref, x_ref, w_ref, bias_ref, mask_ref, o_ref):
    i = pl.program_id(0)

    @pl.when(tile_cnt_ref[i] == 0)
    def _():
        o_ref[...] = jnp.zeros_like(o_ref)

    @pl.when(tile_cnt_ref[i] > 0)
    def _():
        y = jnp.dot(x_ref[...], w_ref[...], preferred_element_type=jnp.float32)
        y = jnp.maximum(y + bias_ref[...], 0.0)
        o_ref[...] = (y * mask_ref[...]).astype(o_ref.dtype)


def _matmul_bn_relu_nomask_kernel(x_ref, w_ref, bias_ref, o_ref):
    y = jnp.dot(x_ref[...], w_ref[...], preferred_element_type=jnp.float32)
    o_ref[...] = jnp.maximum(y + bias_ref[...], 0.0).astype(o_ref.dtype)


def fused_matmul_bn_relu(x, w, bias, row_mask=None, out_dtype=jnp.bfloat16,
                         tm_target=2048):
    """y = relu(x @ w + bias) [* row_mask] on the MXU (bf16 in, f32 acc).

    BN scale must already be folded into w.  K stays one full block (no K grid
    axis / accumulator); M is tiled into a few large blocks sized from the
    per-generation VMEM budget.  With a row mask, fully-inactive M tiles are
    skipped via a scalar-prefetched per-tile count.
    """
    m, k = x.shape
    kw, n = w.shape
    assert k == kw

    xb = x.astype(jnp.bfloat16)
    wb = w.astype(jnp.bfloat16)

    if k % 16 != 0:
        # pad K to a full 128 lane tile so X loads stay lane-dense
        kp = _round_up(k, 128)
        xb = jnp.pad(xb, ((0, 0), (0, kp - k)))
        wb = jnp.pad(wb, ((0, kp - k), (0, 0)))
        k = kp

    tile_budget, vmem_limit = _vmem_budget()
    nb, tm, mp = _pick_tiles(m, 2 * k + 6 * n, tm_target, tile_budget)
    if mp != m:
        xb = jnp.pad(xb, ((0, mp - m), (0, 0)))
    bias2 = jnp.asarray(bias, jnp.float32).reshape(1, n)

    cparams = pltpu.CompilerParams(dimension_semantics=("parallel",),
                                   vmem_limit_bytes=vmem_limit)

    if row_mask is None:
        out = pl.pallas_call(
            _matmul_bn_relu_nomask_kernel,
            out_shape=jax.ShapeDtypeStruct((mp, n), out_dtype),
            grid_spec=pltpu.PrefetchScalarGridSpec(
                num_scalar_prefetch=0,
                grid=(nb,),
                in_specs=[pl.BlockSpec((tm, k), lambda i: (i, 0)),
                          _spec((k, n), lambda i: (0, 0), invariant=True),
                          _spec((1, n), lambda i: (0, 0), invariant=True)],
                out_specs=pl.BlockSpec((tm, n), lambda i: (i, 0)),
            ),
            compiler_params=cparams,
        )(xb, wb, bias2)
        return out[:m]

    mk = row_mask.astype(jnp.float32).reshape(m, 1)
    if mp != m:
        mk = jnp.pad(mk, ((0, mp - m), (0, 0)))
    tile_cnt = (mk.reshape(nb, tm).sum(axis=1) > 0).astype(jnp.int32)

    out = pl.pallas_call(
        _matmul_bn_relu_kernel,
        out_shape=jax.ShapeDtypeStruct((mp, n), out_dtype),
        grid_spec=pltpu.PrefetchScalarGridSpec(
            num_scalar_prefetch=1,
            grid=(nb,),
            in_specs=[pl.BlockSpec((tm, k), lambda i, cnt: (i, 0)),
                      _spec((k, n), lambda i, cnt: (0, 0), invariant=True),
                      _spec((1, n), lambda i, cnt: (0, 0), invariant=True),
                      pl.BlockSpec((tm, 1), lambda i, cnt: (i, 0))],
            out_specs=pl.BlockSpec((tm, n), lambda i, cnt: (i, 0)),
        ),
        compiler_params=cparams,
    )(tile_cnt, xb, wb, bias2, mk)
    return out[:m]


# ----------------------------------------------------------------------------
# Pallas kernel 3: fused SubMConv3d (k=3, s=1, p=1) + BN + ReLU + mask
# ----------------------------------------------------------------------------
def _subm_conv_kernel(offsets, halo_r, tile_cnt_ref, x_ref, w_ref, bias_ref,
                      mask_ref, o_ref):
    # offsets : 27 static flat-row offsets of the 3x3x3 taps (dz,dy,dx major)
    # x_ref   : (rows_ext, Cp) bf16 whole padded-flat input (grid-invariant)
    # w_ref   : (27, Cp, N)   bf16 tap weights (BN scale folded in)
    # bias_ref: (1, N) f32 ; mask_ref: (TM, 1) f32 ; o_ref: (TM, N) bf16
    i = pl.program_id(0)
    tm = o_ref.shape[0]

    @pl.when(tile_cnt_ref[i] == 0)
    def _():
        o_ref[...] = jnp.zeros_like(o_ref)

    @pl.when(tile_cnt_ref[i] > 0)
    def _():
        base = pl.multiple_of(i * tm, 128)
        xw = x_ref[pl.ds(base, tm + 2 * halo_r), :]   # aligned window + halos
        acc = jnp.zeros((tm, o_ref.shape[1]), jnp.float32)
        for t, off in enumerate(offsets):             # static 27-tap unroll
            s = halo_r + off
            acc = acc + jnp.dot(xw[s:s + tm, :], w_ref[t],
                                preferred_element_type=jnp.float32)
        y = jnp.maximum(acc + bias_ref[...], 0.0)
        o_ref[...] = (y * mask_ref[...]).astype(o_ref.dtype)


def subm_conv3d_bn_relu(x, mask, w, gamma, beta, tm_target=4096):
    """SubMConv3d + BN(affine) + ReLU on the dense grid, no im2col in HBM.

    The zero-padded volume is flattened to (B*Dp*Hp*Wp, C) rows; in that layout
    every 3x3x3 tap is a constant row shift, so the kernel accumulates 27
    shifted-slab matmuls from one VMEM-resident activation copy.
    """
    # TODO(synk): at real VoxelNet resolutions the activation no longer fits
    #             VMEM as one resident block; the row windows would need
    #             halo'd manual DMA (P4) instead.
    b, d, h, wd, cin = x.shape
    cout = w.shape[-1]
    dp, hp, wp = d + 2, h + 2, wd + 2
    halo = hp * wp + wp + 1
    halo_r = _round_up(halo, 8)
    mrows = b * dp * hp * wp

    cin_p = _round_up(cin, 16)                  # bf16 sublane packing of K
    xp = jnp.pad(x.astype(jnp.bfloat16),
                 ((0, 0), (1, 1), (1, 1), (1, 1), (0, cin_p - cin)))
    xr = xp.reshape(mrows, cin_p)
    maskp = jnp.pad(mask.astype(jnp.float32),
                    ((0, 0), (1, 1), (1, 1), (1, 1), (0, 0))).reshape(mrows, 1)

    tile_budget, vmem_limit = _vmem_budget()
    nb, tm, mp = _pick_tiles(mrows, 2 * cin_p + 6 * cout, tm_target, tile_budget)

    rows_ext = mp + 2 * halo_r
    xr_ext = jnp.zeros((rows_ext, cin_p), jnp.bfloat16)
    xr_ext = xr_ext.at[halo_r:halo_r + mrows].set(xr)
    mrow = jnp.zeros((mp, 1), jnp.float32).at[:mrows].set(maskp)
    tile_cnt = (mrow.reshape(nb, tm).sum(axis=1) > 0).astype(jnp.int32)

    offsets = tuple((dz - 1) * hp * wp + (dy - 1) * wp + (dx - 1)
                    for dz in range(3) for dy in range(3) for dx in range(3))
    w27 = jnp.pad(w.reshape(27, cin, cout), ((0, 0), (0, cin_p - cin), (0, 0)))
    w27 = (w27 * gamma[None, None, :]).astype(jnp.bfloat16)
    bias2 = jnp.asarray(beta, jnp.float32).reshape(1, cout)

    y = pl.pallas_call(
        functools.partial(_subm_conv_kernel, offsets, halo_r),
        out_shape=jax.ShapeDtypeStruct((mp, cout), jnp.bfloat16),
        grid_spec=pltpu.PrefetchScalarGridSpec(
            num_scalar_prefetch=1,
            grid=(nb,),
            in_specs=[_spec((rows_ext, cin_p), lambda i, cnt: (0, 0),
                            invariant=True),
                      _spec((27, cin_p, cout), lambda i, cnt: (0, 0, 0),
                            invariant=True),
                      _spec((1, cout), lambda i, cnt: (0, 0), invariant=True),
                      pl.BlockSpec((tm, 1), lambda i, cnt: (i, 0))],
            out_specs=pl.BlockSpec((tm, cout), lambda i, cnt: (i, 0)),
        ),
        compiler_params=pltpu.CompilerParams(
            dimension_semantics=("parallel",),
            vmem_limit_bytes=vmem_limit),
    )(tile_cnt, xr_ext, w27, bias2, mrow)

    y5 = y[:mrows].reshape(b, dp, hp, wp, cout)[:, 1:-1, 1:-1, 1:-1, :]
    return y5, mask                              # SubM: mask unchanged


# ----------------------------------------------------------------------------
# stride-2 SparseConv3d: im2col glue + fused matmul
# ----------------------------------------------------------------------------
def _im2col3d(x, k, stride, pad):
    b, d, h, w, c = x.shape
    xp = jnp.pad(x, ((0, 0), (pad, pad), (pad, pad), (pad, pad), (0, 0)))
    dp, hp, wp = d + 2 * pad, h + 2 * pad, w + 2 * pad
    do = (dp - k) // stride + 1
    ho = (hp - k) // stride + 1
    wo = (wp - k) // stride + 1
    slices = []
    for ddz in range(k):
        for ddy in range(k):
            for ddx in range(k):
                sl = xp[:, ddz:ddz + (do - 1) * stride + 1:stride,
                           ddy:ddy + (ho - 1) * stride + 1:stride,
                           ddx:ddx + (wo - 1) * stride + 1:stride, :]
                slices.append(sl)
    cols = jnp.concatenate(slices, axis=-1)        # (B, Do, Ho, Wo, k^3*C)
    return cols, (do, ho, wo)


def sparse_conv3d_block(x, mask, w, gamma, beta, stride, submanifold):
    """SubMConv3d / SparseConv3d + BN(affine) + ReLU on the dense grid."""
    if submanifold:
        return subm_conv3d_bn_relu(x, mask, w, gamma, beta)

    # TODO(synk): the 3 stride-2 layers still materialize im2col in HBM; a
    #             strided in-kernel tap accumulation would remove that too.
    b, d, h, wd, cin = x.shape
    k, pad = 3, 1
    cols, (do, ho, wo) = _im2col3d(x.astype(jnp.bfloat16), k, stride, pad)

    out_mask = lax.reduce_window(
        mask, -jnp.inf, lax.max,
        window_dimensions=(1, k, k, k, 1),
        window_strides=(1, stride, stride, stride, 1),
        padding=((0, 0), (pad, pad), (pad, pad), (pad, pad), (0, 0)))
    out_mask = (out_mask > 0).astype(jnp.float32)

    cout = w.shape[-1]
    rows = cols.reshape(b * do * ho * wo, k * k * k * cin)
    w2 = w.reshape(k * k * k * cin, cout) * gamma[None, :]   # fold BN scale
    mrow = out_mask.reshape(b * do * ho * wo)
    y = fused_matmul_bn_relu(rows, w2, beta, mrow, out_dtype=jnp.bfloat16)
    return y.reshape(b, do, ho, wo, cout), out_mask


# ----------------------------------------------------------------------------
# VoxelNet: voxelize -> DynamicSimpleVFE -> SparseEncoder
# ----------------------------------------------------------------------------
BASE_CHANNELS = 16
ENCODER_CHANNELS = ((16, 16), (32, 32, 32), (64, 64, 64), (128, 128, 128))


def voxelize_points(points_list, pc_range, voxel_size, grid_size):
    # TODO(synk): out-of-range points are clipped into boundary voxels instead
    #             of dropped (reference dynamic voxelization drops them); the
    #             per-sample dynamic ranges `r` are ignored.
    dz, hy, wx = grid_size
    mins = jnp.asarray(pc_range[:3], jnp.float32)
    vsz = jnp.asarray(voxel_size, jnp.float32)
    coors = []
    for b, pts in enumerate(points_list):
        ci = jnp.floor((pts[:, :3] - mins) / vsz).astype(jnp.int32)
        ix = jnp.clip(ci[:, 0], 0, wx - 1)
        iy = jnp.clip(ci[:, 1], 0, hy - 1)
        iz = jnp.clip(ci[:, 2], 0, dz - 1)
        bcol = jnp.full((pts.shape[0],), b, jnp.int32)
        coors.append(jnp.stack([bcol, iz, iy, ix], axis=1))   # (batch, z, y, x)
    return jnp.concatenate(points_list, axis=0), jnp.concatenate(coors, axis=0)


def init_voxelnet_params(key, points_features, grid_size, output_channels):
    specs = [(points_features, BASE_CHANNELS, 1, True)]      # conv_input (SubM)
    cin = BASE_CHANNELS
    for i, blocks in enumerate(ENCODER_CHANNELS):
        for j, cout in enumerate(blocks):
            if i != 0 and j == 0:
                specs.append((cin, cout, 2, False))           # SparseConv3d s2
            else:
                specs.append((cin, cout, 1, True))            # SubMConv3d
            cin = cout

    keys = jax.random.split(key, 3 * len(specs) + 3)
    conv3d = []
    ki = 0
    for (ci, co, stride, subm) in specs:
        w = jax.random.normal(keys[ki], (3, 3, 3, ci, co), jnp.float32)
        w = w * (1.0 / jnp.sqrt(27.0 * ci))
        gamma = 1.0 + 0.01 * jax.random.normal(keys[ki + 1], (co,), jnp.float32)
        beta = 0.01 * jax.random.normal(keys[ki + 2], (co,), jnp.float32)
        conv3d.append(dict(w=w, gamma=gamma, beta=beta, stride=stride, subm=subm))
        ki += 3

    # final depth after the three stride-2 stages (conv_out expects C_out*3)
    df = grid_size[0]
    for _ in range(3):
        df = (df - 1) // 2 + 1
    assert df == 3, "grid depth must reduce to 3 (conv_out uses C*3 channels)"
    cin2d = ENCODER_CHANNELS[-1][-1] * df
    w_out = jax.random.normal(keys[ki], (cin2d, output_channels), jnp.float32)
    w_out = w_out * (1.0 / jnp.sqrt(float(cin2d)))
    g_out = 1.0 + 0.01 * jax.random.normal(keys[ki + 1], (output_channels,), jnp.float32)
    b_out = 0.01 * jax.random.normal(keys[ki + 2], (output_channels,), jnp.float32)
    return dict(conv3d=conv3d,
                conv_out=dict(w=w_out, gamma=g_out, beta=b_out))


def voxelnet_forward(params, points_list, ranges,
                     pc_range, voxel_size, grid_size):
    # 1) voxelize
    feats, coors = voxelize_points(points_list, pc_range, voxel_size, grid_size)
    batch_size = len(points_list)                 # == coors[-1, 0] + 1

    # 2) DynamicSimpleVFE (scatter-mean) -> dense voxel grid (bf16) + mask
    x, mask = dynamic_voxel_mean(feats, coors, batch_size, grid_size)

    # 3) SparseEncoder (conv_input + 4 encoder stages), dense-equivalent
    # TODO(synk): consecutive narrow-N SubM layers of a stage could be fused so
    #             16/32-wide intermediates never hit HBM (lane-dense stores).
    for layer in params["conv3d"]:
        x, mask = sparse_conv3d_block(x, mask, layer["w"], layer["gamma"],
                                      layer["beta"], layer["stride"],
                                      layer["subm"])

    # 4) dense() -> view(N, C*D, H, W) -> conv_out (1x1 conv + BN + ReLU)
    b, df, hf, wf, c = x.shape
    # channel index in NCHW view is c*D + d  ->  bring (C, D) adjacent, C outer
    x2 = jnp.transpose(x, (0, 2, 3, 4, 1)).reshape(b, hf, wf, c * df)
    rows = x2.reshape(b * hf * wf, c * df)
    co = params["conv_out"]
    w2 = co["w"] * co["gamma"][None, :]
    y = fused_matmul_bn_relu(rows, w2, co["beta"], row_mask=None,
                             out_dtype=jnp.float32)
    y = y.reshape(b, hf, wf, -1)
    return jnp.transpose(y, (0, 3, 1, 2))          # NCHW, like PyTorch


# ----------------------------------------------------------------------------
if __name__ == "__main__":
    # small configuration: grid (z=17, y=16, x=16), 4 point features
    points_features = 4
    output_channels = 128
    voxel_size = (0.4, 0.4, 0.2)                       # (vx, vy, vz)
    point_cloud_range = (0.0, -3.2, -1.7, 6.4, 3.2, 1.7)
    grid_size = (17, 16, 16)                           # (Dz, Hy, Wx)

    key = jax.random.PRNGKey(0)
    kp, k1, k2 = jax.random.split(key, 3)
    params = init_voxelnet_params(kp, points_features, grid_size,
                                  output_channels)

    def make_points(k, n=128):
        ku, ki = jax.random.split(k)
        lo = jnp.asarray(point_cloud_range[:3], jnp.float32)
        hi = jnp.asarray(point_cloud_range[3:], jnp.float32)
        xyz = lo + (hi - lo - 1e-3) * jax.random.uniform(ku, (n, 3), jnp.float32)
        inten = jax.random.uniform(ki, (n, 1), jnp.float32)
        return jnp.concatenate([xyz, inten], axis=1)

    points = [make_points(k1, 128), make_points(k2, 128)]   # batch of 2 clouds
    ranges = [jnp.asarray(point_cloud_range, jnp.float32)] * 2

    out = voxelnet_forward(params, points, ranges,
                           point_cloud_range, voxel_size, grid_size)
    out = jax.block_until_ready(out)
    assert out.shape == (2, output_channels, 2, 2), out.shape
    assert bool(jnp.all(jnp.isfinite(out)))
    print("KERNEL_OK")
</pallas_src>

<mosaic_0001>
module attributes {stable_mosaic.version = 11 : i64} {
  func.func @k(%arg0: i32, %arg1: memref<8x128xf32, #tpu.memory_space<vmem>>, %arg2: memref<8x128xf32, #tpu.memory_space<vmem>>) attributes {dimension_semantics = [#tpu.dimension_semantics<arbitrary>], iteration_bounds = array<i64: 1>, scalar_prefetch = 0 : i64, scratch_operands = 0 : i64, tpu.core_type = #tpu.core_type<tc>, window_params = [{pipeline_mode = #tpu.pipeline_mode<synchronous>, transform_indices = @transform_0, window_bounds = array<i64: 8, 128>}, {pipeline_mode = #tpu.pipeline_mode<synchronous>, transform_indices = @transform_1, window_bounds = array<i64: 8, 128>}]} {
    %c0 = arith.constant 0 : index
    %c0_0 = arith.constant 0 : index
    %0 = vector.load %arg1[%c0, %c0_0] : memref<8x128xf32, #tpu.memory_space<vmem>>, vector<8x128xf32>
    %c0_1 = arith.constant 0 : index
    %c0_2 = arith.constant 0 : index
    %1 = vector.load %arg2[%c0_1, %c0_2] : memref<8x128xf32, #tpu.memory_space<vmem>>, vector<8x128xf32>
    tpu.vector_store %arg2[%c0_1, %c0_2], %0 {strides = array<i32>} : memref<8x128xf32, #tpu.memory_space<vmem>>, vector<8x128xf32>,
    return
  }
  func.func @transform_0(%arg0: i32) -> (i32, i32) {
    %c0_i32 = arith.constant 0 : i32
    %c0_i32_0 = arith.constant 0 : i32
    %c0_i32_1 = arith.constant 0 : i32
    return %c0_i32, %c0_i32_0 : i32, i32
  }
  func.func @transform_1(%arg0: i32) -> (i32, i32) {
    %c0_i32 = arith.constant 0 : i32
    %c0_i32_0 = arith.constant 0 : i32
    %c0_i32_1 = arith.constant 0 : i32
    return %c0_i32, %c0_i32_0 : i32, i32
  }
}

module attributes {stable_mosaic.version = 11 : i64} {
  func.func @_voxel_mean_kernel(%arg0: i32, %arg1: memref<9xi32, #tpu.memory_space<smem>>, %arg2: memref<1x256xi32, #tpu.memory_space<vmem>>, %arg3: memref<256x128xbf16, #tpu.memory_space<vmem>>, %arg4: memref<1024x128xbf16, #tpu.memory_space<vmem>>) attributes {dimension_semantics = [#tpu.dimension_semantics<parallel>], iteration_bounds = array<i64: 9>, scalar_prefetch = 1 : i64, scratch_operands = 0 : i64, tpu.core_type = #tpu.core_type<tc>, window_params = [{pipeline_mode = #tpu.pipeline_mode<synchronous>, transform_indices = @transform_0, window_bounds = array<i64: 1, 256>}, {pipeline_mode = #tpu.pipeline_mode<synchronous>, transform_indices = @transform_1, window_bounds = array<i64: 256, 128>}, {transform_indices = @transform_2, window_bounds = array<i64: 1024, 128>}]} {
    %0 = arith.index_cast %arg0 : i32 to index
    %1 = memref.load %arg1[%0] : memref<9xi32, #tpu.memory_space<smem>>
    %c0_i32 = arith.constant 0 : i32
    %2 = arith.cmpi eq, %1, %c0_i32 : i32
    %3 = arith.extui %2 : i1 to i32
    %c0_i32_0 = arith.constant 0 : i32
    %4 = arith.cmpi ne, %3, %c0_i32_0 : i32
    scf.if %4 {
      %cst = arith.constant 0.000000e+00 : bf16
      %10 = vector.broadcast %cst : bf16 to vector<1024x128xbf16>
      %c0 = arith.constant 0 : index
      %c0_3 = arith.constant 0 : index
      %11 = vector.load %arg4[%c0, %c0_3] : memref<1024x128xbf16, #tpu.memory_space<vmem>>, vector<1024x128xbf16>
      tpu.vector_store %arg4[%c0, %c0_3], %10 {strides = array<i32>} : memref<1024x128xbf16, #tpu.memory_space<vmem>>, vector<1024x128xbf16>,
    } else {
    }
    %5 = arith.index_cast %arg0 : i32 to index
    %6 = memref.load %arg1[%5] : memref<9xi32, #tpu.memory_space<smem>>
    %c0_i32_1 = arith.constant 0 : i32
    %7 = arith.cmpi sgt, %6, %c0_i32_1 : i32
    %8 = arith.extui %7 : i1 to i32
    %c0_i32_2 = arith.constant 0 : i32
    %9 = arith.cmpi ne, %8, %c0_i32_2 : i32
    scf.if %9 {
      %c0 = arith.constant 0 : index
      %c0_3 = arith.constant 0 : index
      %10 = vector.load %arg2[%c0, %c0_3] : memref<1x256xi32, #tpu.memory_space<vmem>>, vector<1x256xi32>
      %c1024_i32 = arith.constant 1024 : i32
      %11 = arith.muli %arg0, %c1024_i32 : i32
      %12 = vector.broadcast %11 : i32 to vector<1x256xi32>
      %13 = arith.subi %10, %12 : vector<1x256xi32>
      %14 = tpu.iota {dimensions = array<i32: 0>} : vector<1024x256xi32>
      %15 = vector.broadcast %13 : vector<1x256xi32> to vector<1024x256xi32>
      %16 = arith.cmpi eq, %14, %15 : vector<1024x256xi32>
      %17 = arith.extui %16 : vector<1024x256xi1> to vector<1024x256xi32>
      %18 = arith.sitofp %17 : vector<1024x256xi32> to vector<1024x256xf32>
      %19 = arith.truncf %18 : vector<1024x256xf32> to vector<1024x256xbf16>
      %c0_4 = arith.constant 0 : index
      %c0_5 = arith.constant 0 : index
      %20 = vector.load %arg3[%c0_4, %c0_5] : memref<256x128xbf16, #tpu.memory_space<vmem>>, vector<256x128xbf16>
      %cst = arith.constant dense<0.000000e+00> : vector<1024x128xf32>
      %21 = tpu.matmul %19, %20, %cst {dimension_numbers = #tpu.dot_dimension_numbers<[1], [0], [0], [1], [0, 0, 1, 1], [], []>} : vector<1024x256xbf16>, vector<256x128xbf16>, vector<1024x128xf32> -> vector<1024x128xf32>
      %22 = vector.extract_strided_slice %21 {offsets = [0, 4], sizes = [1024, 1], strides = [1, 1]} : vector<1024x128xf32> to vector<1024x1xf32>
      %cst_6 = arith.constant 1.000000e+00 : f32
      %23 = vector.broadcast %cst_6 : f32 to vector<1024x1xf32>
      %24 = arith.maximumf %22, %23 : vector<1024x1xf32>
      %25 = tpu.reciprocal %24 {approx = true} : vector<1024x1xf32> -> vector<1024x1xf32>
      %26 = vector.broadcast %25 : vector<1024x1xf32> to vector<1024x128xf32>
      %27 = arith.mulf %21, %26 : vector<1024x128xf32>
      %28 = arith.truncf %27 : vector<1024x128xf32> to vector<1024x128xbf16>
      %c0_7 = arith.constant 0 : index
      %c0_8 = arith.constant 0 : index
      %29 = vector.load %arg4[%c0_7, %c0_8] : memref<1024x128xbf16, #tpu.memory_space<vmem>>, vector<1024x128xbf16>
      tpu.vector_store %arg4[%c0_7, %c0_8], %28 {strides = array<i32>} : memref<1024x128xbf16, #tpu.memory_space<vmem>>, vector<1024x128xbf16>,
    } else {
    }
    return
  }
  func.func @transform_0(%arg0: i32, %arg1: memref<9xi32, #tpu.memory_space<smem>>) -> (i32, i32) {
    %c0_i32 = arith.constant 0 : i32
    %c0_i32_0 = arith.constant 0 : i32
    %c0_i32_1 = arith.constant 0 : i32
    return %c0_i32, %c0_i32_0 : i32, i32
  }
  func.func @transform_1(%arg0: i32, %arg1: memref<9xi32, #tpu.memory_space<smem>>) -> (i32, i32) {
    %c0_i32 = arith.constant 0 : i32
    %c0_i32_0 = arith.constant 0 : i32
    %c0_i32_1 = arith.constant 0 : i32
    return %c0_i32, %c0_i32_0 : i32, i32
  }
  func.func @transform_2(%arg0: i32, %arg1: memref<9xi32, #tpu.memory_space<smem>>) -> (i32, i32) {
    %c0_i32 = arith.constant 0 : i32
    %c0_i32_0 = arith.constant 0 : i32
    return %arg0, %c0_i32 : i32, i32
  }
}

</mosaic_0001>

<bundles_post_ra>
// kernel: tpu_custom_call.1
= control target key start
LH: loop header
LB: loop body
LE: loop exit
PB: predicated region body
PF: predicated region fallthrough
CT: control target
= control target key end

     0   :  { %6 = vsyncpa [#allocation3], 0  ;;  %s124_s0 = inlined_call_operand.hbm [shape: f32[8,128], index: 0, kind: input, shape index: {}]   ;;  %s125_s1 = inlined_call_operand.hbm [shape: f32[8,128], index: 1, kind: output, shape index: {}]  }
   0x1   :  { %7 = vsyncpa [#allocation4], 0  ;;  %s88_s6 = smov [#allocation2]   ;;  %s40_s10 = scalar_lea.hbm %s124_s0, 128 }
   0x2   :  { %s14_s7 = sshll.u32 %s88_s6, 4  ;;  %p41_p0 = scmp.ne.s32.totalorder %s124_s0, %s40_s10  ;;  %s15_s7 = int_to_ptr.vmem [resolvable:$true] %s14_s7 }
   0x3   :  { %p44_p1 = scmp.lt.u32.totalorder %s40_s10, %s124_s0 }
   0x5   :  { %p46_p2 = pnand %p44_p1, %p41_p0 }
   0x7   :  { %49 = shalt.err (!%p46_p2)
}
   0x8   :  { %s50_s15 = scalar_lea.vmem %s15_s7, 128  ;;  %p55_p4 = scmp.lt.s32.totalorder %s15_s7, %s15_s7 }
   0x9   :  { %p51_p3 = scmp.ne.s32.totalorder %s15_s7, %s50_s15  ;;  %p56_p5 = scmp.lt.s32.totalorder %s50_s15, %s50_s15 }
   0xb   :  { %p57_p6 = por %p56_p5, %p55_p4 }
   0xd   :  { %p58_p7 = pnand %p57_p6, %p51_p3 }
   0xf   :  { %61 = shalt.err (!%p58_p7)
}
  0x10   :  { %17 = dma.hbm_to_vmem [thread:$0]  %s124_s0, 128, %s15_s7, [#allocation3]  }
  0x11   :  { %84 = dma.done.wait [#allocation3], 128  }
  0x12   :  { %85 = vsyncadd [#allocation3], 4294967168  ;;  %s89_s18 = smov [#allocation5]   ;;  %v21_v0 = vld [vmem:[#allocation2] sm:$0xff] }
  0x13   :  { %s29_s19 = sshll.u32 %s89_s18, 4  ;;  %22 = vst [vmem:[#allocation5] sm:$0xff] %v21_v0  ;;  %s30_s19 = int_to_ptr.vmem [resolvable:$true] %s29_s19 }
  0x14   :  { %s62_s20 = scalar_lea.vmem %s30_s19, 128  ;;  %p67_p9 = scmp.lt.s32.totalorder %s30_s19, %s30_s19 }
  0x15   :  { %p63_p8 = scmp.ne.s32.totalorder %s30_s19, %s62_s20  ;;  %p68_p10 = scmp.lt.s32.totalorder %s62_s20, %s62_s20 }
  0x17   :  { %p69_p11 = por %p68_p10, %p67_p9 }
  0x19   :  { %p70_p12 = pnand %p69_p11, %p63_p8 }
  0x1b   :  { %73 = shalt.err (!%p70_p12)
}
  0x1c   :  { %s74_s23 = scalar_lea.hbm %s125_s1, 128 }
  0x1d   :  { %p75_p13 = scmp.ne.s32.totalorder %s125_s1, %s74_s23  ;;  %p78_p0 = scmp.lt.u32.totalorder %s74_s23, %s125_s1 }
  0x1f   :  { %p80_p1 = pnand %p78_p0, %p75_p13 }
  0x21   :  { %83 = shalt.err (!%p80_p1)
}
  0x22   :  { %32 = dma.vmem_to_hbm [thread:$0]  %s30_s19, 128, %s125_s1, [#allocation4]  }
  0x23   :  { %86 = dma.done.wait [#allocation4], 128  }
  0x24   :  { %87 = vsyncadd [#allocation4], 4294967168 }
  0x25   :  { %36 = vsyncpa [#allocation3], 1 }
  0x26   :  { %37 = vsyncpa [#allocation4], 1 }

// kernel: tpu_custom_call.1
= control target key start
LH: loop header
LB: loop body
LE: loop exit
PB: predicated region body
PF: predicated region fallthrough
CT: control target
= control target key end

     0   :  { %s7211_s0 = inlined_call_operand.hbm [shape: s32[9], index: 0, kind: input, shape index: {}]   ;;  %s7212_s1 = inlined_call_operand.hbm [shape: s32[1,256], index: 1, kind: input, shape index: {}]   ;;  %s7213_s2 = inlined_call_operand.hbm [shape: bf16[256,128], index: 2, kind: input, shape index: {}]   ;;  %s7214_s3 = inlined_call_operand.hbm [shape: bf16[9216,128], index: 3, kind: output, shape index: {}]  }
   0x1   :  { %s5314_s14 = scalar_lea.hbm %s7211_s0, 16 }
   0x2   :  { %p5315_p0 = scmp.ne.s32.totalorder %s7211_s0, %s5314_s14  ;;  %p5318_p1 = scmp.lt.u32.totalorder %s5314_s14, %s7211_s0 }
   0x4   :  { %p5320_p2 = pnand %p5318_p1, %p5315_p0 }
   0x6   :  { %5323 = shalt.err (!%p5320_p2)  }
   0x7   :  { %s5454_s19 = smov [#allocation3]  }
   0x8   :  { %9 = dma.hbm_to_smem %s7211_s0, 16, %s5454_s19, [#allocation2] }
   0x9   :  { %5424 = dma.done.wait [#allocation2], 16 }
   0xa   :  { %5425 = vsyncadd [#allocation2], 4294967280 }
   0xb   :  { %11 = sfence }
   0xc   :  { %12 = vsyncpa [#allocation5], 0 }
   0xd   :  { %13 = vsyncpa [#allocation8], 0 }
   0xe   :  { %14 = vsyncpa [#allocation6], 0 }
   0xf   :  { %16 = vsyncpa [#allocation6 + $0x1], 0  ;;  %s5498_s22 = smov 0   ;;  %s5500_s23 = smov 0  }
  0x10   :  { %s5502_s24 = smov 0   ;;  %s5504_s25 = smov 0  }
  0x11 LB: > { %s5519_s0 = sadd.s32 4294967295, %s5452_s25   ;;  %s3755_s26 = sadd.s32 4294967294, %s5452_s25   ;;  %s5452_s25 = sphi %s5504_s25, %s7358_s25   ;;  %s5448_s24 = sphi %s5502_s24, %s7357_s24   ;;  %s5444_s23 = sphi %s5500_s23, %s7356_s23   ;;  %s5440_s22 = sphi %s5498_s22, %s7355_s22  }
  0x12   : > { %s5523_s27 = sadd.s32 1, %s5452_s25   ;;  %s71_s28 = sadd.s32 1, %s5448_s24 }
  0x13   : > { %s68_s29 = ssub.s32 %s5452_s25, %s5523_s27  ;;  %p81_p3 = scmp.ne.s32.totalorder %s5448_s24, %s5444_s23 }
  0x14   : > { %p69_p4 = scmp.eq.s32.totalorder %s68_s29, 0  ;;  %p82_p5 = scmp.eq.s32.totalorder %s5519_s0, 8 }
  0x15   : > { %p87_p6 = scmp.ne.s32.totalorder %s5444_s23, %s5440_s22  ;;  %p88_p7 = scmp.eq.s32.totalorder %s3755_s26, 8 }
  0x16   : > { %s5534_s30 = scalar_select %p69_p4, %s5448_s24, %s71_s28  }
  0x17   : > { %p5536_p8 = por %p82_p5, %p81_p3  ;;  %p5540_p9 = por %p88_p7, %p87_p6 }
  0x18   : > { %p3756_p10 = scmp.ge.s32.totalorder %s5452_s25, 1  ;;  %p95_p11 = scmp.lt.s32.totalorder %s5452_s25, 10 }
  0x19   : > { %s7256_s4 = scalar_select %p5536_p8, 1, 0 }
  0x1a   : > { %s7257_s5 = scalar_select %p5540_p9, 1, 0 }
  0x1b   : > { %p7215_p12 = scmp.eq.s32.totalorder %s5519_s0, 0  ;;  %p5547_p13 = pnand %p3756_p10, %p95_p11 }
  0x1c   : > { %s5455_s7 = smov [#allocation4]   ;;  %s5456_s9 = smov [#allocation7]  }
  0x1d   : > { %s7258_s6 = scalar_select %p5547_p13, 1, 0 }
  0x1e   : > { %s108_s8 = sshll.u32 %s5455_s7, 4  ;;  %p4981_p0 = pneg %p5547_p13  ;;  %s109_s8 = int_to_ptr.vmem [resolvable:$true] %s108_s8 }
  0x1f   : > { %s118_s10 = sshll.u32 %s5456_s9, 4  ;;  %s5324_s14 = scalar_lea.hbm %s7212_s1, 32  ;;  %s5559_s10 = int_to_ptr.vmem [resolvable:$true] %s118_s10 }
  0x20   : > { %p5555_p1 = pnand %p7215_p12, %p4981_p0  ;;  %p5325_p2 = scmp.ne.s32.totalorder %s7212_s1, %s5324_s14 }
  0x21   : > { %p5331_p6 = scmp.lt.u32.totalorder %s5324_s14, %s7212_s1 }
  0x22   : > { %p5326_p3 = pneg %p5555_p1 }
  0x24   : > { %p5327_p4 = pnand %p5326_p3, %p5325_p2 }
  0x26   : > { %p5328_p5 = pneg %p5327_p4 }
  0x28   : > { %p5333_p7 = pnand %p5331_p6, %p5328_p5 }
  0x2a   : > { %5336 = shalt.err (!%p5333_p7)
}
  0x2b   : > { %s5337_s19 = scalar_lea.vmem %s109_s8, 32  ;;  %p5345_p12 = scmp.lt.s32.totalorder %s109_s8, %s109_s8 }
  0x2c   : > { %p5338_p10 = scmp.ne.s32.totalorder %s109_s8, %s5337_s19  ;;  %p5346_p9 = scmp.lt.s32.totalorder %s5337_s19, %s5337_s19 }
  0x2e   : > { %p5340_p11 = pnand %p5338_p10, %p5326_p3  ;;  %p5347_p8 = por %p5346_p9, %p5345_p12 }
  0x30   : > { %p5341_p0 = pneg %p5340_p11 }
  0x32   : > { %p5348_p13 = pnand %p5347_p8, %p5341_p0 }
  0x34   : > { %5351 = shalt.err (!%p5348_p13)
}
  0x35   : > { %4984 = dma.hbm_to_vmem [thread:$0]  (!%p5555_p1), %s7212_s1, 32, %s109_s8, [#allocation5]  }
  0x36   : > { %s5352_s29 = scalar_lea.hbm %s7213_s2, 2048 }
  0x37   : > { %p5353_p2 = scmp.ne.s32.totalorder %s7213_s2, %s5352_s29  ;;  %p5359_p12 = scmp.lt.u32.totalorder %s5352_s29, %s7213_s2 }
  0x39   : > { %p5355_p9 = pnand %p5353_p2, %p5326_p3 }
  0x3b   : > { %p5356_p8 = pneg %p5355_p9 }
  0x3d   : > { %p5361_p13 = pnand %p5359_p12, %p5356_p8 }
  0x3f   : > { %5364 = shalt.err (!%p5361_p13)
}
  0x40   : > { %s5365_s8 = scalar_lea.vmem %s5559_s10, 2048  ;;  %p5373_p7 = scmp.lt.s32.totalorder %s5559_s10, %s5559_s10 }
  0x41   : > { %p5366_p4 = scmp.ne.s32.totalorder %s5559_s10, %s5365_s8  ;;  %p5374_p10 = scmp.lt.s32.totalorder %s5365_s8, %s5365_s8 }
  0x43   : > { %p5368_p5 = pnand %p5366_p4, %p5326_p3  ;;  %p5375_p11 = por %p5374_p10, %p5373_p7 }
  0x45   : > { %p5369_p6 = pneg %p5368_p5 }
  0x47   : > { %p5376_p0 = pnand %p5375_p11, %p5369_p6 }
  0x49   : > { %5379 = shalt.err (!%p5376_p0)
}
  0x4a   : > { %s5457_s14 = smov 64   ;;  %s5458_s15 = smov 4  }
  0x4b   : > { %4987 = dma.hbm_to_vmem [thread:$0]  (!%p5555_p1), %s7213_s2, 2048, %s5559_s10, [#allocation8], %s5457_s14, %s5457_s14, %s5458_s15  }
  0x4c   : > { %p7260_p2 = scmp.ne.s32.totalorder %s7258_s6, 0 }
  0x4d   : > { %p7261_p3 = scmp.eq.s32.totalorder (!%p7260_p2), %s5519_s0, 0 }
  0x4e   : > { %134 = sbr.rel (%p7260_p2) target bundleno = 882 (0x372), region = 28 }
  0x55   : > { %5427 = dma.done.wait (%p7261_p3), [#allocation5], 32   ;;  %p7262_p9 = pmov %p7261_p3 }
  0x56   : > { %p7263_p8 = pmov %p7261_p3 }
  0x57   : > { %5429 = vsyncadd (%p7262_p9), [#allocation5], 4294967264 }
  0x58   : > { %5431 = dma.done.wait (%p7263_p8), [#allocation8], 2048   ;;  %p7264_p12 = pmov %p7261_p3 }
  0x59   : > { %s152_s11 = sand.u32 1, %s5444_s23   ;;  %s157_s10 = sld [smem:[#allocation3 + %s5519_s0]] }
  0x5a   : > { %5433 = vsyncadd (%p7264_p12), [#allocation8], 4294965248  ;;  %s3762_s6 = sshll.u32 %s152_s11, 9 }
  0x5b   : > { %s5622_s18 = scalar_lea.vmem [#allocation9], %s3762_s6 }
  0x5f   : > { %p3763_p1 = scmp.ne.s32.totalorder %s157_s10, 0 }
  0x60   : > { %v5459_v0 = vmov (!%p3763_p1), 0  }
  0x61   : > { %161 = sbr.rel (%p3763_p1) target bundleno = 161 (0xa1), region = 40  ;;  %162 = vst [vmem:[%s5622_s18] sm:$0xf] (!%p3763_p1), %v5459_v0  ;;  %163 = vst [vmem:[%s5622_s18 + $0x4] sm:$0xf] (!%p3763_p1), %v5459_v0 }
  0x62   : > { %164 = vst [vmem:[%s5622_s18 + $0x8] sm:$0xf] (!%p3763_p1), %v5459_v0  ;;  %165 = vst [vmem:[%s5622_s18 + $0xc] sm:$0xf] (!%p3763_p1), %v5459_v0 }
  0x63   : > { %166 = vst [vmem:[%s5622_s18 + $0x10] sm:$0xf] (!%p3763_p1), %v5459_v0  ;;  %167 = vst [vmem:[%s5622_s18 + $0x14] sm:$0xf] (!%p3763_p1), %v5459_v0 }
  0x64   : > { %168 = vst [vmem:[%s5622_s18 + $0x18] sm:$0xf] (!%p3763_p1), %v5459_v0  ;;  %169 = vst [vmem:[%s5622_s18 + $0x1c] sm:$0xf] (!%p3763_p1), %v5459_v0 }
  0x65   : > { %170 = vst [vmem:[%s5622_s18 + $0x20] sm:$0xf] (!%p3763_p1), %v5459_v0  ;;  %171 = vst [vmem:[%s5622_s18 + $0x24] sm:$0xf] (!%p3763_p1), %v5459_v0 }
  0x66   : > { %172 = vst [vmem:[%s5622_s18 + $0x28] sm:$0xf] (!%p3763_p1), %v5459_v0  ;;  %173 = vst [vmem:[%s5622_s18 + $0x2c] sm:$0xf] (!%p3763_p1), %v5459_v0 }
  0x67   : > { %174 = vst [vmem:[%s5622_s18 + $0x30] sm:$0xf] (!%p3763_p1), %v5459_v0  ;;  %175 = vst [vmem:[%s5622_s18 + $0x34] sm:$0xf] (!%p3763_p1), %v5459_v0 }
  0x68   : > { %176 = vst [vmem:[%s5622_s18 + $0x38] sm:$0xf] %v5459_v0  ;;  %177 = vst [vmem:[%s5622_s18 + $0x3c] sm:$0xf] %v5459_v0 }
  0x69   : > { %178 = vst [vmem:[%s5622_s18 + $0x40] sm:$0xf] %v5459_v0  ;;  %179 = vst [vmem:[%s5622_s18 + $0x44] sm:$0xf] %v5459_v0 }
  0x6a   : > { %180 = vst [vmem:[%s5622_s18 + $0x48] sm:$0xf] %v5459_v0  ;;  %181 = vst [vmem:[%s5622_s18 + $0x4c] sm:$0xf] %v5459_v0 }
  0x6b   : > { %182 = vst [vmem:[%s5622_s18 + $0x50] sm:$0xf] %v5459_v0  ;;  %183 = vst [vmem:[%s5622_s18 + $0x54] sm:$0xf] %v5459_v0 }
  0x6c   : > { %184 = vst [vmem:[%s5622_s18 + $0x58] sm:$0xf] %v5459_v0  ;;  %185 = vst [vmem:[%s5622_s18 + $0x5c] sm:$0xf] %v5459_v0 }
  0x6d   : > { %186 = vst [vmem:[%s5622_s18 + $0x60] sm:$0xf] %v5459_v0  ;;  %187 = vst [vmem:[%s5622_s18 + $0x64] sm:$0xf] %v5459_v0 }
  0x6e   : > { %188 = vst [vmem:[%s5622_s18 + $0x68] sm:$0xf] %v5459_v0  ;;  %189 = vst [vmem:[%s5622_s18 + $0x6c] sm:$0xf] %v5459_v0 }
  0x6f   : > { %190 = vst [vmem:[%s5622_s18 + $0x70] sm:$0xf] %v5459_v0  ;;  %191 = vst [vmem:[%s5622_s18 + $0x74] sm:$0xf] %v5459_v0 }
  0x70   : > { %192 = vst [vmem:[%s5622_s18 + $0x78] sm:$0xf] %v5459_v0  ;;  %193 = vst [vmem:[%s5622_s18 + $0x7c] sm:$0xf] %v5459_v0 }
  0x71   : > { %194 = vst [vmem:[%s5622_s18 + $0x80] sm:$0xf] %v5459_v0  ;;  %195 = vst [vmem:[%s5622_s18 + $0x84] sm:$0xf] %v5459_v0 }
  0x72   : > { %196 = vst [vmem:[%s5622_s18 + $0x88] sm:$0xf] %v5459_v0  ;;  %197 = vst [vmem:[%s5622_s18 + $0x8c] sm:$0xf] %v5459_v0 }
  0x73   : > { %198 = vst [vmem:[%s5622_s18 + $0x90] sm:$0xf] %v5459_v0  ;;  %199 = vst [vmem:[%s5622_s18 + $0x94] sm:$0xf] %v5459_v0 }
  0x74   : > { %200 = vst [vmem:[%s5622_s18 + $0x98] sm:$0xf] %v5459_v0  ;;  %201 = vst [vmem:[%s5622_s18 + $0x9c] sm:$0xf] %v5459_v0 }
  0x75   : > { %202 = vst [vmem:[%s5622_s18 + $0xa0] sm:$0xf] %v5459_v0  ;;  %203 = vst [vmem:[%s5622_s18 + $0xa4] sm:$0xf] %v5459_v0 }
  0x76   : > { %204 = vst [vmem:[%s5622_s18 + $0xa8] sm:$0xf] %v5459_v0  ;;  %205 = vst [vmem:[%s5622_s18 + $0xac] sm:$0xf] %v5459_v0 }
  0x77   : > { %206 = vst [vmem:[%s5622_s18 + $0xb0] sm:$0xf] %v5459_v0  ;;  %207 = vst [vmem:[%s5622_s18 + $0xb4] sm:$0xf] %v5459_v0 }
  0x78   : > { %208 = vst [vmem:[%s5622_s18 + $0xb8] sm:$0xf] %v5459_v0  ;;  %209 = vst [vmem:[%s5622_s18 + $0xbc] sm:$0xf] %v5459_v0 }
  0x79   : > { %210 = vst [vmem:[%s5622_s18 + $0xc0] sm:$0xf] %v5459_v0  ;;  %211 = vst [vmem:[%s5622_s18 + $0xc4] sm:$0xf] %v5459_v0 }
  0x7a   : > { %212 = vst [vmem:[%s5622_s18 + $0xc8] sm:$0xf] %v5459_v0  ;;  %213 = vst [vmem:[%s5622_s18 + $0xcc] sm:$0xf] %v5459_v0 }
  0x7b   : > { %214 = vst [vmem:[%s5622_s18 + $0xd0] sm:$0xf] %v5459_v0  ;;  %215 = vst [vmem:[%s5622_s18 + $0xd4] sm:$0xf] %v5459_v0 }
  0x7c   : > { %216 = vst [vmem:[%s5622_s18 + $0xd8] sm:$0xf] %v5459_v0  ;;  %217 = vst [vmem:[%s5622_s18 + $0xdc] sm:$0xf] %v5459_v0 }
  0x7d   : > { %218 = vst [vmem:[%s5622_s18 + $0xe0] sm:$0xf] %v5459_v0  ;;  %219 = vst [vmem:[%s5622_s18 + $0xe4] sm:$0xf] %v5459_v0 }
  0x7e   : > { %220 = vst [vmem:[%s5622_s18 + $0xe8] sm:$0xf] %v5459_v0  ;;  %221 = vst [vmem:[%s5622_s18 + $0xec] sm:$0xf] %v5459_v0 }
  0x7f   : > { %222 = vst [vmem:[%s5622_s18 + $0xf0] sm:$0xf] %v5459_v0  ;;  %223 = vst [vmem:[%s5622_s18 + $0xf4] sm:$0xf] %v5459_v0 }
  0x80   : > { %224 = vst [vmem:[%s5622_s18 + $0xf8] sm:$0xf] %v5459_v0  ;;  %225 = vst [vmem:[%s5622_s18 + $0xfc] sm:$0xf] %v5459_v0 }
  0x81   : > { %226 = vst [vmem:[%s5622_s18 + $0x100] sm:$0xf] %v5459_v0  ;;  %227 = vst [vmem:[%s5622_s18 + $0x104] sm:$0xf] %v5459_v0 }
  0x82   : > { %228 = vst [vmem:[%s5622_s18 + $0x108] sm:$0xf] %v5459_v0  ;;  %229 = vst [vmem:[%s5622_s18 + $0x10c] sm:$0xf] %v5459_v0 }
  0x83   : > { %230 = vst [vmem:[%s5622_s18 + $0x110] sm:$0xf] %v5459_v0  ;;  %231 = vst [vmem:[%s5622_s18 + $0x114] sm:$0xf] %v5459_v0 }
  0x84   : > { %232 = vst [vmem:[%s5622_s18 + $0x118] sm:$0xf] %v5459_v0  ;;  %233 = vst [vmem:[%s5622_s18 + $0x11c] sm:$0xf] %v5459_v0 }
  0x85   : > { %234 = vst [vmem:[%s5622_s18 + $0x120] sm:$0xf] %v5459_v0  ;;  %235 = vst [vmem:[%s5622_s18 + $0x124] sm:$0xf] %v5459_v0 }
  0x86   : > { %236 = vst [vmem:[%s5622_s18 + $0x128] sm:$0xf] %v5459_v0  ;;  %237 = vst [vmem:[%s5622_s18 + $0x12c] sm:$0xf] %v5459_v0 }
  0x87   : > { %238 = vst [vmem:[%s5622_s18 + $0x130] sm:$0xf] %v5459_v0  ;;  %239 = vst [vmem:[%s5622_s18 + $0x134] sm:$0xf] %v5459_v0 }
  0x88   : > { %240 = vst [vmem:[%s5622_s18 + $0x138] sm:$0xf] %v5459_v0  ;;  %241 = vst [vmem:[%s5622_s18 + $0x13c] sm:$0xf] %v5459_v0 }
  0x89   : > { %242 = vst [vmem:[%s5622_s18 + $0x140] sm:$0xf] %v5459_v0  ;;  %243 = vst [vmem:[%s5622_s18 + $0x144] sm:$0xf] %v5459_v0 }
  0x8a   : > { %244 = vst [vmem:[%s5622_s18 + $0x148] sm:$0xf] %v5459_v0  ;;  %245 = vst [vmem:[%s5622_s18 + $0x14c] sm:$0xf] %v5459_v0 }
  0x8b   : > { %246 = vst [vmem:[%s5622_s18 + $0x150] sm:$0xf] %v5459_v0  ;;  %247 = vst [vmem:[%s5622_s18 + $0x154] sm:$0xf] %v5459_v0 }
  0x8c   : > { %248 = vst [vmem:[%s5622_s18 + $0x158] sm:$0xf] %v5459_v0  ;;  %249 = vst [vmem:[%s5622_s18 + $0x15c] sm:$0xf] %v5459_v0 }
  0x8d   : > { %250 = vst [vmem:[%s5622_s18 + $0x160] sm:$0xf] %v5459_v0  ;;  %251 = vst [vmem:[%s5622_s18 + $0x164] sm:$0xf] %v5459_v0 }
  0x8e   : > { %252 = vst [vmem:[%s5622_s18 + $0x168] sm:$0xf] %v5459_v0  ;;  %253 = vst [vmem:[%s5622_s18 + $0x16c] sm:$0xf] %v5459_v0 }
  0x8f   : > { %254 = vst [vmem:[%s5622_s18 + $0x170] sm:$0xf] %v5459_v0  ;;  %255 = vst [vmem:[%s5622_s18 + $0x174] sm:$0xf] %v5459_v0 }
  0x90   : > { %256 = vst [vmem:[%s5622_s18 + $0x178] sm:$0xf] %v5459_v0  ;;  %257 = vst [vmem:[%s5622_s18 + $0x17c] sm:$0xf] %v5459_v0 }
  0x91   : > { %258 = vst [vmem:[%s5622_s18 + $0x180] sm:$0xf] %v5459_v0  ;;  %259 = vst [vmem:[%s5622_s18 + $0x184] sm:$0xf] %v5459_v0 }
  0x92   : > { %260 = vst [vmem:[%s5622_s18 + $0x188] sm:$0xf] %v5459_v0  ;;  %261 = vst [vmem:[%s5622_s18 + $0x18c] sm:$0xf] %v5459_v0 }
  0x93   : > { %262 = vst [vmem:[%s5622_s18 + $0x190] sm:$0xf] %v5459_v0  ;;  %263 = vst [vmem:[%s5622_s18 + $0x194] sm:$0xf] %v5459_v0 }
  0x94   : > { %264 = vst [vmem:[%s5622_s18 + $0x198] sm:$0xf] %v5459_v0  ;;  %265 = vst [vmem:[%s5622_s18 + $0x19c] sm:$0xf] %v5459_v0 }
  0x95   : > { %266 = vst [vmem:[%s5622_s18 + $0x1a0] sm:$0xf] %v5459_v0  ;;  %267 = vst [vmem:[%s5622_s18 + $0x1a4] sm:$0xf] %v5459_v0 }
  0x96   : > { %268 = vst [vmem:[%s5622_s18 + $0x1a8] sm:$0xf] %v5459_v0  ;;  %269 = vst [vmem:[%s5622_s18 + $0x1ac] sm:$0xf] %v5459_v0 }
  0x97   : > { %270 = vst [vmem:[%s5622_s18 + $0x1b0] sm:$0xf] %v5459_v0  ;;  %271 = vst [vmem:[%s5622_s18 + $0x1b4] sm:$0xf] %v5459_v0 }
  0x98   : > { %272 = vst [vmem:[%s5622_s18 + $0x1b8] sm:$0xf] %v5459_v0  ;;  %273 = vst [vmem:[%s5622_s18 + $0x1bc] sm:$0xf] %v5459_v0 }
  0x99   : > { %274 = vst [vmem:[%s5622_s18 + $0x1c0] sm:$0xf] %v5459_v0  ;;  %275 = vst [vmem:[%s5622_s18 + $0x1c4] sm:$0xf] %v5459_v0 }
  0x9a   : > { %276 = vst [vmem:[%s5622_s18 + $0x1c8] sm:$0xf] %v5459_v0  ;;  %277 = vst [vmem:[%s5622_s18 + $0x1cc] sm:$0xf] %v5459_v0 }
  0x9b   : > { %278 = vst [vmem:[%s5622_s18 + $0x1d0] sm:$0xf] %v5459_v0  ;;  %279 = vst [vmem:[%s5622_s18 + $0x1d4] sm:$0xf] %v5459_v0 }
  0x9c   : > { %280 = vst [vmem:[%s5622_s18 + $0x1d8] sm:$0xf] %v5459_v0  ;;  %281 = vst [vmem:[%s5622_s18 + $0x1dc] sm:$0xf] %v5459_v0 }
  0x9d   : > { %282 = vst [vmem:[%s5622_s18 + $0x1e0] sm:$0xf] %v5459_v0  ;;  %283 = vst [vmem:[%s5622_s18 + $0x1e4] sm:$0xf] %v5459_v0 }
  0x9e   : > { %284 = vst [vmem:[%s5622_s18 + $0x1e8] sm:$0xf] %v5459_v0  ;;  %285 = vst [vmem:[%s5622_s18 + $0x1ec] sm:$0xf] %v5459_v0 }
  0x9f   : > { %286 = vst [vmem:[%s5622_s18 + $0x1f0] sm:$0xf] %v5459_v0  ;;  %287 = vst [vmem:[%s5622_s18 + $0x1f4] sm:$0xf] %v5459_v0 }
  0xa0   : > { %288 = vst [vmem:[%s5622_s18 + $0x1f8] sm:$0xf] %v5459_v0  ;;  %289 = vst [vmem:[%s5622_s18 + $0x1fc] sm:$0xf] %v5459_v0 }
  0xa1 PF: > { %s290_s19 = sld [smem:[#allocation3 + %s5519_s0]] }
  0xa7   : > { %p3764_p13 = scmp.le.s32.totalorder %s290_s19, 0 }
  0xa9   : > { %294 = sbr.rel (%p3764_p13) target bundleno = 856 (0x358), region = 44 }
  0xb0   : > { %v5042_v1 = vld [vmem:[#allocation7] sm:$0xff]   ;;  %v5460_v2 = vmov 0   ;;  %v5043_v3 = vld [vmem:[#allocation7 + $0x8] sm:$0xff]   ;;  %v5044_v4 = vld [vmem:[#allocation7 + $0x10] sm:$0xff]   ;;  %v299_v5 = vlaneseq  ;;  %s3765_s20 = sshll.u32 %s5519_s0, 10 }
  0xb1   : > { %1460 = vmatprep.subr.bf16.mxu0 %v5460_v2  ;;  %4939 = vmatprep.subr.bf16.mxu1 %v5460_v2  ;;  %v5045_v6 = vld [vmem:[#allocation7 + $0x18] sm:$0xff]   ;;  %v5046_v8 = vld [vmem:[#allocation7 + $0x20] sm:$0xff]   ;;  %v297_v9 = vstv %s3765_s20  ;;  %v5047_v16 = vld [vmem:[#allocation7 + $0x28] sm:$0xff]   ;;  %v5461_v19 = vmov 1.0|1.0  }
  0xb2   : > { %1461 = vmatpush1.bf16.msra.mxu0 %v5042_v1  ;;  %4955 = vmatpush1.bf16.msra.mxu1 %v5042_v1  ;;  %v5890_v7 = vshrl.u32 %v299_v5, 7  ;;  %v295_v11 = vld [vmem:[#allocation4] sm:$0x3]  ;;  %v5048_v18 = vld [vmem:[#allocation7 + $0x30] sm:$0xff]   ;;  %v5050_v21 = vld [vmem:[#allocation7 + $0x40] sm:$0xff]  }
  0xb3   : > { %1462 = vmatprep.subr.bf16.mxu0 %v5460_v2  ;;  %4940 = vmatprep.subr.bf16.mxu1 %v5460_v2  ;;  %v298_v12 = vsub.s32 %v295_v11, %v297_v9  ;;  %v5049_v20 = vld [vmem:[#allocation7 + $0x38] sm:$0xff]   ;;  %v5051_v22 = vld [vmem:[#allocation7 + $0x48] sm:$0xff]   ;;  %v5052_v23 = vld [vmem:[#allocation7 + $0x50] sm:$0xff]  }
  0xb4   : > { %v434_v10 = vsub.s32 1, %v5890_v7  ;;  %v5896_v13 = vadd.s32 8, %v5890_v7  ;;  %v5899_v14 = vadd.s32 512, %v5890_v7  ;;  %v5902_v15 = vadd.s32 520, %v5890_v7  ;;  %v5053_v24 = vld [vmem:[#allocation7 + $0x58] sm:$0xff]   ;;  %v5054_v25 = vld [vmem:[#allocation7 + $0x60] sm:$0xff]  }
  0xb5   : > { %v430_v26 = vsub.s32 0, %v5890_v7  ;;  %v5055_v27 = vld [vmem:[#allocation7 + $0x68] sm:$0xff]   ;;  %v5056_v29 = vld [vmem:[#allocation7 + $0x70] sm:$0xff]   ;;  %v302_v30 = vadd.s32 16, %v5890_v7  ;;  %v303_v31 = vadd.s32 24, %v5890_v7  ;;  %v366_v32 = vadd.s32 528, %v5890_v7 }
  0xb6   : > { %1463 = vmatpush1.bf16.msra.mxu0 %v5043_v3  ;;  %4956 = vmatpush1.bf16.msra.mxu1 %v5043_v3  ;;  %v5906_v17 = vrot.slane %v298_v12, %v434_v10  ;;  %v367_v33 = vadd.s32 536, %v5890_v7  ;;  %v5057_v34 = vld [vmem:[#allocation7 + $0x78] sm:$0xff]   ;;  %v304_v35 = vadd.s32 32, %v5890_v7  ;;  %v305_v36 = vadd.s32 40, %v5890_v7 }
  0xb7   : > { %1464 = vmatprep.subr.bf16.mxu0 %v5460_v2  ;;  %4941 = vmatprep.subr.bf16.mxu1 %v5460_v2  ;;  %v5935_v28 = vrot.slane %v298_v12, %v430_v26  ;;  %v368_v37 = vadd.s32 544, %v5890_v7  ;;  %v369_v38 = vadd.s32 552, %v5890_v7  ;;  %v306_v39 = vadd.s32 48, %v5890_v7 }
  0xb8   : > { %vm437_vm0 = vcmp.eq.s32.totalorder %v5890_v7, %v5906_v17  ;;  %vm439_vm1 = vcmp.eq.s32.totalorder %v5896_v13, %v5906_v17  ;;  %vm565_vm2 = vcmp.eq.s32.totalorder %v5899_v14, %v5906_v17  ;;  %vm567_vm3 = vcmp.eq.s32.totalorder %v5902_v15, %v5906_v17 }
  0xb9   : > { %vm4038_vm4 = vmpackc.low %vm439_vm1, %vm437_vm0  ;;  %vm436_vm6 = vcmp.eq.s32.totalorder %v5890_v7, %v5935_v28  ;;  %vm438_vm7 = vcmp.eq.s32.totalorder %v5896_v13, %v5935_v28  ;;  %vm564_vm8 = vcmp.eq.s32.totalorder %v5899_v14, %v5935_v28  ;;  %vm566_vm9 = vcmp.eq.s32.totalorder %v5902_v15, %v5935_v28 }
  0xba   : > { %1465 = vmatpush1.bf16.msra.mxu0 %v5044_v4  ;;  %4957 = vmatpush1.bf16.msra.mxu1 %v5044_v4  ;;  %vm4166_vm5 = vmpackc.low %vm567_vm3, %vm565_vm2  ;;  %vm441_vm10 = vcmp.eq.s32.totalorder %v302_v30, %v5906_v17  ;;  %vm443_vm11 = vcmp.eq.s32.totalorder %v303_v31, %v5906_v17  ;;  %vm569_vm13 = vcmp.eq.s32.totalorder %v366_v32, %v5906_v17  ;;  %v307_v40 = vadd.s32 56, %v5890_v7 }
  0xbb   : > { %1466 = vmatprep.subr.bf16.mxu0 %v5460_v2  ;;  %4942 = vmatprep.subr.bf16.mxu1 %v5460_v2  ;;  %vm4040_vm12 = vmpackc.low %vm438_vm7, %vm436_vm6  ;;  %vm571_vm14 = vcmp.eq.s32.totalorder %v367_v33, %v5906_v17  ;;  %vm440_vm2 = vcmp.eq.s32.totalorder %v302_v30, %v5935_v28  ;;  %vm442_vm3 = vcmp.eq.s32.totalorder %v303_v31, %v5935_v28  ;;  %v370_v41 = vadd.s32 560, %v5890_v7 }
  0xbc   : > { %4039 = vmatprep.mubr.msk.bf16.mxu0 %vm4038_vm4, %v5461_v19  ;;  %4167 = vmatprep.mubr.msk.bf16.mxu1 %vm4166_vm5, %v5461_v19  ;;  %vm4168_vm15 = vmpackc.low %vm566_vm9, %vm564_vm8  ;;  %vm568_vm4 = vcmp.eq.s32.totalorder %v366_v32, %v5935_v28  ;;  %vm570_vm5 = vcmp.eq.s32.totalorder %v367_v33, %v5935_v28  ;;  %vm445_vm6 = vcmp.eq.s32.totalorder %v304_v35, %v5906_v17  ;;  %v371_v42 = vadd.s32 568, %v5890_v7 }
  0xbd   : > { %vm4042_vm0 = vmpackc.low %vm443_vm11, %vm441_vm10  ;;  %vm447_vm7 = vcmp.eq.s32.totalorder %v305_v36, %v5906_v17  ;;  %vm573_vm9 = vcmp.eq.s32.totalorder %v368_v37, %v5906_v17  ;;  %vm575_vm10 = vcmp.eq.s32.totalorder %v369_v38, %v5906_v17  ;;  %v308_v43 = vadd.s32 64, %v5890_v7 }
  0xbe   : > { %1467 = vmatpush1.bf16.msra.mxu0 %v5045_v6  ;;  %4958 = vmatpush1.bf16.msra.mxu1 %v5045_v6  ;;  %vm4170_vm1 = vmpackc.low %vm571_vm14, %vm569_vm13  ;;  %vm444_vm14 = vcmp.eq.s32.totalorder %v304_v35, %v5935_v28  ;;  %v309_v44 = vadd.s32 72, %v5890_v7  ;;  %v372_v45 = vadd.s32 576, %v5890_v7  ;;  %v373_v46 = vadd.s32 584, %v5890_v7 }
  0xbf   : > { %1468 = vmatprep.subr.bf16.mxu0 %v5460_v2  ;;  %4943 = vmatprep.subr.bf16.mxu1 %v5460_v2  ;;  %vm4044_vm8 = vmpackc.low %vm442_vm3, %vm440_vm2  ;;  %vm449_vm2 = vcmp.eq.s32.totalorder %v306_v39, %v5906_v17  ;;  %vm451_vm3 = vcmp.eq.s32.totalorder %v307_v40, %v5906_v17  ;;  %v310_v47 = vadd.s32 80, %v5890_v7  ;;  %v311_v48 = vadd.s32 88, %v5890_v7 }
  0xc0   : > { %vm4172_vm11 = vmpackc.low %vm570_vm5, %vm568_vm4  ;;  %vm577_vm5 = vcmp.eq.s32.totalorder %v370_v41, %v5906_v17  ;;  %v374_v49 = vadd.s32 592, %v5890_v7  ;;  %v375_v50 = vadd.s32 600, %v5890_v7  ;;  %v312_v51 = vadd.s32 96, %v5890_v7 }
  0xc1   : > { %vm4174_vm13 = vmpackc.low %vm575_vm10, %vm573_vm9  ;;  %vm448_vm10 = vcmp.eq.s32.totalorder %v306_v39, %v5935_v28  ;;  %v313_v52 = vadd.s32 104, %v5890_v7  ;;  %v376_v53 = vadd.s32 608, %v5890_v7  ;;  %v377_v54 = vadd.s32 616, %v5890_v7 }
  0xc2   : > { %1469 = vmatpush1.bf16.msra.mxu0 %v5046_v8  ;;  %4959 = vmatpush1.bf16.msra.mxu1 %v5046_v8  ;;  %v314_v55 = vadd.s32 112, %v5890_v7  ;;  %v315_v56 = vadd.s32 120, %v5890_v7  ;;  %v378_v57 = vadd.s32 624, %v5890_v7  ;;  %v379_v58 = vadd.s32 632, %v5890_v7 }
  0xc3   : > { %1470 = vmatprep.subr.bf16.mxu0 %v5460_v2  ;;  %4944 = vmatprep.subr.bf16.mxu1 %v5460_v2  ;;  %v316_v59 = vadd.s32 128, %v5890_v7  ;;  %v317_v60 = vadd.s32 136, %v5890_v7  ;;  %v380_v61 = vadd.s32 640, %v5890_v7  ;;  %v381_v62 = vadd.s32 648, %v5890_v7 }
  0xc4   : > { %v318_v63 = vadd.s32 144, %v5890_v7  ;;  %v319_v0 = vadd.s32 152, %v5890_v7  ;;  %v382_v1 = vadd.s32 656, %v5890_v7  ;;  %v320_v3 = vadd.s32 160, %v5890_v7 }
  0xc5   : > { %v321_v4 = vadd.s32 168, %v5890_v7  ;;  %v384_v5 = vadd.s32 672, %v5890_v7  ;;  %v385_v6 = vadd.s32 680, %v5890_v7  ;;  %v322_v8 = vadd.s32 176, %v5890_v7 }
  0xc6   : > { %1471 = vmatpush1.bf16.msra.mxu0 %v5047_v16  ;;  %4960 = vmatpush1.bf16.msra.mxu1 %v5047_v16  ;;  %v323_v9 = vadd.s32 184, %v5890_v7  ;;  %v386_v10 = vadd.s32 688, %v5890_v7  ;;  %v387_v11 = vadd.s32 696, %v5890_v7  ;;  %v324_v12 = vadd.s32 192, %v5890_v7 }
  0xc7   : > { %1472 = vmatprep.subr.bf16.mxu0 %v5460_v2  ;;  %4945 = vmatprep.subr.bf16.mxu1 %v5460_v2  ;;  %v325_v13 = vadd.s32 200, %v5890_v7  ;;  %v388_v14 = vadd.s32 704, %v5890_v7  ;;  %v389_v15 = vadd.s32 712, %v5890_v7  ;;  %v326_v16 = vadd.s32 208, %v5890_v7 }
  0xc8   : > { %v5462_v26 = vmov 4   ;;  %v394_v30 = vadd.s32 752, %v5890_v7  ;;  %v395_v31 = vadd.s32 760, %v5890_v7  ;;  %v332_v32 = vadd.s32 256, %v5890_v7 }
  0xc9   : > { %5040 = vset.pattern.permute.xlu0 %v5462_v26  ;;  %5041 = vset.pattern.permute.xlu1 %v5462_v26  ;;  %v333_v33 = vadd.s32 264, %v5890_v7  ;;  %v397_v35 = vadd.s32 776, %v5890_v7  ;;  %v399_v39 = vadd.s32 792, %v5890_v7 }
  0xca   : > { %1473 = vmatpush1.bf16.msra.mxu0 %v5048_v18  ;;  %4961 = vmatpush1.bf16.msra.mxu1 %v5048_v18  ;;  %v327_v18 = vadd.s32 216, %v5890_v7 }
  0xcb   : > { %1474 = vmatprep.subr.bf16.mxu0 %v5460_v2  ;;  %4946 = vmatprep.subr.bf16.mxu1 %v5460_v2 }
  0xce   : > { %1475 = vmatpush1.bf16.msra.mxu0 %v5049_v20  ;;  %4962 = vmatpush1.bf16.msra.mxu1 %v5049_v20  ;;  %v390_v20 = vadd.s32 720, %v5890_v7 }
  0xcf   : > { %1476 = vmatprep.subr.bf16.mxu0 %v5460_v2  ;;  %4947 = vmatprep.subr.bf16.mxu1 %v5460_v2 }
  0xd2   : > { %1477 = vmatpush1.bf16.msra.mxu0 %v5050_v21  ;;  %4963 = vmatpush1.bf16.msra.mxu1 %v5050_v21  ;;  %v391_v21 = vadd.s32 728, %v5890_v7 }
  0xd3   : > { %1478 = vmatprep.subr.bf16.mxu0 %v5460_v2  ;;  %4948 = vmatprep.subr.bf16.mxu1 %v5460_v2 }
  0xd6   : > { %1479 = vmatpush1.bf16.msra.mxu0 %v5051_v22  ;;  %4964 = vmatpush1.bf16.msra.mxu1 %v5051_v22  ;;  %v328_v22 = vadd.s32 224, %v5890_v7 }
  0xd7   : > { %1480 = vmatprep.subr.bf16.mxu0 %v5460_v2  ;;  %4949 = vmatprep.subr.bf16.mxu1 %v5460_v2 }
  0xda   : > { %1481 = vmatpush1.bf16.msra.mxu0 %v5052_v23  ;;  %4965 = vmatpush1.bf16.msra.mxu1 %v5052_v23  ;;  %v329_v23 = vadd.s32 232, %v5890_v7 }
  0xdb   : > { %1482 = vmatprep.subr.bf16.mxu0 %v5460_v2  ;;  %4950 = vmatprep.subr.bf16.mxu1 %v5460_v2 }
  0xde   : > { %1483 = vmatpush1.bf16.msra.mxu0 %v5053_v24  ;;  %4966 = vmatpush1.bf16.msra.mxu1 %v5053_v24  ;;  %v392_v24 = vadd.s32 736, %v5890_v7 }
  0xdf   : > { %1484 = vmatprep.subr.bf16.mxu0 %v5460_v2  ;;  %4951 = vmatprep.subr.bf16.mxu1 %v5460_v2 }
  0xe2   : > { %1485 = vmatpush1.bf16.msra.mxu0 %v5054_v25  ;;  %4967 = vmatpush1.bf16.msra.mxu1 %v5054_v25  ;;  %v393_v25 = vadd.s32 744, %v5890_v7 }
  0xe3   : > { %1486 = vmatprep.subr.bf16.mxu0 %v5460_v2  ;;  %4952 = vmatprep.subr.bf16.mxu1 %v5460_v2 }
  0xe6   : > { %1487 = vmatpush1.bf16.msra.mxu0 %v5055_v27  ;;  %4968 = vmatpush1.bf16.msra.mxu1 %v5055_v27  ;;  %v330_v27 = vadd.s32 240, %v5890_v7 }
  0xe7   : > { %1488 = vmatprep.subr.bf16.mxu0 %v5460_v2  ;;  %4953 = vmatprep.subr.bf16.mxu1 %v5460_v2 }
  0xea   : > { %1489 = vmatpush1.bf16.msra.mxu0 %v5056_v29  ;;  %4969 = vmatpush1.bf16.msra.mxu1 %v5056_v29  ;;  %v331_v29 = vadd.s32 248, %v5890_v7 }
  0xeb   : > { %1490 = vmatprep.subr.bf16.mxu0 %v5460_v2  ;;  %4954 = vmatprep.subr.bf16.mxu1 %v5460_v2  ;;  %v383_v2 = vadd.s32 664, %v5890_v7 }
  0xee   : > { %1491 = vmatpush1.bf16.msra.mxu0 %v5057_v34  ;;  %4970 = vmatpush1.bf16.msra.mxu1 %v5057_v34  ;;  %v396_v34 = vadd.s32 768, %v5890_v7 }
  0xf1   : > { %4041 = vmatmul.mubr.msk.bf16.vlgmr.msra.gmra.mrb[0].mxu0 %vm4040_vm12, %v5461_v19  ;;  %4169 = vmatmul.mubr.msk.bf16.vlgmr.msra.gmra.mrb[0].mxu1 %vm4168_vm15, %v5461_v19  ;;  %vm4046_vm12 = vmpackc.low %vm447_vm7, %vm445_vm6  ;;  %vm446_vm15 = vcmp.eq.s32.totalorder %v305_v36, %v5935_v28  ;;  %vm579_vm6 = vcmp.eq.s32.totalorder %v371_v42, %v5906_v17  ;;  %v334_v36 = vadd.s32 272, %v5890_v7 }
  0xf2   : > { %4043 = vmatprep.mubr.msk.bf16.mxu0 %vm4042_vm0, %v5461_v19  ;;  %4171 = vmatprep.mubr.msk.bf16.mxu1 %vm4170_vm1, %v5461_v19  ;;  %vm572_vm0 = vcmp.eq.s32.totalorder %v368_v37, %v5935_v28  ;;  %vm574_vm1 = vcmp.eq.s32.totalorder %v369_v38, %v5935_v28  ;;  %vm4048_vm4 = vmpackc.low %vm446_vm15, %vm444_vm14  ;;  %vm453_vm14 = vcmp.eq.s32.totalorder %v308_v43, %v5906_v17  ;;  %v335_v37 = vadd.s32 280, %v5890_v7 }
  0xf3   : > { %vm4176_vm7 = vmpackc.low %vm574_vm1, %vm572_vm0  ;;  %vm455_vm15 = vcmp.eq.s32.totalorder %v309_v44, %v5906_v17  ;;  %vm581_vm1 = vcmp.eq.s32.totalorder %v372_v45, %v5906_v17  ;;  %v398_v38 = vadd.s32 784, %v5890_v7 }
  0xf4   : > { %vm4178_vm9 = vmpackc.low %vm579_vm6, %vm577_vm5  ;;  %vm452_vm6 = vcmp.eq.s32.totalorder %v308_v43, %v5935_v28  ;;  %v401_v43 = vadd.s32 808, %v5890_v7 }
  0xf9   : > { %4045 = vmatmul.mubr.msk.bf16.gmra.mrb[4].mxu0 %vm4044_vm8, %v5461_v19  ;;  %4173 = vmatmul.mubr.msk.bf16.gmra.mrb[4].mxu1 %vm4172_vm11, %v5461_v19  ;;  %vm4050_vm8 = vmpackc.low %vm451_vm3, %vm449_vm2  ;;  %vm450_vm11 = vcmp.eq.s32.totalorder %v307_v40, %v5935_v28  ;;  %vm583_vm2 = vcmp.eq.s32.totalorder %v373_v46, %v5906_v17  ;;  %v336_v40 = vadd.s32 288, %v5890_v7 }
  0xfa   : > { %4047 = vmatprep.mubr.msk.bf16.mxu0 %vm4046_vm12, %v5461_v19  ;;  %4175 = vmatprep.mubr.msk.bf16.mxu1 %vm4174_vm13, %v5461_v19  ;;  %vm576_vm12 = vcmp.eq.s32.totalorder %v370_v41, %v5935_v28  ;;  %vm578_vm13 = vcmp.eq.s32.totalorder %v371_v42, %v5935_v28  ;;  %vm4052_vm0 = vmpackc.low %vm450_vm11, %vm448_vm10  ;;  %vm457_vm10 = vcmp.eq.s32.totalorder %v310_v47, %v5906_v17  ;;  %v337_v41 = vadd.s32 296, %v5890_v7 }
  0xfb   : > { %vm4180_vm3 = vmpackc.low %vm578_vm13, %vm576_vm12  ;;  %vm459_vm11 = vcmp.eq.s32.totalorder %v311_v48, %v5906_v17  ;;  %vm585_vm13 = vcmp.eq.s32.totalorder %v374_v49, %v5906_v17  ;;  %v400_v42 = vadd.s32 800, %v5890_v7 }
  0xfc   : > { %vm4182_vm5 = vmpackc.low %vm583_vm2, %vm581_vm1  ;;  %vm456_vm2 = vcmp.eq.s32.totalorder %v310_v47, %v5935_v28  ;;  %v403_v47 = vadd.s32 824, %v5890_v7 }
 0x101   : > { %4049 = vmatmul.mubr.msk.bf16.gmra.mrb[8].mxu0 %vm4048_vm4, %v5461_v19  ;;  %4177 = vmatmul.mubr.msk.bf16.gmra.mrb[8].mxu1 %vm4176_vm7, %v5461_v19  ;;  %vm4054_vm4 = vmpackc.low %vm455_vm15, %vm453_vm14  ;;  %vm454_vm7 = vcmp.eq.s32.totalorder %v309_v44, %v5935_v28  ;;  %vm587_vm14 = vcmp.eq.s32.totalorder %v375_v50, %v5906_v17  ;;  %v338_v44 = vadd.s32 304, %v5890_v7 }
 0x102   : > { %4051 = vmatprep.mubr.msk.bf16.mxu0 %vm4050_vm8, %v5461_v19  ;;  %4179 = vmatprep.mubr.msk.bf16.mxu1 %vm4178_vm9, %v5461_v19  ;;  %vm580_vm8 = vcmp.eq.s32.totalorder %v372_v45, %v5935_v28  ;;  %vm582_vm9 = vcmp.eq.s32.totalorder %v373_v46, %v5935_v28  ;;  %vm4056_vm12 = vmpackc.low %vm454_vm7, %vm452_vm6  ;;  %vm461_vm6 = vcmp.eq.s32.totalorder %v312_v51, %v5906_v17  ;;  %v339_v45 = vadd.s32 312, %v5890_v7 }
 0x103   : > { %vm4184_vm15 = vmpackc.low %vm582_vm9, %vm580_vm8  ;;  %vm463_vm7 = vcmp.eq.s32.totalorder %v313_v52, %v5906_v17  ;;  %vm589_vm9 = vcmp.eq.s32.totalorder %v376_v53, %v5906_v17  ;;  %v402_v46 = vadd.s32 816, %v5890_v7 }
 0x104   : > { %vm4186_vm1 = vmpackc.low %vm587_vm14, %vm585_vm13  ;;  %vm460_vm14 = vcmp.eq.s32.totalorder %v312_v51, %v5935_v28  ;;  %v405_v51 = vadd.s32 840, %v5890_v7 }
 0x109   : > { %4053 = vmatmul.mubr.msk.bf16.gmra.mrb[12].mxu0 %vm4052_vm0, %v5461_v19  ;;  %4181 = vmatmul.mubr.msk.bf16.gmra.mrb[12].mxu1 %vm4180_vm3, %v5461_v19  ;;  %vm4058_vm0 = vmpackc.low %vm459_vm11, %vm457_vm10  ;;  %vm458_vm3 = vcmp.eq.s32.totalorder %v311_v48, %v5935_v28  ;;  %vm591_vm10 = vcmp.eq.s32.totalorder %v377_v54, %v5906_v17  ;;  %v340_v48 = vadd.s32 320, %v5890_v7 }
 0x10a   : > { %4055 = vmatprep.mubr.msk.bf16.mxu0 %vm4054_vm4, %v5461_v19  ;;  %4183 = vmatprep.mubr.msk.bf16.mxu1 %vm4182_vm5, %v5461_v19  ;;  %vm584_vm4 = vcmp.eq.s32.totalorder %v374_v49, %v5935_v28  ;;  %vm586_vm5 = vcmp.eq.s32.totalorder %v375_v50, %v5935_v28  ;;  %vm4060_vm8 = vmpackc.low %vm458_vm3, %vm456_vm2  ;;  %vm465_vm2 = vcmp.eq.s32.totalorder %v314_v55, %v5906_v17  ;;  %v341_v49 = vadd.s32 328, %v5890_v7 }
 0x10b   : > { %vm4188_vm11 = vmpackc.low %vm586_vm5, %vm584_vm4  ;;  %vm467_vm3 = vcmp.eq.s32.totalorder %v315_v56, %v5906_v17  ;;  %vm593_vm5 = vcmp.eq.s32.totalorder %v378_v57, %v5906_v17  ;;  %v404_v50 = vadd.s32 832, %v5890_v7 }
 0x10c   : > { %vm4190_vm13 = vmpackc.low %vm591_vm10, %vm589_vm9  ;;  %vm464_vm10 = vcmp.eq.s32.totalorder %v314_v55, %v5935_v28  ;;  %v407_v55 = vadd.s32 856, %v5890_v7 }
 0x111   : > { %4057 = vmatmul.mubr.msk.bf16.gmra.mrb[16].mxu0 %vm4056_vm12, %v5461_v19  ;;  %4185 = vmatmul.mubr.msk.bf16.gmra.mrb[16].mxu1 %vm4184_vm15, %v5461_v19  ;;  %vm4062_vm12 = vmpackc.low %vm463_vm7, %vm461_vm6  ;;  %vm462_vm15 = vcmp.eq.s32.totalorder %v313_v52, %v5935_v28  ;;  %vm595_vm6 = vcmp.eq.s32.totalorder %v379_v58, %v5906_v17  ;;  %v342_v52 = vadd.s32 336, %v5890_v7 }
 0x112   : > { %4059 = vmatprep.mubr.msk.bf16.mxu0 %vm4058_vm0, %v5461_v19  ;;  %4187 = vmatprep.mubr.msk.bf16.mxu1 %vm4186_vm1, %v5461_v19  ;;  %vm588_vm0 = vcmp.eq.s32.totalorder %v376_v53, %v5935_v28  ;;  %vm590_vm1 = vcmp.eq.s32.totalorder %v377_v54, %v5935_v28  ;;  %vm4064_vm4 = vmpackc.low %vm462_vm15, %vm460_vm14  ;;  %vm469_vm14 = vcmp.eq.s32.totalorder %v316_v59, %v5906_v17  ;;  %v343_v53 = vadd.s32 344, %v5890_v7 }
 0x113   : > { %vm4192_vm7 = vmpackc.low %vm590_vm1, %vm588_vm0  ;;  %vm471_vm15 = vcmp.eq.s32.totalorder %v317_v60, %v5906_v17  ;;  %vm597_vm1 = vcmp.eq.s32.totalorder %v380_v61, %v5906_v17  ;;  %v406_v54 = vadd.s32 848, %v5890_v7 }
 0x114   : > { %vm4194_vm9 = vmpackc.low %vm595_vm6, %vm593_vm5  ;;  %vm468_vm6 = vcmp.eq.s32.totalorder %v316_v59, %v5935_v28  ;;  %v409_v59 = vadd.s32 872, %v5890_v7 }
 0x119   : > { %4061 = vmatmul.mubr.msk.bf16.gmra.mrb[20].mxu0 %vm4060_vm8, %v5461_v19  ;;  %4189 = vmatmul.mubr.msk.bf16.gmra.mrb[20].mxu1 %vm4188_vm11, %v5461_v19  ;;  %vm4066_vm8 = vmpackc.low %vm467_vm3, %vm465_vm2  ;;  %vm466_vm11 = vcmp.eq.s32.totalorder %v315_v56, %v5935_v28  ;;  %vm599_vm2 = vcmp.eq.s32.totalorder %v381_v62, %v5906_v17  ;;  %v344_v56 = vadd.s32 352, %v5890_v7 }
 0x11a   : > { %4063 = vmatprep.mubr.msk.bf16.mxu0 %vm4062_vm12, %v5461_v19  ;;  %4191 = vmatprep.mubr.msk.bf16.mxu1 %vm4190_vm13, %v5461_v19  ;;  %vm592_vm12 = vcmp.eq.s32.totalorder %v378_v57, %v5935_v28  ;;  %vm594_vm13 = vcmp.eq.s32.totalorder %v379_v58, %v5935_v28  ;;  %vm4068_vm0 = vmpackc.low %vm466_vm11, %vm464_vm10  ;;  %vm473_vm10 = vcmp.eq.s32.totalorder %v318_v63, %v5906_v17  ;;  %v345_v57 = vadd.s32 360, %v5890_v7 }
 0x11b   : > { %vm4196_vm3 = vmpackc.low %vm594_vm13, %vm592_vm12  ;;  %vm475_vm11 = vcmp.eq.s32.totalorder %v319_v0, %v5906_v17  ;;  %vm601_vm13 = vcmp.eq.s32.totalorder %v382_v1, %v5906_v17  ;;  %v408_v58 = vadd.s32 864, %v5890_v7 }
 0x11c   : > { %vm4198_vm5 = vmpackc.low %vm599_vm2, %vm597_vm1  ;;  %vm472_vm2 = vcmp.eq.s32.totalorder %v318_v63, %v5935_v28  ;;  %v411_v63 = vadd.s32 888, %v5890_v7 }
 0x121   : > { %4065 = vmatmul.mubr.msk.bf16.gmra.mrb[24].mxu0 %vm4064_vm4, %v5461_v19  ;;  %4193 = vmatmul.mubr.msk.bf16.gmra.mrb[24].mxu1 %vm4192_vm7, %v5461_v19  ;;  %vm4070_vm4 = vmpackc.low %vm471_vm15, %vm469_vm14  ;;  %vm470_vm7 = vcmp.eq.s32.totalorder %v317_v60, %v5935_v28  ;;  %vm603_vm14 = vcmp.eq.s32.totalorder %v383_v2, %v5906_v17  ;;  %v346_v60 = vadd.s32 368, %v5890_v7 }
 0x122   : > { %4067 = vmatprep.mubr.msk.bf16.mxu0 %vm4066_vm8, %v5461_v19  ;;  %4195 = vmatprep.mubr.msk.bf16.mxu1 %vm4194_vm9, %v5461_v19  ;;  %vm596_vm8 = vcmp.eq.s32.totalorder %v380_v61, %v5935_v28  ;;  %vm598_vm9 = vcmp.eq.s32.totalorder %v381_v62, %v5935_v28  ;;  %vm4072_vm12 = vmpackc.low %vm470_vm7, %vm468_vm6  ;;  %vm477_vm6 = vcmp.eq.s32.totalorder %v320_v3, %v5906_v17  ;;  %v347_v61 = vadd.s32 376, %v5890_v7 }
 0x123   : > { %vm4200_vm15 = vmpackc.low %vm598_vm9, %vm596_vm8  ;;  %vm479_vm7 = vcmp.eq.s32.totalorder %v321_v4, %v5906_v17  ;;  %vm605_vm9 = vcmp.eq.s32.totalorder %v384_v5, %v5906_v17  ;;  %v410_v62 = vadd.s32 880, %v5890_v7 }
 0x124   : > { %vm4202_vm1 = vmpackc.low %vm603_vm14, %vm601_vm13  ;;  %vm476_vm14 = vcmp.eq.s32.totalorder %v320_v3, %v5935_v28  ;;  %v413_v3 = vadd.s32 904, %v5890_v7 }
 0x129   : > { %4069 = vmatmul.mubr.msk.bf16.gmra.mrb[28].mxu0 %vm4068_vm0, %v5461_v19  ;;  %4197 = vmatmul.mubr.msk.bf16.gmra.mrb[28].mxu1 %vm4196_vm3, %v5461_v19  ;;  %vm4074_vm0 = vmpackc.low %vm475_vm11, %vm473_vm10  ;;  %vm474_vm3 = vcmp.eq.s32.totalorder %v319_v0, %v5935_v28  ;;  %vm607_vm10 = vcmp.eq.s32.totalorder %v385_v6, %v5906_v17  ;;  %v348_v0 = vadd.s32 384, %v5890_v7 }
 0x12a   : > { %4071 = vmatprep.mubr.msk.bf16.mxu0 %vm4070_vm4, %v5461_v19  ;;  %4199 = vmatprep.mubr.msk.bf16.mxu1 %vm4198_vm5, %v5461_v19  ;;  %vm600_vm4 = vcmp.eq.s32.totalorder %v382_v1, %v5935_v28  ;;  %vm602_vm5 = vcmp.eq.s32.totalorder %v383_v2, %v5935_v28  ;;  %vm4076_vm8 = vmpackc.low %vm474_vm3, %vm472_vm2  ;;  %vm481_vm2 = vcmp.eq.s32.totalorder %v322_v8, %v5906_v17  ;;  %v349_v1 = vadd.s32 392, %v5890_v7 }
 0x12b   : > { %vm4204_vm11 = vmpackc.low %vm602_vm5, %vm600_vm4  ;;  %vm483_vm3 = vcmp.eq.s32.totalorder %v323_v9, %v5906_v17  ;;  %vm609_vm5 = vcmp.eq.s32.totalorder %v386_v10, %v5906_v17  ;;  %v412_v2 = vadd.s32 896, %v5890_v7 }
 0x12c   : > { %vm4206_vm13 = vmpackc.low %vm607_vm10, %vm605_vm9  ;;  %vm480_vm10 = vcmp.eq.s32.totalorder %v322_v8, %v5935_v28  ;;  %v415_v8 = vadd.s32 920, %v5890_v7 }
 0x131   : > { %4073 = vmatmul.mubr.msk.bf16.gmra.mrb[32].mxu0 %vm4072_vm12, %v5461_v19  ;;  %4201 = vmatmul.mubr.msk.bf16.gmra.mrb[32].mxu1 %vm4200_vm15, %v5461_v19  ;;  %vm4078_vm12 = vmpackc.low %vm479_vm7, %vm477_vm6  ;;  %vm478_vm15 = vcmp.eq.s32.totalorder %v321_v4, %v5935_v28  ;;  %vm611_vm6 = vcmp.eq.s32.totalorder %v387_v11, %v5906_v17  ;;  %v350_v4 = vadd.s32 400, %v5890_v7 }
 0x132   : > { %4075 = vmatprep.mubr.msk.bf16.mxu0 %vm4074_vm0, %v5461_v19  ;;  %4203 = vmatprep.mubr.msk.bf16.mxu1 %vm4202_vm1, %v5461_v19  ;;  %vm604_vm0 = vcmp.eq.s32.totalorder %v384_v5, %v5935_v28  ;;  %vm606_vm1 = vcmp.eq.s32.totalorder %v385_v6, %v5935_v28  ;;  %vm4080_vm4 = vmpackc.low %vm478_vm15, %vm476_vm14  ;;  %vm485_vm14 = vcmp.eq.s32.totalorder %v324_v12, %v5906_v17  ;;  %v351_v5 = vadd.s32 408, %v5890_v7 }
 0x133   : > { %vm4208_vm7 = vmpackc.low %vm606_vm1, %vm604_vm0  ;;  %vm487_vm15 = vcmp.eq.s32.totalorder %v325_v13, %v5906_v17  ;;  %vm613_vm1 = vcmp.eq.s32.totalorder %v388_v14, %v5906_v17  ;;  %v414_v6 = vadd.s32 912, %v5890_v7 }
 0x134   : > { %vm4210_vm9 = vmpackc.low %vm611_vm6, %vm609_vm5  ;;  %vm484_vm6 = vcmp.eq.s32.totalorder %v324_v12, %v5935_v28  ;;  %v417_v12 = vadd.s32 936, %v5890_v7 }
 0x139   : > { %4077 = vmatmul.mubr.msk.bf16.gmra.mrb[36].mxu0 %vm4076_vm8, %v5461_v19  ;;  %4205 = vmatmul.mubr.msk.bf16.gmra.mrb[36].mxu1 %vm4204_vm11, %v5461_v19  ;;  %vm4082_vm8 = vmpackc.low %vm483_vm3, %vm481_vm2  ;;  %vm482_vm11 = vcmp.eq.s32.totalorder %v323_v9, %v5935_v28  ;;  %vm615_vm2 = vcmp.eq.s32.totalorder %v389_v15, %v5906_v17  ;;  %v352_v9 = vadd.s32 416, %v5890_v7 }
 0x13a   : > { %4079 = vmatprep.mubr.msk.bf16.mxu0 %vm4078_vm12, %v5461_v19  ;;  %4207 = vmatprep.mubr.msk.bf16.mxu1 %vm4206_vm13, %v5461_v19  ;;  %vm608_vm12 = vcmp.eq.s32.totalorder %v386_v10, %v5935_v28  ;;  %vm610_vm13 = vcmp.eq.s32.totalorder %v387_v11, %v5935_v28  ;;  %vm4084_vm0 = vmpackc.low %vm482_vm11, %vm480_vm10  ;;  %vm489_vm10 = vcmp.eq.s32.totalorder %v326_v16, %v5906_v17  ;;  %v353_v10 = vadd.s32 424, %v5890_v7 }
 0x13b   : > { %vm4212_vm3 = vmpackc.low %vm610_vm13, %vm608_vm12  ;;  %vm491_vm11 = vcmp.eq.s32.totalorder %v327_v18, %v5906_v17  ;;  %vm617_vm13 = vcmp.eq.s32.totalorder %v390_v20, %v5906_v17  ;;  %v416_v11 = vadd.s32 928, %v5890_v7 }
 0x13c   : > { %vm4214_vm5 = vmpackc.low %vm615_vm2, %vm613_vm1  ;;  %vm488_vm2 = vcmp.eq.s32.totalorder %v326_v16, %v5935_v28  ;;  %v419_v16 = vadd.s32 952, %v5890_v7 }
 0x141   : > { %4081 = vmatmul.mubr.msk.bf16.gmra.mrb[40].mxu0 %vm4080_vm4, %v5461_v19  ;;  %4209 = vmatmul.mubr.msk.bf16.gmra.mrb[40].mxu1 %vm4208_vm7, %v5461_v19  ;;  %vm4086_vm4 = vmpackc.low %vm487_vm15, %vm485_vm14  ;;  %vm486_vm7 = vcmp.eq.s32.totalorder %v325_v13, %v5935_v28  ;;  %vm619_vm14 = vcmp.eq.s32.totalorder %v391_v21, %v5906_v17  ;;  %v354_v13 = vadd.s32 432, %v5890_v7 }
 0x142   : > { %4083 = vmatprep.mubr.msk.bf16.mxu0 %vm4082_vm8, %v5461_v19  ;;  %4211 = vmatprep.mubr.msk.bf16.mxu1 %vm4210_vm9, %v5461_v19  ;;  %vm612_vm8 = vcmp.eq.s32.totalorder %v388_v14, %v5935_v28  ;;  %vm614_vm9 = vcmp.eq.s32.totalorder %v389_v15, %v5935_v28  ;;  %vm4088_vm12 = vmpackc.low %vm486_vm7, %vm484_vm6  ;;  %vm493_vm6 = vcmp.eq.s32.totalorder %v328_v22, %v5906_v17  ;;  %v355_v14 = vadd.s32 440, %v5890_v7 }
 0x143   : > { %vm4216_vm15 = vmpackc.low %vm614_vm9, %vm612_vm8  ;;  %vm495_vm7 = vcmp.eq.s32.totalorder %v329_v23, %v5906_v17  ;;  %vm621_vm9 = vcmp.eq.s32.totalorder %v392_v24, %v5906_v17  ;;  %v418_v15 = vadd.s32 944, %v5890_v7 }
 0x144   : > { %vm4218_vm1 = vmpackc.low %vm619_vm14, %vm617_vm13  ;;  %vm492_vm14 = vcmp.eq.s32.totalorder %v328_v22, %v5935_v28  ;;  %v421_v22 = vadd.s32 968, %v5890_v7 }
 0x149   : > { %4085 = vmatmul.mubr.msk.bf16.gmra.mrb[44].mxu0 %vm4084_vm0, %v5461_v19  ;;  %4213 = vmatmul.mubr.msk.bf16.gmra.mrb[44].mxu1 %vm4212_vm3, %v5461_v19  ;;  %vm4090_vm0 = vmpackc.low %vm491_vm11, %vm489_vm10  ;;  %vm490_vm3 = vcmp.eq.s32.totalorder %v327_v18, %v5935_v28  ;;  %vm623_vm10 = vcmp.eq.s32.totalorder %v393_v25, %v5906_v17  ;;  %v356_v18 = vadd.s32 448, %v5890_v7 }
 0x14a   : > { %4087 = vmatprep.mubr.msk.bf16.mxu0 %vm4086_vm4, %v5461_v19  ;;  %4215 = vmatprep.mubr.msk.bf16.mxu1 %vm4214_vm5, %v5461_v19  ;;  %vm616_vm4 = vcmp.eq.s32.totalorder %v390_v20, %v5935_v28  ;;  %vm618_vm5 = vcmp.eq.s32.totalorder %v391_v21, %v5935_v28  ;;  %vm4092_vm8 = vmpackc.low %vm490_vm3, %vm488_vm2  ;;  %vm497_vm2 = vcmp.eq.s32.totalorder %v330_v27, %v5906_v17  ;;  %v357_v20 = vadd.s32 456, %v5890_v7 }
 0x14b   : > { %vm4220_vm11 = vmpackc.low %vm618_vm5, %vm616_vm4  ;;  %vm499_vm3 = vcmp.eq.s32.totalorder %v331_v29, %v5906_v17  ;;  %vm625_vm5 = vcmp.eq.s32.totalorder %v394_v30, %v5906_v17  ;;  %v420_v21 = vadd.s32 960, %v5890_v7 }
 0x14c   : > { %vm4222_vm13 = vmpackc.low %vm623_vm10, %vm621_vm9  ;;  %vm496_vm10 = vcmp.eq.s32.totalorder %v330_v27, %v5935_v28 }
 0x151   : > { %4089 = vmatmul.mubr.msk.bf16.gmra.mrb[48].mxu0 %vm4088_vm12, %v5461_v19  ;;  %4217 = vmatmul.mubr.msk.bf16.gmra.mrb[48].mxu1 %vm4216_vm15, %v5461_v19  ;;  %vm4094_vm12 = vmpackc.low %vm495_vm7, %vm493_vm6  ;;  %vm494_vm15 = vcmp.eq.s32.totalorder %v329_v23, %v5935_v28  ;;  %vm627_vm6 = vcmp.eq.s32.totalorder %v395_v31, %v5906_v17 }
 0x152   : > { %4091 = vmatprep.mubr.msk.bf16.mxu0 %vm4090_vm0, %v5461_v19  ;;  %4219 = vmatprep.mubr.msk.bf16.mxu1 %vm4218_vm1, %v5461_v19  ;;  %vm620_vm0 = vcmp.eq.s32.totalorder %v392_v24, %v5935_v28  ;;  %vm622_vm1 = vcmp.eq.s32.totalorder %v393_v25, %v5935_v28  ;;  %vm4096_vm4 = vmpackc.low %vm494_vm15, %vm492_vm14  ;;  %vm501_vm14 = vcmp.eq.s32.totalorder %v332_v32, %v5906_v17 }
 0x153   : > { %vm4224_vm7 = vmpackc.low %vm622_vm1, %vm620_vm0  ;;  %vm503_vm15 = vcmp.eq.s32.totalorder %v333_v33, %v5906_v17  ;;  %vm629_vm1 = vcmp.eq.s32.totalorder %v396_v34, %v5906_v17 }
 0x154   : > { %vm4226_vm9 = vmpackc.low %vm627_vm6, %vm625_vm5  ;;  %vm500_vm6 = vcmp.eq.s32.totalorder %v332_v32, %v5935_v28 }
 0x159   : > { %4093 = vmatmul.mubr.msk.bf16.gmra.mrb[52].mxu0 %vm4092_vm8, %v5461_v19  ;;  %4221 = vmatmul.mubr.msk.bf16.gmra.mrb[52].mxu1 %vm4220_vm11, %v5461_v19  ;;  %vm4098_vm8 = vmpackc.low %vm499_vm3, %vm497_vm2  ;;  %vm498_vm11 = vcmp.eq.s32.totalorder %v331_v29, %v5935_v28  ;;  %vm631_vm2 = vcmp.eq.s32.totalorder %v397_v35, %v5906_v17 }
 0x15a   : > { %4095 = vmatprep.mubr.msk.bf16.mxu0 %vm4094_vm12, %v5461_v19  ;;  %4223 = vmatprep.mubr.msk.bf16.mxu1 %vm4222_vm13, %v5461_v19  ;;  %vm624_vm12 = vcmp.eq.s32.totalorder %v394_v30, %v5935_v28  ;;  %vm626_vm13 = vcmp.eq.s32.totalorder %v395_v31, %v5935_v28  ;;  %vm4100_vm0 = vmpackc.low %vm498_vm11, %vm496_vm10  ;;  %vm505_vm10 = vcmp.eq.s32.totalorder %v334_v36, %v5906_v17 }
 0x15b   : > { %vm4228_vm3 = vmpackc.low %vm626_vm13, %vm624_vm12  ;;  %vm507_vm11 = vcmp.eq.s32.totalorder %v335_v37, %v5906_v17  ;;  %vm633_vm13 = vcmp.eq.s32.totalorder %v398_v38, %v5906_v17 }
 0x15c   : > { %vm4230_vm5 = vmpackc.low %vm631_vm2, %vm629_vm1  ;;  %vm504_vm2 = vcmp.eq.s32.totalorder %v334_v36, %v5935_v28  ;;  %v6405_v36 = vadd.s32 464, %v5890_v7 }
 0x161   : > { %4097 = vmatmul.mubr.msk.bf16.gmra.mrb[56].mxu0 %vm4096_vm4, %v5461_v19  ;;  %4225 = vmatmul.mubr.msk.bf16.gmra.mrb[56].mxu1 %vm4224_vm7, %v5461_v19  ;;  %vm4102_vm4 = vmpackc.low %vm503_vm15, %vm501_vm14  ;;  %vm502_vm7 = vcmp.eq.s32.totalorder %v333_v33, %v5935_v28  ;;  %vm635_vm14 = vcmp.eq.s32.totalorder %v399_v39, %v5906_v17 }
 0x162   : > { %4099 = vmatprep.mubr.msk.bf16.mxu0 %vm4098_vm8, %v5461_v19  ;;  %4227 = vmatprep.mubr.msk.bf16.mxu1 %vm4226_vm9, %v5461_v19  ;;  %vm628_vm8 = vcmp.eq.s32.totalorder %v396_v34, %v5935_v28  ;;  %vm630_vm9 = vcmp.eq.s32.totalorder %v397_v35, %v5935_v28  ;;  %vm4104_vm12 = vmpackc.low %vm502_vm7, %vm500_vm6  ;;  %vm509_vm6 = vcmp.eq.s32.totalorder %v336_v40, %v5906_v17 }
 0x163   : > { %vm4232_vm15 = vmpackc.low %vm630_vm9, %vm628_vm8  ;;  %vm511_vm7 = vcmp.eq.s32.totalorder %v337_v41, %v5906_v17  ;;  %vm637_vm9 = vcmp.eq.s32.totalorder %v400_v42, %v5906_v17 }
 0x164   : > { %vm4234_vm1 = vmpackc.low %vm635_vm14, %vm633_vm13  ;;  %vm508_vm14 = vcmp.eq.s32.totalorder %v336_v40, %v5935_v28 }
 0x169   : > { %4101 = vmatmul.mubr.msk.bf16.gmra.mrb[60].mxu0 %vm4100_vm0, %v5461_v19  ;;  %4229 = vmatmul.mubr.msk.bf16.gmra.mrb[60].mxu1 %vm4228_vm3, %v5461_v19  ;;  %vm4106_vm0 = vmpackc.low %vm507_vm11, %vm505_vm10  ;;  %vm506_vm3 = vcmp.eq.s32.totalorder %v335_v37, %v5935_v28  ;;  %vm639_vm10 = vcmp.eq.s32.totalorder %v401_v43, %v5906_v17  ;;  %v6408_v37 = vadd.s32 472, %v5890_v7 }
 0x16a   : > { %4103 = vmatprep.mubr.msk.bf16.mxu0 %vm4102_vm4, %v5461_v19  ;;  %4231 = vmatprep.mubr.msk.bf16.mxu1 %vm4230_vm5, %v5461_v19  ;;  %vm632_vm4 = vcmp.eq.s32.totalorder %v398_v38, %v5935_v28  ;;  %vm634_vm5 = vcmp.eq.s32.totalorder %v399_v39, %v5935_v28  ;;  %vm4108_vm8 = vmpackc.low %vm506_vm3, %vm504_vm2  ;;  %vm513_vm2 = vcmp.eq.s32.totalorder %v338_v44, %v5906_v17  ;;  %v6415_v38 = vadd.s32 976, %v5890_v7 }
 0x16b   : > { %vm4236_vm11 = vmpackc.low %vm634_vm5, %vm632_vm4  ;;  %vm515_vm3 = vcmp.eq.s32.totalorder %v339_v45, %v5906_v17  ;;  %vm641_vm5 = vcmp.eq.s32.totalorder %v402_v46, %v5906_v17  ;;  %v6418_v39 = vadd.s32 984, %v5890_v7 }
 0x16c   : > { %vm4238_vm13 = vmpackc.low %vm639_vm10, %vm637_vm9  ;;  %vm512_vm10 = vcmp.eq.s32.totalorder %v338_v44, %v5935_v28 }
 0x171   : > { %4105 = vmatmul.mubr.msk.bf16.gmra.mrb[64].mxu0 %vm4104_vm12, %v5461_v19  ;;  %4233 = vmatmul.mubr.msk.bf16.gmra.mrb[64].mxu1 %vm4232_vm15, %v5461_v19  ;;  %vm4110_vm12 = vmpackc.low %vm511_vm7, %vm509_vm6  ;;  %vm510_vm15 = vcmp.eq.s32.totalorder %v337_v41, %v5935_v28  ;;  %vm643_vm6 = vcmp.eq.s32.totalorder %v403_v47, %v5906_v17 }
 0x172   : > { %4107 = vmatprep.mubr.msk.bf16.mxu0 %vm4106_vm0, %v5461_v19  ;;  %4235 = vmatprep.mubr.msk.bf16.mxu1 %vm4234_vm1, %v5461_v19  ;;  %vm636_vm0 = vcmp.eq.s32.totalorder %v400_v42, %v5935_v28  ;;  %vm638_vm1 = vcmp.eq.s32.totalorder %v401_v43, %v5935_v28  ;;  %vm4112_vm4 = vmpackc.low %vm510_vm15, %vm508_vm14  ;;  %vm517_vm14 = vcmp.eq.s32.totalorder %v340_v48, %v5906_v17 }
 0x173   : > { %vm4240_vm7 = vmpackc.low %vm638_vm1, %vm636_vm0  ;;  %vm519_vm15 = vcmp.eq.s32.totalorder %v341_v49, %v5906_v17  ;;  %vm645_vm1 = vcmp.eq.s32.totalorder %v404_v50, %v5906_v17 }
 0x174   : > { %vm4242_vm9 = vmpackc.low %vm643_vm6, %vm641_vm5  ;;  %vm516_vm6 = vcmp.eq.s32.totalorder %v340_v48, %v5935_v28 }
 0x179   : > { %4109 = vmatmul.mubr.msk.bf16.gmra.mrb[68].mxu0 %vm4108_vm8, %v5461_v19  ;;  %4237 = vmatmul.mubr.msk.bf16.gmra.mrb[68].mxu1 %vm4236_vm11, %v5461_v19  ;;  %vm4114_vm8 = vmpackc.low %vm515_vm3, %vm513_vm2  ;;  %vm514_vm11 = vcmp.eq.s32.totalorder %v339_v45, %v5935_v28  ;;  %vm647_vm2 = vcmp.eq.s32.totalorder %v405_v51, %v5906_v17 }
 0x17a   : > { %4111 = vmatprep.mubr.msk.bf16.mxu0 %vm4110_vm12, %v5461_v19  ;;  %4239 = vmatprep.mubr.msk.bf16.mxu1 %vm4238_vm13, %v5461_v19  ;;  %vm640_vm12 = vcmp.eq.s32.totalorder %v402_v46, %v5935_v28  ;;  %vm642_vm13 = vcmp.eq.s32.totalorder %v403_v47, %v5935_v28  ;;  %vm4116_vm0 = vmpackc.low %vm514_vm11, %vm512_vm10  ;;  %vm521_vm10 = vcmp.eq.s32.totalorder %v342_v52, %v5906_v17 }
 0x17b   : > { %vm4244_vm3 = vmpackc.low %vm642_vm13, %vm640_vm12  ;;  %vm523_vm11 = vcmp.eq.s32.totalorder %v343_v53, %v5906_v17  ;;  %vm649_vm13 = vcmp.eq.s32.totalorder %v406_v54, %v5906_v17 }
 0x17c   : > { %vm4246_vm5 = vmpackc.low %vm647_vm2, %vm645_vm1  ;;  %vm520_vm2 = vcmp.eq.s32.totalorder %v342_v52, %v5935_v28 }
 0x181   : > { %4113 = vmatmul.mubr.msk.bf16.gmra.mrb[72].mxu0 %vm4112_vm4, %v5461_v19  ;;  %4241 = vmatmul.mubr.msk.bf16.gmra.mrb[72].mxu1 %vm4240_vm7, %v5461_v19  ;;  %vm4118_vm4 = vmpackc.low %vm519_vm15, %vm517_vm14  ;;  %vm518_vm7 = vcmp.eq.s32.totalorder %v341_v49, %v5935_v28  ;;  %vm651_vm14 = vcmp.eq.s32.totalorder %v407_v55, %v5906_v17 }
 0x182   : > { %4115 = vmatprep.mubr.msk.bf16.mxu0 %vm4114_vm8, %v5461_v19  ;;  %4243 = vmatprep.mubr.msk.bf16.mxu1 %vm4242_vm9, %v5461_v19  ;;  %vm644_vm8 = vcmp.eq.s32.totalorder %v404_v50, %v5935_v28  ;;  %vm646_vm9 = vcmp.eq.s32.totalorder %v405_v51, %v5935_v28  ;;  %vm4120_vm12 = vmpackc.low %vm518_vm7, %vm516_vm6  ;;  %vm525_vm6 = vcmp.eq.s32.totalorder %v344_v56, %v5906_v17 }
 0x183   : > { %vm4248_vm15 = vmpackc.low %vm646_vm9, %vm644_vm8  ;;  %vm527_vm7 = vcmp.eq.s32.totalorder %v345_v57, %v5906_v17  ;;  %vm653_vm9 = vcmp.eq.s32.totalorder %v408_v58, %v5906_v17 }
 0x184   : > { %vm4250_vm1 = vmpackc.low %vm651_vm14, %vm649_vm13  ;;  %vm524_vm14 = vcmp.eq.s32.totalorder %v344_v56, %v5935_v28  ;;  %v6471_v56 = vadd.s32 992, %v5890_v7 }
 0x189   : > { %4117 = vmatmul.mubr.msk.bf16.gmra.mrb[76].mxu0 %vm4116_vm0, %v5461_v19  ;;  %4245 = vmatmul.mubr.msk.bf16.gmra.mrb[76].mxu1 %vm4244_vm3, %v5461_v19  ;;  %vm4122_vm0 = vmpackc.low %vm523_vm11, %vm521_vm10  ;;  %vm522_vm3 = vcmp.eq.s32.totalorder %v343_v53, %v5935_v28  ;;  %vm655_vm10 = vcmp.eq.s32.totalorder %v409_v59, %v5906_v17  ;;  %v6461_v53 = vadd.s32 480, %v5890_v7 }
 0x18a   : > { %4119 = vmatprep.mubr.msk.bf16.mxu0 %vm4118_vm4, %v5461_v19  ;;  %4247 = vmatprep.mubr.msk.bf16.mxu1 %vm4246_vm5, %v5461_v19  ;;  %vm648_vm4 = vcmp.eq.s32.totalorder %v406_v54, %v5935_v28  ;;  %vm650_vm5 = vcmp.eq.s32.totalorder %v407_v55, %v5935_v28  ;;  %vm4124_vm8 = vmpackc.low %vm522_vm3, %vm520_vm2  ;;  %vm529_vm2 = vcmp.eq.s32.totalorder %v346_v60, %v5906_v17  ;;  %v6464_v54 = vadd.s32 488, %v5890_v7 }
 0x18b   : > { %vm4252_vm11 = vmpackc.low %vm650_vm5, %vm648_vm4  ;;  %vm531_vm3 = vcmp.eq.s32.totalorder %v347_v61, %v5906_v17  ;;  %vm657_vm5 = vcmp.eq.s32.totalorder %v410_v62, %v5906_v17 }
 0x18c   : > { %vm4254_vm13 = vmpackc.low %vm655_vm10, %vm653_vm9  ;;  %vm528_vm10 = vcmp.eq.s32.totalorder %v346_v60, %v5935_v28 }
 0x191   : > { %4121 = vmatmul.mubr.msk.bf16.gmra.mrb[80].mxu0 %vm4120_vm12, %v5461_v19  ;;  %4249 = vmatmul.mubr.msk.bf16.gmra.mrb[80].mxu1 %vm4248_vm15, %v5461_v19  ;;  %vm4126_vm12 = vmpackc.low %vm527_vm7, %vm525_vm6  ;;  %vm526_vm15 = vcmp.eq.s32.totalorder %v345_v57, %v5935_v28  ;;  %vm659_vm6 = vcmp.eq.s32.totalorder %v411_v63, %v5906_v17  ;;  %v6474_v57 = vadd.s32 1000, %v5890_v7 }
 0x192   : > { %4123 = vmatprep.mubr.msk.bf16.mxu0 %vm4122_vm0, %v5461_v19  ;;  %4251 = vmatprep.mubr.msk.bf16.mxu1 %vm4250_vm1, %v5461_v19  ;;  %vm652_vm0 = vcmp.eq.s32.totalorder %v408_v58, %v5935_v28  ;;  %vm654_vm1 = vcmp.eq.s32.totalorder %v409_v59, %v5935_v28  ;;  %vm4128_vm4 = vmpackc.low %vm526_vm15, %vm524_vm14  ;;  %vm533_vm14 = vcmp.eq.s32.totalorder %v348_v0, %v5906_v17 }
 0x193   : > { %vm4256_vm7 = vmpackc.low %vm654_vm1, %vm652_vm0  ;;  %vm535_vm15 = vcmp.eq.s32.totalorder %v349_v1, %v5906_v17  ;;  %vm661_vm1 = vcmp.eq.s32.totalorder %v412_v2, %v5906_v17 }
 0x194   : > { %vm4258_vm9 = vmpackc.low %vm659_vm6, %vm657_vm5  ;;  %vm532_vm6 = vcmp.eq.s32.totalorder %v348_v0, %v5935_v28 }
 0x199   : > { %4125 = vmatmul.mubr.msk.bf16.gmra.mrb[84].mxu0 %vm4124_vm8, %v5461_v19  ;;  %4253 = vmatmul.mubr.msk.bf16.gmra.mrb[84].mxu1 %vm4252_vm11, %v5461_v19  ;;  %vm4130_vm8 = vmpackc.low %vm531_vm3, %vm529_vm2  ;;  %vm530_vm11 = vcmp.eq.s32.totalorder %v347_v61, %v5935_v28  ;;  %vm663_vm2 = vcmp.eq.s32.totalorder %v413_v3, %v5906_v17 }
 0x19a   : > { %4127 = vmatprep.mubr.msk.bf16.mxu0 %vm4126_vm12, %v5461_v19  ;;  %4255 = vmatprep.mubr.msk.bf16.mxu1 %vm4254_vm13, %v5461_v19  ;;  %vm656_vm12 = vcmp.eq.s32.totalorder %v410_v62, %v5935_v28  ;;  %vm658_vm13 = vcmp.eq.s32.totalorder %v411_v63, %v5935_v28  ;;  %vm4132_vm0 = vmpackc.low %vm530_vm11, %vm528_vm10  ;;  %vm537_vm10 = vcmp.eq.s32.totalorder %v350_v4, %v5906_v17 }
 0x19b   : > { %vm4260_vm3 = vmpackc.low %vm658_vm13, %vm656_vm12  ;;  %vm539_vm11 = vcmp.eq.s32.totalorder %v351_v5, %v5906_v17  ;;  %vm665_vm13 = vcmp.eq.s32.totalorder %v414_v6, %v5906_v17 }
 0x19c   : > { %vm4262_vm5 = vmpackc.low %vm663_vm2, %vm661_vm1  ;;  %vm536_vm2 = vcmp.eq.s32.totalorder %v350_v4, %v5935_v28 }
 0x1a1   : > { %4129 = vmatmul.mubr.msk.bf16.gmra.mrb[88].mxu0 %vm4128_vm4, %v5461_v19  ;;  %4257 = vmatmul.mubr.msk.bf16.gmra.mrb[88].mxu1 %vm4256_vm7, %v5461_v19  ;;  %vm4134_vm4 = vmpackc.low %vm535_vm15, %vm533_vm14  ;;  %vm534_vm7 = vcmp.eq.s32.totalorder %v349_v1, %v5935_v28  ;;  %vm667_vm14 = vcmp.eq.s32.totalorder %v415_v8, %v5906_v17 }
 0x1a2   : > { %4131 = vmatprep.mubr.msk.bf16.mxu0 %vm4130_vm8, %v5461_v19  ;;  %4259 = vmatprep.mubr.msk.bf16.mxu1 %vm4258_vm9, %v5461_v19  ;;  %vm660_vm8 = vcmp.eq.s32.totalorder %v412_v2, %v5935_v28  ;;  %vm662_vm9 = vcmp.eq.s32.totalorder %v413_v3, %v5935_v28  ;;  %vm4136_vm12 = vmpackc.low %vm534_vm7, %vm532_vm6  ;;  %vm541_vm6 = vcmp.eq.s32.totalorder %v352_v9, %v5906_v17 }
 0x1a3   : > { %vm4264_vm15 = vmpackc.low %vm662_vm9, %vm660_vm8  ;;  %vm543_vm7 = vcmp.eq.s32.totalorder %v353_v10, %v5906_v17  ;;  %vm669_vm9 = vcmp.eq.s32.totalorder %v416_v11, %v5906_v17 }
 0x1a4   : > { %vm4266_vm1 = vmpackc.low %vm667_vm14, %vm665_vm13  ;;  %vm540_vm14 = vcmp.eq.s32.totalorder %v352_v9, %v5935_v28 }
 0x1a9   : > { %4133 = vmatmul.mubr.msk.bf16.gmra.mrb[92].mxu0 %vm4132_vm0, %v5461_v19  ;;  %4261 = vmatmul.mubr.msk.bf16.gmra.mrb[92].mxu1 %vm4260_vm3, %v5461_v19  ;;  %vm4138_vm0 = vmpackc.low %vm539_vm11, %vm537_vm10  ;;  %vm538_vm3 = vcmp.eq.s32.totalorder %v351_v5, %v5935_v28  ;;  %vm671_vm10 = vcmp.eq.s32.totalorder %v417_v12, %v5906_v17 }
 0x1aa   : > { %4135 = vmatprep.mubr.msk.bf16.mxu0 %vm4134_vm4, %v5461_v19  ;;  %4263 = vmatprep.mubr.msk.bf16.mxu1 %vm4262_vm5, %v5461_v19  ;;  %vm664_vm4 = vcmp.eq.s32.totalorder %v414_v6, %v5935_v28  ;;  %vm666_vm5 = vcmp.eq.s32.totalorder %v415_v8, %v5935_v28  ;;  %vm4140_vm8 = vmpackc.low %vm538_vm3, %vm536_vm2  ;;  %vm545_vm2 = vcmp.eq.s32.totalorder %v354_v13, %v5906_v17 }
 0x1ab   : > { %vm4268_vm11 = vmpackc.low %vm666_vm5, %vm664_vm4  ;;  %vm547_vm3 = vcmp.eq.s32.totalorder %v355_v14, %v5906_v17  ;;  %vm673_vm5 = vcmp.eq.s32.totalorder %v418_v15, %v5906_v17 }
 0x1ac   : > { %vm4270_vm13 = vmpackc.low %vm671_vm10, %vm669_vm9  ;;  %vm544_vm10 = vcmp.eq.s32.totalorder %v354_v13, %v5935_v28  ;;  %v6537_v13 = vadd.s32 496, %v5890_v7 }
 0x1b1   : > { %4137 = vmatmul.mubr.msk.bf16.gmra.mrb[96].mxu0 %vm4136_vm12, %v5461_v19  ;;  %4265 = vmatmul.mubr.msk.bf16.gmra.mrb[96].mxu1 %vm4264_vm15, %v5461_v19  ;;  %vm4142_vm12 = vmpackc.low %vm543_vm7, %vm541_vm6  ;;  %vm542_vm15 = vcmp.eq.s32.totalorder %v353_v10, %v5935_v28  ;;  %vm675_vm6 = vcmp.eq.s32.totalorder %v419_v16, %v5906_v17 }
 0x1b2   : > { %4139 = vmatprep.mubr.msk.bf16.mxu0 %vm4138_vm0, %v5461_v19  ;;  %4267 = vmatprep.mubr.msk.bf16.mxu1 %vm4266_vm1, %v5461_v19  ;;  %vm668_vm0 = vcmp.eq.s32.totalorder %v416_v11, %v5935_v28  ;;  %vm670_vm1 = vcmp.eq.s32.totalorder %v417_v12, %v5935_v28  ;;  %vm4144_vm4 = vmpackc.low %vm542_vm15, %vm540_vm14  ;;  %vm549_vm14 = vcmp.eq.s32.totalorder %v356_v18, %v5906_v17 }
 0x1b3   : > { %vm4272_vm7 = vmpackc.low %vm670_vm1, %vm668_vm0  ;;  %vm551_vm15 = vcmp.eq.s32.totalorder %v357_v20, %v5906_v17  ;;  %vm677_vm1 = vcmp.eq.s32.totalorder %v420_v21, %v5906_v17 }
 0x1b4   : > { %vm4274_vm9 = vmpackc.low %vm675_vm6, %vm673_vm5  ;;  %vm548_vm6 = vcmp.eq.s32.totalorder %v356_v18, %v5935_v28  ;;  %v6550_v18 = vadd.s32 1016, %v5890_v7 }
 0x1b9   : > { %4141 = vmatmul.mubr.msk.bf16.gmra.mrb[100].mxu0 %vm4140_vm8, %v5461_v19  ;;  %4269 = vmatmul.mubr.msk.bf16.gmra.mrb[100].mxu1 %vm4268_vm11, %v5461_v19  ;;  %vm4146_vm8 = vmpackc.low %vm547_vm3, %vm545_vm2  ;;  %vm546_vm11 = vcmp.eq.s32.totalorder %v355_v14, %v5935_v28  ;;  %vm679_vm2 = vcmp.eq.s32.totalorder %v421_v22, %v5906_v17  ;;  %v6540_v14 = vadd.s32 504, %v5890_v7 }
 0x1ba   : > { %4143 = vmatprep.mubr.msk.bf16.mxu0 %vm4142_vm12, %v5461_v19  ;;  %4271 = vmatprep.mubr.msk.bf16.mxu1 %vm4270_vm13, %v5461_v19  ;;  %vm672_vm12 = vcmp.eq.s32.totalorder %v418_v15, %v5935_v28  ;;  %vm674_vm13 = vcmp.eq.s32.totalorder %v419_v16, %v5935_v28  ;;  %vm6391_vm0 = vmpackc.low %vm546_vm11, %vm544_vm10  ;;  %vm553_vm10 = vcmp.eq.s32.totalorder %v6405_v36, %v5906_v17  ;;  %v6547_v16 = vadd.s32 1008, %v5890_v7 }
 0x1bb   : > { %vm4276_vm3 = vmpackc.low %vm674_vm13, %vm672_vm12  ;;  %vm555_vm11 = vcmp.eq.s32.totalorder %v6408_v37, %v5906_v17  ;;  %vm681_vm13 = vcmp.eq.s32.totalorder %v6415_v38, %v5906_v17 }
 0x1bc   : > { %vm4278_vm5 = vmpackc.low %vm679_vm2, %vm677_vm1  ;;  %vm552_vm2 = vcmp.eq.s32.totalorder %v6405_v36, %v5935_v28 }
 0x1c1   : > { %4145 = vmatmul.mubr.msk.bf16.gmra.mrb[104].mxu0 %vm4144_vm4, %v5461_v19  ;;  %4273 = vmatmul.mubr.msk.bf16.gmra.mrb[104].mxu1 %vm4272_vm7, %v5461_v19  ;;  %vm4150_vm4 = vmpackc.low %vm551_vm15, %vm549_vm14  ;;  %vm550_vm7 = vcmp.eq.s32.totalorder %v357_v20, %v5935_v28  ;;  %vm683_vm14 = vcmp.eq.s32.totalorder %v6418_v39, %v5906_v17 }
 0x1c2   : > { %4147 = vmatprep.mubr.msk.bf16.mxu0 %vm4146_vm8, %v5461_v19  ;;  %4275 = vmatprep.mubr.msk.bf16.mxu1 %vm4274_vm9, %v5461_v19  ;;  %vm676_vm8 = vcmp.eq.s32.totalorder %v420_v21, %v5935_v28  ;;  %vm678_vm9 = vcmp.eq.s32.totalorder %v421_v22, %v5935_v28  ;;  %vm6437_vm12 = vmpackc.low %vm550_vm7, %vm548_vm6  ;;  %vm557_vm6 = vcmp.eq.s32.totalorder %v6461_v53, %v5906_v17 }
 0x1c3   : > { %vm4280_vm15 = vmpackc.low %vm678_vm9, %vm676_vm8  ;;  %vm559_vm7 = vcmp.eq.s32.totalorder %v6464_v54, %v5906_v17  ;;  %vm685_vm9 = vcmp.eq.s32.totalorder %v6471_v56, %v5906_v17 }
 0x1c4   : > { %v6387_v23 = vpop.f32.mrb[0].mxu0  ;;  %v6389_v24 = vpop.f32.mrb[0].mxu1  ;;  %vm4282_vm1 = vmpackc.low %vm683_vm14, %vm681_vm13  ;;  %vm556_vm14 = vcmp.eq.s32.totalorder %v6461_v53, %v5935_v28 }
 0x1c5   : > { %v2005_v26 = vmax.f32 %v6387_v23, 1.0  ;;  %v1496_v27 = vpop.f32.mrb[1].mxu0  ;;  %v1752_v29 = vpop.f32.mrb[1].mxu1  ;;  %v2069_v32 = vmax.f32 %v6389_v24, 1.0 }
 0x1c6   : > { %v6398_v30 = vpop.f32.mrb[2].mxu0  ;;  %v6400_v31 = vpop.f32.mrb[2].mxu1 }
 0x1c7   : > { %5058 = vrcp.f32 %v2005_v26  ;;  %v2070_v33 = vmax.f32 %v6400_v31, 1.0  ;;  %v1499_v34 = vpop.f32.mrb[3].mxu0  ;;  %v1755_v35 = vpop.f32.mrb[3].mxu1  ;;  %v2006_v40 = vmax.f32 %v6398_v30, 1.0 }
 0x1c9   : > { %4149 = vmatmul.mubr.msk.bf16.gmra.mrb[108].mxu0 %vm6391_vm0, %v5461_v19  ;;  %4277 = vmatmul.mubr.msk.bf16.gmra.mrb[108].mxu1 %vm4276_vm3, %v5461_v19  ;;  %5060 = vrcp.f32 %v2070_v33  ;;  %vm4154_vm0 = vmpackc.low %vm555_vm11, %vm553_vm10  ;;  %vm554_vm3 = vcmp.eq.s32.totalorder %v6408_v37, %v5935_v28  ;;  %vm687_vm10 = vcmp.eq.s32.totalorder %v6474_v57, %v5906_v17 }
 0x1ca   : > { %4151 = vmatprep.mubr.msk.bf16.mxu0 %vm4150_vm4, %v5461_v19  ;;  %4279 = vmatprep.mubr.msk.bf16.mxu1 %vm4278_vm5, %v5461_v19  ;;  %5062 = vrcp.f32 %v2069_v32  ;;  %vm680_vm4 = vcmp.eq.s32.totalorder %v6415_v38, %v5935_v28  ;;  %vm682_vm5 = vcmp.eq.s32.totalorder %v6418_v39, %v5935_v28  ;;  %vm6503_vm8 = vmpackc.low %vm554_vm3, %vm552_vm2  ;;  %vm561_vm2 = vcmp.eq.s32.totalorder %v6537_v13, %v5906_v17 }
 0x1cb   : > { %5064 = vrcp.f32 %v2006_v40  ;;  %vm4284_vm11 = vmpackc.low %vm682_vm5, %vm680_vm4  ;;  %vm563_vm3 = vcmp.eq.s32.totalorder %v6540_v14, %v5906_v17  ;;  %vm689_vm5 = vcmp.eq.s32.totalorder %v6547_v16, %v5906_v17 }
 0x1cc   : > { %v6427_v41 = vpop.f32.mrb[4].mxu0  ;;  %v6429_v42 = vpop.f32.mrb[4].mxu1  ;;  %vm6532_vm13 = vmpackc.low %vm687_vm10, %vm685_vm9  ;;  %vm560_vm10 = vcmp.eq.s32.totalorder %v6537_v13, %v5935_v28 }
 0x1cd   : > { %v2007_v43 = vmax.f32 %v6427_v41, 1.0  ;;  %v1504_v44 = vpop.f32.mrb[5].mxu0  ;;  %v2071_v45 = vmax.f32 %v6429_v42, 1.0  ;;  %v1760_v46 = vpop.f32.mrb[5].mxu1 }
 0x1ce   : > { %v6445_v48 = vpop.f32.mrb[6].mxu0  ;;  %v6447_v49 = vpop.f32.mrb[6].mxu1 }
 0x1cf   : > { %5066 = vrcp.f32 %v2007_v43  ;;  %v2008_v50 = vmax.f32 %v6445_v48, 1.0  ;;  %v1507_v51 = vpop.f32.mrb[7].mxu0  ;;  %v1763_v52 = vpop.f32.mrb[7].mxu1  ;;  %v2072_v58 = vmax.f32 %v6447_v49, 1.0 }
 0x1d0   : > { %5068 = vrcp.f32 %v2071_v45 }
 0x1d1   : > { %v5059_v55 = vpop.eup %5058  ;;  %4153 = vmatmul.mubr.msk.bf16.gmra.mrb[112].mxu0 %vm6437_vm12, %v5461_v19  ;;  %4281 = vmatmul.mubr.msk.bf16.gmra.mrb[112].mxu1 %vm4280_vm15, %v5461_v19  ;;  %5070 = vrcp.f32 %v2008_v50  ;;  %vm6528_vm12 = vmpackc.low %vm559_vm7, %vm557_vm6  ;;  %vm558_vm15 = vcmp.eq.s32.totalorder %v6464_v54, %v5935_v28  ;;  %vm691_vm6 = vcmp.eq.s32.totalorder %v6550_v18, %v5906_v17 }
 0x1d2   : > { %2263 = vperm.xlu0 %5040, %v5059_v55   ;;  %4155 = vmatprep.mubr.msk.bf16.mxu0 %vm4154_vm0, %v5461_v19  ;;  %5072 = vrcp.f32 %v2072_v58  ;;  %vm684_vm0 = vcmp.eq.s32.totalorder %v6471_v56, %v5935_v28  ;;  %vm6583_vm4 = vmpackc.low %vm558_vm15, %vm556_vm14 }
 0x1d3   : > { %4283 = vmatprep.mubr.msk.bf16.mxu1 %vm4282_vm1, %v5461_v19  ;;  %v5061_v59 = vpop.eup %5060  ;;  %vm686_vm1 = vcmp.eq.s32.totalorder %v6474_v57, %v5935_v28  ;;  %vm4290_vm9 = vmpackc.low %vm691_vm6, %vm689_vm5 }
 0x1d4   : > { %v6487_v60 = vpop.f32.mrb[8].mxu0  ;;  %v6489_v61 = vpop.f32.mrb[8].mxu1  ;;  %2588 = vperm.xlu1 %5041, %v5061_v59   ;;  %vm4288_vm7 = vmpackc.low %vm686_vm1, %vm684_vm0 }
 0x1d5   : > { %v5063_v62 = vpop.eup %5062  ;;  %v2009_v63 = vmax.f32 %v6487_v60, 1.0  ;;  %v1512_v0 = vpop.f32.mrb[9].mxu0  ;;  %v2073_v1 = vmax.f32 %v6489_v61, 1.0 }
 0x1d6   : > { %v1768_v2 = vpop.f32.mrb[9].mxu1  ;;  %2583 = vperm.xlu0 %5040, %v5063_v62   ;;  %v6511_v4 = vpop.f32.mrb[10].mxu0 }
 0x1d7   : > { %v6513_v5 = vpop.f32.mrb[10].mxu1  ;;  %5074 = vrcp.f32 %v2009_v63  ;;  %v2010_v6 = vmax.f32 %v6511_v4, 1.0  ;;  %v1515_v8 = vpop.f32.mrb[11].mxu0 }
 0x1d8   : > { %v1771_v9 = vpop.f32.mrb[11].mxu1  ;;  %v5065_v11 = vpop.eup %5064  ;;  %5076 = vrcp.f32 %v2073_v1  ;;  %v2074_v20 = vmax.f32 %v6513_v5, 1.0 }
 0x1d9   : > { %v5067_v15 = vpop.eup %5066  ;;  %4157 = vmatmul.mubr.msk.bf16.gmra.mrb[116].mxu0 %vm6503_vm8, %v5461_v19  ;;  %4285 = vmatmul.mubr.msk.bf16.gmra.mrb[116].mxu1 %vm4284_vm11, %v5461_v19  ;;  %5078 = vrcp.f32 %v2010_v6  ;;  %vm4162_vm8 = vmpackc.low %vm563_vm3, %vm561_vm2  ;;  %vm562_vm11 = vcmp.eq.s32.totalorder %v6540_v14, %v5935_v28 }
 0x1da   : > { %2268 = vperm.xlu0 %5040, %v5065_v11   ;;  %2273 = vperm.xlu1 %5041, %v5067_v15   ;;  %v5069_v21 = vpop.eup %5068  ;;  %5080 = vrcp.f32 %v2074_v20  ;;  %vm4164_vm14 = vmpackc.low %vm562_vm11, %vm560_vm10 }
 0x1db   : > { %4159 = vmatprep.mubr.msk.bf16.mxu0 %vm6528_vm12, %v5461_v19  ;;  %4287 = vmatprep.mubr.msk.bf16.mxu1 %vm6532_vm13, %v5461_v19  ;;  %v5071_v25 = vpop.eup %5070  ;;  %vm688_vm12 = vcmp.eq.s32.totalorder %v6547_v16, %v5935_v28  ;;  %vm690_vm13 = vcmp.eq.s32.totalorder %v6550_v18, %v5935_v28 }
 0x1dc   : > { %v6567_v7 = vpop.f32.mrb[12].mxu0  ;;  %v6569_v22 = vpop.f32.mrb[12].mxu1  ;;  %vm4292_vm15 = vmpackc.low %vm690_vm13, %vm688_vm12 }
 0x1dd   : > { %v2011_v26 = vmax.f32 %v6567_v7, 1.0  ;;  %v1520_v27 = vpop.f32.mrb[13].mxu0  ;;  %v2075_v29 = vmax.f32 %v6569_v22, 1.0  ;;  %v1776_v32 = vpop.f32.mrb[13].mxu1 }
 0x1de   : > { %2593 = vperm.xlu0 %5040, %v5069_v21   ;;  %2278 = vperm.xlu1 %5041, %v5071_v25   ;;  %v6591_v34 = vpop.f32.mrb[14].mxu0  ;;  %v6593_v35 = vpop.f32.mrb[14].mxu1 }
 0x1df   : > { %5082 = vrcp.f32 %v2011_v26  ;;  %v2012_v36 = vmax.f32 %v6591_v34, 1.0  ;;  %v1523_v37 = vpop.f32.mrb[15].mxu0  ;;  %v1779_v38 = vpop.f32.mrb[15].mxu1  ;;  %v2076_v43 = vmax.f32 %v6593_v35, 1.0 }
 0x1e0   : > { %v5073_v39 = vpop.eup %5072  ;;  %5084 = vrcp.f32 %v2075_v29 }
 0x1e1   : > { %v5075_v40 = vpop.eup %5074  ;;  %4161 = vmatmul.mubr.msk.bf16.gmra.mrb[120].mxu0 %vm6583_vm4, %v5461_v19  ;;  %4289 = vmatmul.mubr.msk.bf16.gmra.mrb[120].mxu1 %vm4288_vm7, %v5461_v19  ;;  %5086 = vrcp.f32 %v2012_v36 }
 0x1e2   : > { %2598 = vperm.xlu1 %5041, %v5073_v39   ;;  %2283 = vperm.xlu0 %5040, %v5075_v40   ;;  %v5077_v17 = vpop.eup %5076  ;;  %5088 = vrcp.f32 %v2076_v43 }
 0x1e3   : > { %4163 = vmatprep.mubr.msk.bf16.mxu0 %vm4162_vm8, %v5461_v19  ;;  %4291 = vmatprep.mubr.msk.bf16.mxu1 %vm4290_vm9, %v5461_v19  ;;  %v5079_v46 = vpop.eup %5078 }
 0x1e4   : > { %v6623_v44 = vpop.f32.mrb[16].mxu0  ;;  %v6625_v45 = vpop.f32.mrb[16].mxu1 }
 0x1e5   : > { %v2013_v47 = vmax.f32 %v6623_v44, 1.0  ;;  %v1528_v50 = vpop.f32.mrb[17].mxu0  ;;  %v2077_v51 = vmax.f32 %v6625_v45, 1.0  ;;  %v1784_v52 = vpop.f32.mrb[17].mxu1 }
 0x1e6   : > { %2603 = vperm.xlu0 %5040, %v5077_v17   ;;  %2288 = vperm.xlu1 %5041, %v5079_v46   ;;  %v6632_v53 = vpop.f32.mrb[18].mxu0  ;;  %v6634_v54 = vpop.f32.mrb[18].mxu1 }
 0x1e7   : > { %5090 = vrcp.f32 %v2013_v47  ;;  %v2014_v55 = vmax.f32 %v6632_v53, 1.0  ;;  %v1531_v56 = vpop.f32.mrb[19].mxu0  ;;  %v1787_v57 = vpop.f32.mrb[19].mxu1  ;;  %v2078_v62 = vmax.f32 %v6634_v54, 1.0 }
 0x1e8   : > { %v5081_v58 = vpop.eup %5080  ;;  %5092 = vrcp.f32 %v2077_v51 }
 0x1e9   : > { %v5083_v59 = vpop.eup %5082  ;;  %4165 = vmatmul.mubr.msk.bf16.gmra.mrb[124].mxu0 %vm4164_vm14, %v5461_v19  ;;  %4293 = vmatmul.mubr.msk.bf16.gmra.mrb[124].mxu1 %vm4292_vm15, %v5461_v19  ;;  %5094 = vrcp.f32 %v2014_v55 }
 0x1ea   : > { %2608 = vperm.xlu1 %5041, %v5081_v58   ;;  %2293 = vperm.xlu0 %5040, %v5083_v59   ;;  %v5085_v63 = vpop.eup %5084  ;;  %5096 = vrcp.f32 %v2078_v62 }
 0x1eb   : > { %v5087_v1 = vpop.eup %5086 }
 0x1ec   : > { %v6643_v28 = vpop.f32.mrb[20].mxu0  ;;  %v6645_v0 = vpop.f32.mrb[20].mxu1 }
 0x1ed   : > { %v2015_v2 = vmax.f32 %v6643_v28, 1.0  ;;  %v1536_v3 = vpop.f32.mrb[21].mxu0  ;;  %v2079_v6 = vmax.f32 %v6645_v0, 1.0  ;;  %v1792_v8 = vpop.f32.mrb[21].mxu1 }
 0x1ee   : > { %2613 = vperm.xlu0 %5040, %v5085_v63   ;;  %2298 = vperm.xlu1 %5041, %v5087_v1   ;;  %v6649_v19 = vpop.f32.mrb[22].mxu0  ;;  %v6651_v9 = vpop.f32.mrb[22].mxu1 }
 0x1ef   : > { %5098 = vrcp.f32 %v2015_v2  ;;  %v2016_v10 = vmax.f32 %v6649_v19, 1.0  ;;  %v1539_v11 = vpop.f32.mrb[23].mxu0  ;;  %v1795_v12 = vpop.f32.mrb[23].mxu1  ;;  %v2080_v15 = vmax.f32 %v6651_v9, 1.0 }
 0x1f0   : > { %v5089_v13 = vpop.eup %5088  ;;  %5100 = vrcp.f32 %v2079_v6 }
 0x1f1   : > { %v5091_v14 = vpop.eup %5090  ;;  %5102 = vrcp.f32 %v2016_v10 }
 0x1f2   : > { %2618 = vperm.xlu1 %5041, %v5089_v13   ;;  %2303 = vperm.xlu0 %5040, %v5091_v14   ;;  %v5093_v16 = vpop.eup %5092  ;;  %5104 = vrcp.f32 %v2080_v15 }
 0x1f3   : > { %v5095_v21 = vpop.eup %5094 }
 0x1f4   : > { %v6655_v18 = vpop.f32.mrb[24].mxu0  ;;  %v6657_v20 = vpop.f32.mrb[24].mxu1 }
 0x1f5   : > { %v2017_v25 = vmax.f32 %v6655_v18, 1.0  ;;  %v1544_v26 = vpop.f32.mrb[25].mxu0  ;;  %v2081_v27 = vmax.f32 %v6657_v20, 1.0  ;;  %v1800_v29 = vpop.f32.mrb[25].mxu1 }
 0x1f6   : > { %2623 = vperm.xlu0 %5040, %v5093_v16   ;;  %2308 = vperm.xlu1 %5041, %v5095_v21   ;;  %v6661_v32 = vpop.f32.mrb[26].mxu0  ;;  %v6663_v33 = vpop.f32.mrb[26].mxu1 }
 0x1f7   : > { %5106 = vrcp.f32 %v2017_v25  ;;  %v2018_v36 = vmax.f32 %v6661_v32, 1.0  ;;  %v1547_v37 = vpop.f32.mrb[27].mxu0  ;;  %v1803_v38 = vpop.f32.mrb[27].mxu1  ;;  %v2082_v43 = vmax.f32 %v6663_v33, 1.0 }
 0x1f8   : > { %v5097_v39 = vpop.eup %5096  ;;  %5108 = vrcp.f32 %v2081_v27 }
 0x1f9   : > { %v5099_v40 = vpop.eup %5098  ;;  %5110 = vrcp.f32 %v2018_v36 }
 0x1fa   : > { %2628 = vperm.xlu1 %5041, %v5097_v39   ;;  %2313 = vperm.xlu0 %5040, %v5099_v40   ;;  %v5101_v17 = vpop.eup %5100  ;;  %5112 = vrcp.f32 %v2082_v43 }
 0x1fb   : > { %v5103_v50 = vpop.eup %5102 }
 0x1fc   : > { %v6667_v46 = vpop.f32.mrb[28].mxu0  ;;  %v6669_v47 = vpop.f32.mrb[28].mxu1 }
 0x1fd   : > { %v2019_v51 = vmax.f32 %v6667_v46, 1.0  ;;  %v1552_v52 = vpop.f32.mrb[29].mxu0  ;;  %v2083_v55 = vmax.f32 %v6669_v47, 1.0  ;;  %v1808_v56 = vpop.f32.mrb[29].mxu1 }
 0x1fe   : > { %2633 = vperm.xlu0 %5040, %v5101_v17   ;;  %2318 = vperm.xlu1 %5041, %v5103_v50   ;;  %v6673_v57 = vpop.f32.mrb[30].mxu0  ;;  %v6675_v58 = vpop.f32.mrb[30].mxu1 }
 0x1ff   : > { %5114 = vrcp.f32 %v2019_v51  ;;  %v2020_v59 = vmax.f32 %v6673_v57, 1.0  ;;  %v1555_v62 = vpop.f32.mrb[31].mxu0  ;;  %v1811_v63 = vpop.f32.mrb[31].mxu1  ;;  %v2084_v3 = vmax.f32 %v6675_v58, 1.0 }
 0x200   : > { %v5105_v1 = vpop.eup %5104  ;;  %5116 = vrcp.f32 %v2083_v55 }
 0x201   : > { %v5107_v2 = vpop.eup %5106  ;;  %5118 = vrcp.f32 %v2020_v59 }
 0x202   : > { %2638 = vperm.xlu1 %5041, %v5105_v1   ;;  %2323 = vperm.xlu0 %5040, %v5107_v2   ;;  %v5109_v6 = vpop.eup %5108  ;;  %5120 = vrcp.f32 %v2084_v3 }
 0x203   : > { %v5111_v11 = vpop.eup %5110 }
 0x204   : > { %v6679_v8 = vpop.f32.mrb[32].mxu0  ;;  %v6681_v10 = vpop.f32.mrb[32].mxu1 }
 0x205   : > { %v2021_v12 = vmax.f32 %v6679_v8, 1.0  ;;  %v1560_v13 = vpop.f32.mrb[33].mxu0  ;;  %v2085_v14 = vmax.f32 %v6681_v10, 1.0  ;;  %v1816_v15 = vpop.f32.mrb[33].mxu1 }
 0x206   : > { %2643 = vperm.xlu0 %5040, %v5109_v6   ;;  %2328 = vperm.xlu1 %5041, %v5111_v11   ;;  %v6685_v16 = vpop.f32.mrb[34].mxu0  ;;  %v6687_v21 = vpop.f32.mrb[34].mxu1 }
 0x207   : > { %5122 = vrcp.f32 %v2021_v12  ;;  %v2022_v25 = vmax.f32 %v6685_v16, 1.0  ;;  %v1563_v26 = vpop.f32.mrb[35].mxu0  ;;  %v1819_v27 = vpop.f32.mrb[35].mxu1  ;;  %v2086_v37 = vmax.f32 %v6687_v21, 1.0 }
 0x208   : > { %v5113_v29 = vpop.eup %5112  ;;  %5124 = vrcp.f32 %v2085_v14 }
 0x209   : > { %v5115_v36 = vpop.eup %5114  ;;  %5126 = vrcp.f32 %v2022_v25 }
 0x20a   : > { %2648 = vperm.xlu1 %5041, %v5113_v29   ;;  %2333 = vperm.xlu0 %5040, %v5115_v36   ;;  %v5117_v38 = vpop.eup %5116  ;;  %5128 = vrcp.f32 %v2086_v37 }
 0x20b   : > { %v5119_v43 = vpop.eup %5118 }
 0x20c   : > { %v6691_v39 = vpop.f32.mrb[36].mxu0  ;;  %v6693_v40 = vpop.f32.mrb[36].mxu1 }
 0x20d   : > { %v2023_v17 = vmax.f32 %v6691_v39, 1.0  ;;  %v1568_v50 = vpop.f32.mrb[37].mxu0  ;;  %v2087_v51 = vmax.f32 %v6693_v40, 1.0  ;;  %v1824_v52 = vpop.f32.mrb[37].mxu1 }
 0x20e   : > { %2653 = vperm.xlu0 %5040, %v5117_v38   ;;  %2338 = vperm.xlu1 %5041, %v5119_v43   ;;  %v6697_v55 = vpop.f32.mrb[38].mxu0  ;;  %v6699_v56 = vpop.f32.mrb[38].mxu1 }
 0x20f   : > { %5130 = vrcp.f32 %v2023_v17  ;;  %v2024_v59 = vmax.f32 %v6697_v55, 1.0  ;;  %v1571_v62 = vpop.f32.mrb[39].mxu0  ;;  %v1827_v63 = vpop.f32.mrb[39].mxu1  ;;  %v2088_v3 = vmax.f32 %v6699_v56, 1.0 }
 0x210   : > { %v5121_v1 = vpop.eup %5120  ;;  %5132 = vrcp.f32 %v2087_v51 }
 0x211   : > { %v5123_v2 = vpop.eup %5122  ;;  %5134 = vrcp.f32 %v2024_v59 }
 0x212   : > { %2658 = vperm.xlu1 %5041, %v5121_v1   ;;  %2343 = vperm.xlu0 %5040, %v5123_v2   ;;  %v5125_v6 = vpop.eup %5124  ;;  %5136 = vrcp.f32 %v2088_v3 }
 0x213   : > { %v5127_v13 = vpop.eup %5126 }
 0x214   : > { %v6703_v11 = vpop.f32.mrb[40].mxu0  ;;  %v6705_v12 = vpop.f32.mrb[40].mxu1 }
 0x215   : > { %v2025_v14 = vmax.f32 %v6703_v11, 1.0  ;;  %v1576_v15 = vpop.f32.mrb[41].mxu0  ;;  %v2089_v25 = vmax.f32 %v6705_v12, 1.0  ;;  %v1832_v26 = vpop.f32.mrb[41].mxu1 }
 0x216   : > { %2663 = vperm.xlu0 %5040, %v5125_v6   ;;  %2348 = vperm.xlu1 %5041, %v5127_v13   ;;  %v6709_v27 = vpop.f32.mrb[42].mxu0  ;;  %v6711_v29 = vpop.f32.mrb[42].mxu1 }
 0x217   : > { %5138 = vrcp.f32 %v2025_v14  ;;  %v2026_v36 = vmax.f32 %v6709_v27, 1.0  ;;  %v1579_v37 = vpop.f32.mrb[43].mxu0  ;;  %v1835_v38 = vpop.f32.mrb[43].mxu1  ;;  %v2090_v50 = vmax.f32 %v6711_v29, 1.0 }
 0x218   : > { %v5129_v43 = vpop.eup %5128  ;;  %5140 = vrcp.f32 %v2089_v25 }
 0x219   : > { %v5131_v17 = vpop.eup %5130  ;;  %5142 = vrcp.f32 %v2026_v36 }
 0x21a   : > { %2668 = vperm.xlu1 %5041, %v5129_v43   ;;  %2353 = vperm.xlu0 %5040, %v5131_v17   ;;  %v5133_v51 = vpop.eup %5132  ;;  %5144 = vrcp.f32 %v2090_v50 }
 0x21b   : > { %v5135_v62 = vpop.eup %5134 }
 0x21c   : > { %v6715_v52 = vpop.f32.mrb[44].mxu0  ;;  %v6717_v59 = vpop.f32.mrb[44].mxu1 }
 0x21d   : > { %v2027_v63 = vmax.f32 %v6715_v52, 1.0  ;;  %v1584_v1 = vpop.f32.mrb[45].mxu0  ;;  %v2091_v2 = vmax.f32 %v6717_v59, 1.0  ;;  %v1840_v3 = vpop.f32.mrb[45].mxu1 }
 0x21e   : > { %2673 = vperm.xlu0 %5040, %v5133_v51   ;;  %2358 = vperm.xlu1 %5041, %v5135_v62   ;;  %v6721_v6 = vpop.f32.mrb[46].mxu0  ;;  %v6723_v13 = vpop.f32.mrb[46].mxu1 }
 0x21f   : > { %7277 = vst [vmem:[#allocation14_spill] sm:$0xff] %v6723_v13  ;;  %5146 = vrcp.f32 %v2027_v63  ;;  %v2028_v14 = vmax.f32 %v6721_v6, 1.0  ;;  %v1587_v15 = vpop.f32.mrb[47].mxu0  ;;  %v1843_v25 = vpop.f32.mrb[47].mxu1  ;;  %v2092_v37 = vmax.f32 %v6723_v13, 1.0 }
 0x220   : > { %v5137_v26 = vpop.eup %5136  ;;  %5148 = vrcp.f32 %v2091_v2 }
 0x221   : > { %v5139_v36 = vpop.eup %5138  ;;  %5150 = vrcp.f32 %v2028_v14 }
 0x222   : > { %2678 = vperm.xlu1 %5041, %v5137_v26   ;;  %2363 = vperm.xlu0 %5040, %v5139_v36   ;;  %v5141_v38 = vpop.eup %5140  ;;  %5152 = vrcp.f32 %v2092_v37 }
 0x223   : > { %v5143_v50 = vpop.eup %5142 }
 0x224   : > { %v6727_v43 = vpop.f32.mrb[48].mxu0  ;;  %v6729_v17 = vpop.f32.mrb[48].mxu1 }
 0x225   : > { %7278 = vst [vmem:[#allocation15_spill] sm:$0xff] %v6727_v43  ;;  %7279 = vst [vmem:[#allocation16_spill] sm:$0xff] %v6729_v17  ;;  %v2029_v51 = vmax.f32 %v6727_v43, 1.0  ;;  %v1592_v62 = vpop.f32.mrb[49].mxu0  ;;  %v2093_v63 = vmax.f32 %v6729_v17, 1.0  ;;  %v1848_v1 = vpop.f32.mrb[49].mxu1 }
 0x226   : > { %2683 = vperm.xlu0 %5040, %v5141_v38   ;;  %2368 = vperm.xlu1 %5041, %v5143_v50   ;;  %v6733_v2 = vpop.f32.mrb[50].mxu0  ;;  %v6735_v3 = vpop.f32.mrb[50].mxu1 }
 0x227   : > { %7280 = vst [vmem:[#allocation17_spill] sm:$0xff] %v6733_v2  ;;  %7281 = vst [vmem:[#allocation18_spill] sm:$0xff] %v6735_v3  ;;  %5154 = vrcp.f32 %v2029_v51  ;;  %v2030_v14 = vmax.f32 %v6733_v2, 1.0  ;;  %v1595_v15 = vpop.f32.mrb[51].mxu0  ;;  %v1851_v25 = vpop.f32.mrb[51].mxu1  ;;  %v2094_v62 = vmax.f32 %v6735_v3, 1.0 }
 0x228   : > { %v5145_v26 = vpop.eup %5144  ;;  %5156 = vrcp.f32 %v2093_v63 }
 0x229   : > { %v5147_v36 = vpop.eup %5146  ;;  %5158 = vrcp.f32 %v2030_v14 }
 0x22a   : > { %2688 = vperm.xlu1 %5041, %v5145_v26   ;;  %2373 = vperm.xlu0 %5040, %v5147_v36   ;;  %v5149_v1 = vpop.eup %5148  ;;  %5160 = vrcp.f32 %v2094_v62 }
 0x22b   : > { %v5151_v50 = vpop.eup %5150 }
 0x22c   : > { %v6739_v37 = vpop.f32.mrb[52].mxu0  ;;  %v6741_v38 = vpop.f32.mrb[52].mxu1 }
 0x22d   : > { %7282 = vst [vmem:[#allocation19_spill] sm:$0xff] %v6739_v37  ;;  %7283 = vst [vmem:[#allocation20_spill] sm:$0xff] %v6741_v38  ;;  %v2031_v51 = vmax.f32 %v6739_v37, 1.0  ;;  %v1600_v17 = vpop.f32.mrb[53].mxu0  ;;  %v2095_v15 = vmax.f32 %v6741_v38, 1.0  ;;  %v1856_v25 = vpop.f32.mrb[53].mxu1 }
 0x22e   : > { %2693 = vperm.xlu0 %5040, %v5149_v1   ;;  %2378 = vperm.xlu1 %5041, %v5151_v50   ;;  %v6745_v63 = vpop.f32.mrb[54].mxu0  ;;  %v6747_v26 = vpop.f32.mrb[54].mxu1 }
 0x22f   : > { %7284 = vst [vmem:[#allocation21_spill] sm:$0xff] %v6745_v63  ;;  %7285 = vst [vmem:[#allocation22_spill] sm:$0xff] %v6747_v26  ;;  %5162 = vrcp.f32 %v2031_v51  ;;  %v2032_v14 = vmax.f32 %v6745_v63, 1.0  ;;  %v1603_v36 = vpop.f32.mrb[55].mxu0  ;;  %v1859_v3 = vpop.f32.mrb[55].mxu1  ;;  %v2096_v17 = vmax.f32 %v6747_v26, 1.0 }
 0x230   : > { %v5153_v2 = vpop.eup %5152  ;;  %5164 = vrcp.f32 %v2095_v15 }
 0x231   : > { %v5155_v43 = vpop.eup %5154  ;;  %5166 = vrcp.f32 %v2032_v14 }
 0x232   : > { %2698 = vperm.xlu1 %5041, %v5153_v2   ;;  %2383 = vperm.xlu0 %5040, %v5155_v43   ;;  %v5157_v25 = vpop.eup %5156  ;;  %5168 = vrcp.f32 %v2096_v17 }
 0x233   : > { %v5159_v50 = vpop.eup %5158 }
 0x234   : > { %v6751_v62 = vpop.f32.mrb[56].mxu0  ;;  %v6753_v1 = vpop.f32.mrb[56].mxu1 }
 0x235   : > { %7286 = vst [vmem:[#allocation23_spill] sm:$0xff] %v6751_v62  ;;  %7287 = vst [vmem:[#allocation24_spill] sm:$0xff] %v6753_v1  ;;  %v2033_v51 = vmax.f32 %v6751_v62, 1.0  ;;  %v1608_v38 = vpop.f32.mrb[57].mxu0  ;;  %v2097_v36 = vmax.f32 %v6753_v1, 1.0  ;;  %v1864_v3 = vpop.f32.mrb[57].mxu1 }
 0x236   : > { %2703 = vperm.xlu0 %5040, %v5157_v25   ;;  %2388 = vperm.xlu1 %5041, %v5159_v50   ;;  %v6757_v15 = vpop.f32.mrb[58].mxu0  ;;  %v6759_v2 = vpop.f32.mrb[58].mxu1 }
 0x237   : > { %7288 = vst [vmem:[#allocation25_spill] sm:$0xff] %v6757_v15  ;;  %7289 = vst [vmem:[#allocation26_spill] sm:$0xff] %v6759_v2  ;;  %5170 = vrcp.f32 %v2033_v51  ;;  %v2034_v43 = vmax.f32 %v6757_v15, 1.0  ;;  %v1611_v14 = vpop.f32.mrb[59].mxu0  ;;  %v1867_v26 = vpop.f32.mrb[59].mxu1  ;;  %v2098_v38 = vmax.f32 %v6759_v2, 1.0 }
 0x238   : > { %v5161_v63 = vpop.eup %5160  ;;  %5172 = vrcp.f32 %v2097_v36 }
 0x239   : > { %v5163_v37 = vpop.eup %5162  ;;  %5174 = vrcp.f32 %v2034_v43 }
 0x23a   : > { %2708 = vperm.xlu1 %5041, %v5161_v63   ;;  %2393 = vperm.xlu0 %5040, %v5163_v37   ;;  %v5165_v3 = vpop.eup %5164  ;;  %5176 = vrcp.f32 %v2098_v38 }
 0x23b   : > { %v5167_v50 = vpop.eup %5166 }
 0x23c   : > { %v6763_v17 = vpop.f32.mrb[60].mxu0  ;;  %v6765_v25 = vpop.f32.mrb[60].mxu1 }
 0x23d   : > { %7290 = vst [vmem:[#allocation27_spill] sm:$0xff] %v6763_v17  ;;  %7291 = vst [vmem:[#allocation28_spill] sm:$0xff] %v6765_v25  ;;  %v2035_v51 = vmax.f32 %v6763_v17, 1.0  ;;  %v1616_v1 = vpop.f32.mrb[61].mxu0  ;;  %v2099_v14 = vmax.f32 %v6765_v25, 1.0  ;;  %v1872_v26 = vpop.f32.mrb[61].mxu1 }
 0x23e   : > { %2713 = vperm.xlu0 %5040, %v5165_v3   ;;  %2398 = vperm.xlu1 %5041, %v5167_v50   ;;  %v6769_v36 = vpop.f32.mrb[62].mxu0  ;;  %v6771_v63 = vpop.f32.mrb[62].mxu1 }
 0x23f   : > { %7292 = vst [vmem:[#allocation29_spill] sm:$0xff] %v6769_v36  ;;  %7293 = vst [vmem:[#allocation30_spill] sm:$0xff] %v6771_v63  ;;  %5178 = vrcp.f32 %v2035_v51  ;;  %v2036_v37 = vmax.f32 %v6769_v36, 1.0  ;;  %v1619_v43 = vpop.f32.mrb[63].mxu0  ;;  %v1875_v2 = vpop.f32.mrb[63].mxu1  ;;  %v2100_v1 = vmax.f32 %v6771_v63, 1.0 }
 0x240   : > { %v5169_v15 = vpop.eup %5168  ;;  %5180 = vrcp.f32 %v2099_v14 }
 0x241   : > { %v5171_v62 = vpop.eup %5170  ;;  %5182 = vrcp.f32 %v2036_v37 }
 0x242   : > { %2718 = vperm.xlu1 %5041, %v5169_v15   ;;  %2403 = vperm.xlu0 %5040, %v5171_v62   ;;  %v5173_v26 = vpop.eup %5172  ;;  %5184 = vrcp.f32 %v2100_v1 }
 0x243   : > { %v5175_v50 = vpop.eup %5174 }
 0x244   : > { %v6775_v38 = vpop.f32.mrb[64].mxu0  ;;  %v6777_v3 = vpop.f32.mrb[64].mxu1 }
 0x245   : > { %7294 = vst [vmem:[#allocation31_spill] sm:$0xff] %v6775_v38  ;;  %7295 = vst [vmem:[#allocation32_spill] sm:$0xff] %v6777_v3  ;;  %v2037_v51 = vmax.f32 %v6775_v38, 1.0  ;;  %v1624_v25 = vpop.f32.mrb[65].mxu0  ;;  %v2101_v43 = vmax.f32 %v6777_v3, 1.0  ;;  %v1880_v2 = vpop.f32.mrb[65].mxu1 }
 0x246   : > { %2723 = vperm.xlu0 %5040, %v5173_v26   ;;  %2408 = vperm.xlu1 %5041, %v5175_v50   ;;  %v6781_v14 = vpop.f32.mrb[66].mxu0  ;;  %v6783_v15 = vpop.f32.mrb[66].mxu1 }
 0x247   : > { %7296 = vst [vmem:[#allocation33_spill] sm:$0xff] %v6781_v14  ;;  %7297 = vst [vmem:[#allocation34_spill] sm:$0xff] %v6783_v15  ;;  %5186 = vrcp.f32 %v2037_v51  ;;  %v2038_v62 = vmax.f32 %v6781_v14, 1.0  ;;  %v1627_v37 = vpop.f32.mrb[67].mxu0  ;;  %v1883_v63 = vpop.f32.mrb[67].mxu1  ;;  %v2102_v25 = vmax.f32 %v6783_v15, 1.0 }
 0x248   : > { %v5177_v36 = vpop.eup %5176  ;;  %5188 = vrcp.f32 %v2101_v43 }
 0x249   : > { %v5179_v17 = vpop.eup %5178  ;;  %5190 = vrcp.f32 %v2038_v62 }
 0x24a   : > { %2728 = vperm.xlu1 %5041, %v5177_v36   ;;  %2413 = vperm.xlu0 %5040, %v5179_v17   ;;  %v5181_v2 = vpop.eup %5180  ;;  %5192 = vrcp.f32 %v2102_v25 }
 0x24b   : > { %v5183_v50 = vpop.eup %5182 }
 0x24c   : > { %v6787_v1 = vpop.f32.mrb[68].mxu0  ;;  %v6789_v26 = vpop.f32.mrb[68].mxu1 }
 0x24d   : > { %7298 = vst [vmem:[#allocation35_spill] sm:$0xff] %v6787_v1  ;;  %7299 = vst [vmem:[#allocation36_spill] sm:$0xff] %v6789_v26  ;;  %v2039_v51 = vmax.f32 %v6787_v1, 1.0  ;;  %v1632_v3 = vpop.f32.mrb[69].mxu0  ;;  %v2103_v37 = vmax.f32 %v6789_v26, 1.0  ;;  %v1888_v63 = vpop.f32.mrb[69].mxu1 }
 0x24e   : > { %2733 = vperm.xlu0 %5040, %v5181_v2   ;;  %2418 = vperm.xlu1 %5041, %v5183_v50   ;;  %v6793_v43 = vpop.f32.mrb[70].mxu0  ;;  %v6795_v36 = vpop.f32.mrb[70].mxu1 }
 0x24f   : > { %7300 = vst [vmem:[#allocation37_spill] sm:$0xff] %v6793_v43  ;;  %7301 = vst [vmem:[#allocation38_spill] sm:$0xff] %v6795_v36  ;;  %5194 = vrcp.f32 %v2039_v51  ;;  %v2040_v17 = vmax.f32 %v6793_v43, 1.0  ;;  %v1635_v62 = vpop.f32.mrb[71].mxu0  ;;  %v1891_v15 = vpop.f32.mrb[71].mxu1  ;;  %v2104_v3 = vmax.f32 %v6795_v36, 1.0 }
 0x250   : > { %v5185_v14 = vpop.eup %5184  ;;  %5196 = vrcp.f32 %v2103_v37 }
 0x251   : > { %v5187_v38 = vpop.eup %5186  ;;  %v2264_v1 = vpop.permute.xlu0 %2263  ;;  %5198 = vrcp.f32 %v2040_v17 }
 0x252   : > { %2738 = vperm.xlu1 %5041, %v5185_v14   ;;  %2423 = vperm.xlu0 %5040, %v5187_v38   ;;  %v5189_v25 = vpop.eup %5188  ;;  %5200 = vrcp.f32 %v2104_v3 }
 0x253   : > { %v2589_v2 = vpop.permute.xlu1 %2588  ;;  %v5191_v63 = vpop.eup %5190 }
 0x254   : > { %v6799_v50 = vpop.f32.mrb[72].mxu0  ;;  %v2966_v15 = vmul.f32 %v2589_v2, %v6400_v31  ;;  %v6806_v38 = vpop.f32.mrb[72].mxu1 }
 0x255   : > { %7302 = vst [vmem:[#allocation39_spill] sm:$0xff] %v6799_v50  ;;  %v2041_v51 = vmax.f32 %v6799_v50, 1.0  ;;  %v2584_v26 = vpop.permute.xlu0 %2583  ;;  %v1640_v43 = vpop.f32.mrb[73].mxu0  ;;  %7303 = vst [vmem:[#allocation40_spill] sm:$0xff] %v6806_v38  ;;  %v2105_v50 = vmax.f32 %v6806_v38, 1.0 }
 0x256   : > { %v2965_v37 = vmul.f32 %v2584_v26, %v6389_v24  ;;  %2743 = vperm.xlu0 %5040, %v5189_v25   ;;  %2428 = vperm.xlu1 %5041, %v5191_v63   ;;  %v6804_v14 = vpop.f32.mrb[74].mxu0  ;;  %v1896_v36 = vpop.f32.mrb[73].mxu1  ;;  %v2901_v25 = vmul.f32 %v2264_v1, %v6387_v23 }
 0x257   : > { %5202 = vrcp.f32 %v2041_v51  ;;  %v2042_v17 = vmax.f32 %v6804_v14, 1.0  ;;  %v1643_v62 = vpop.f32.mrb[75].mxu0  ;;  %v5193_v43 = vpop.eup %5192 }
 0x258   : > { %v4719_v3 = vpack.c.bf16 %v2966_v15, %v2965_v37  ;;  %v6810_v13 = vpop.f32.mrb[74].mxu1  ;;  %5204 = vrcp.f32 %v2105_v50 }
 0x259   : > { %v5195_v31 = vpop.eup %5194  ;;  %v2269_v24 = vpop.permute.xlu0 %2268  ;;  %v2106_v2 = vmax.f32 %v6810_v13, 1.0  ;;  %5206 = vrcp.f32 %v2042_v17 }
 0x25a   : > { %v2274_v26 = vpop.permute.xlu1 %2273  ;;  %4907 = vst [vmem:[%s5622_s18 + $0x100] sm:$0xff] %v4719_v3   ;;  %v2902_v63 = vmul.f32 %v2269_v24, %v6398_v30  ;;  %v1899_v51 = vpop.f32.mrb[75].mxu1  ;;  %2748 = vperm.xlu1 %5041, %v5193_v43   ;;  %2433 = vperm.xlu0 %5040, %v5195_v31  }
 0x25b   : > { %v5197_v36 = vpop.eup %5196  ;;  %5208 = vrcp.f32 %v2106_v2  ;;  %v2903_v30 = vmul.f32 %v2274_v26, %v6427_v41 }
 0x25c   : > { %v4559_v15 = vpack.c.bf16 %v2902_v63, %v2901_v25  ;;  %v6816_v37 = vpop.f32.mrb[76].mxu0  ;;  %v6818_v62 = vpop.f32.mrb[76].mxu1 }
 0x25d   : > { %7304 = vst [vmem:[#allocation41_spill] sm:$0xff] %v6816_v37  ;;  %7305 = vst [vmem:[#allocation42_spill] sm:$0xff] %v6818_v62  ;;  %v5199_v38 = vpop.eup %5198  ;;  %v2043_v23 = vmax.f32 %v6816_v37, 1.0  ;;  %v2594_v1 = vpop.permute.xlu0 %2593  ;;  %v2107_v3 = vmax.f32 %v6818_v62, 1.0 }
 0x25e   : > { %v2279_v50 = vpop.permute.xlu1 %2278  ;;  %4560 = vst [vmem:[%s5622_s18] sm:$0xff] %v4559_v15   ;;  %v1648_v31 = vpop.f32.mrb[77].mxu0  ;;  %2753 = vperm.xlu0 %5040, %v5197_v36   ;;  %2438 = vperm.xlu1 %5041, %v5199_v38   ;;  %v2967_v26 = vmul.f32 %v2594_v1, %v6429_v42 }
 0x25f   : > { %v2904_v43 = vmul.f32 %v2279_v50, %v6445_v48  ;;  %v1904_v17 = vpop.f32.mrb[77].mxu1  ;;  %5210 = vrcp.f32 %v2043_v23  ;;  %v6825_v24 = vpop.f32.mrb[78].mxu0 }
 0x260   : > { %v6827_v25 = vpop.f32.mrb[78].mxu1  ;;  %v5201_v63 = vpop.eup %5200  ;;  %v2044_v62 = vmax.f32 %v6825_v24, 1.0  ;;  %5212 = vrcp.f32 %v2107_v3 }
 0x261   : > { %v4564_v51 = vpack.c.bf16 %v2904_v43, %v2903_v30  ;;  %v1651_v2 = vpop.f32.mrb[79].mxu0  ;;  %v1907_v15 = vpop.f32.mrb[79].mxu1  ;;  %v2108_v38 = vmax.f32 %v6827_v25, 1.0 }
 0x262   : > { %v5203_v37 = vpop.eup %5202  ;;  %v2599_v41 = vpop.permute.xlu1 %2598  ;;  %2758 = vperm.xlu1 %5041, %v5201_v63   ;;  %5214 = vrcp.f32 %v2044_v62 }
 0x263   : > { %v2284_v48 = vpop.permute.xlu0 %2283  ;;  %4876 = vst [vmem:[%s5622_s18 + $0x8] sm:$0xff] %v4564_v51   ;;  %v2968_v36 = vmul.f32 %v2599_v41, %v6447_v49  ;;  %2443 = vperm.xlu0 %5040, %v5203_v37   ;;  %v5205_v23 = vpop.eup %5204  ;;  %5216 = vrcp.f32 %v2108_v38 }
 0x264   : > { %v6834_v30 = vpop.f32.mrb[80].mxu0  ;;  %v6836_v43 = vpop.f32.mrb[80].mxu1  ;;  %v2905_v49 = vmul.f32 %v2284_v48, %v6487_v60 }
 0x265   : > { %v4724_v50 = vpack.c.bf16 %v2968_v36, %v2967_v26  ;;  %v5207_v3 = vpop.eup %5206  ;;  %v2045_v31 = vmax.f32 %v6834_v30, 1.0  ;;  %v2109_v1 = vmax.f32 %v6836_v43, 1.0  ;;  %v1656_v62 = vpop.f32.mrb[81].mxu0 }
 0x266   : > { %v2289_v42 = vpop.permute.xlu1 %2288  ;;  %2448 = vperm.xlu1 %5041, %v5207_v3   ;;  %v1912_v63 = vpop.f32.mrb[81].mxu1 }
 0x267   : > { %v2604_v17 = vpop.permute.xlu0 %2603  ;;  %4908 = vst [vmem:[%s5622_s18 + $0x108] sm:$0xff] %v4724_v50   ;;  %v2906_v37 = vmul.f32 %v2289_v42, %v6511_v4  ;;  %2763 = vperm.xlu0 %5040, %v5205_v23   ;;  %5218 = vrcp.f32 %v2045_v31  ;;  %v6843_v51 = vpop.f32.mrb[82].mxu0 }
 0x268   : > { %v6845_v2 = vpop.f32.mrb[82].mxu1  ;;  %v5209_v15 = vpop.eup %5208  ;;  %v2046_v26 = vmax.f32 %v6843_v51, 1.0  ;;  %5220 = vrcp.f32 %v2109_v1  ;;  %v2969_v48 = vmul.f32 %v2604_v17, %v6489_v61 }
 0x269   : > { %v4569_v41 = vpack.c.bf16 %v2906_v37, %v2905_v49  ;;  %v1659_v38 = vpop.f32.mrb[83].mxu0  ;;  %v1915_v36 = vpop.f32.mrb[83].mxu1  ;;  %v2110_v23 = vmax.f32 %v6845_v2, 1.0 }
 0x26a   : > { %v5211_v50 = vpop.eup %5210  ;;  %v2609_v60 = vpop.permute.xlu1 %2608  ;;  %2768 = vperm.xlu1 %5041, %v5209_v15   ;;  %5222 = vrcp.f32 %v2046_v26 }
 0x26b   : > { %v2294_v4 = vpop.permute.xlu0 %2293  ;;  %4877 = vst [vmem:[%s5622_s18 + $0x10] sm:$0xff] %v4569_v41   ;;  %v2970_v3 = vmul.f32 %v2609_v60, %v6513_v5  ;;  %2453 = vperm.xlu0 %5040, %v5211_v50   ;;  %v5213_v31 = vpop.eup %5212  ;;  %5224 = vrcp.f32 %v2110_v23 }
 0x26c   : > { %v6852_v49 = vpop.f32.mrb[84].mxu0  ;;  %v6854_v37 = vpop.f32.mrb[84].mxu1  ;;  %v2907_v5 = vmul.f32 %v2294_v4, %v6567_v7 }
 0x26d   : > { %v4729_v42 = vpack.c.bf16 %v2970_v3, %v2969_v48  ;;  %v5215_v1 = vpop.eup %5214  ;;  %v2047_v62 = vmax.f32 %v6852_v49, 1.0  ;;  %v2111_v17 = vmax.f32 %v6854_v37, 1.0  ;;  %v1664_v41 = vpop.f32.mrb[85].mxu0 }
 0x26e   : > { %v2299_v61 = vpop.permute.xlu1 %2298  ;;  %2458 = vperm.xlu1 %5041, %v5215_v1   ;;  %v1920_v26 = vpop.f32.mrb[85].mxu1 }
 0x26f   : > { %v2614_v63 = vpop.permute.xlu0 %2613  ;;  %4909 = vst [vmem:[%s5622_s18 + $0x110] sm:$0xff] %v4729_v42   ;;  %v2908_v15 = vmul.f32 %v2299_v61, %v6591_v34  ;;  %2773 = vperm.xlu0 %5040, %v5213_v31   ;;  %5226 = vrcp.f32 %v2047_v62  ;;  %v6861_v38 = vpop.f32.mrb[86].mxu0 }
 0x270   : > { %v6863_v36 = vpop.f32.mrb[86].mxu1  ;;  %v5217_v50 = vpop.eup %5216  ;;  %v2048_v48 = vmax.f32 %v6861_v38, 1.0  ;;  %5228 = vrcp.f32 %v2111_v17  ;;  %v2971_v4 = vmul.f32 %v2614_v63, %v6569_v22 }
 0x271   : > { %v4574_v60 = vpack.c.bf16 %v2908_v15, %v2907_v5  ;;  %v1667_v23 = vpop.f32.mrb[87].mxu0  ;;  %v1923_v3 = vpop.f32.mrb[87].mxu1  ;;  %v2112_v31 = vmax.f32 %v6863_v36, 1.0 }
 0x272   : > { %v5219_v42 = vpop.eup %5218  ;;  %v2619_v7 = vpop.permute.xlu1 %2618  ;;  %2778 = vperm.xlu1 %5041, %v5217_v50   ;;  %5230 = vrcp.f32 %v2048_v48 }
 0x273   : > { %v2304_v34 = vpop.permute.xlu0 %2303  ;;  %4878 = vst [vmem:[%s5622_s18 + $0x18] sm:$0xff] %v4574_v60   ;;  %v2972_v1 = vmul.f32 %v2619_v7, %v6593_v35  ;;  %2463 = vperm.xlu0 %5040, %v5219_v42   ;;  %v5221_v62 = vpop.eup %5220  ;;  %5232 = vrcp.f32 %v2112_v31 }
 0x274   : > { %v6870_v5 = vpop.f32.mrb[88].mxu0  ;;  %v6872_v15 = vpop.f32.mrb[88].mxu1  ;;  %v2909_v35 = vmul.f32 %v2304_v34, %v6623_v44 }
 0x275   : > { %v4734_v61 = vpack.c.bf16 %v2972_v1, %v2971_v4  ;;  %v5223_v17 = vpop.eup %5222  ;;  %v2049_v41 = vmax.f32 %v6870_v5, 1.0  ;;  %v2113_v63 = vmax.f32 %v6872_v15, 1.0  ;;  %v1672_v60 = vpop.f32.mrb[89].mxu0 }
 0x276   : > { %v2309_v22 = vpop.permute.xlu1 %2308  ;;  %2468 = vperm.xlu1 %5041, %v5223_v17   ;;  %v1928_v48 = vpop.f32.mrb[89].mxu1 }
 0x277   : > { %v2624_v26 = vpop.permute.xlu0 %2623  ;;  %4910 = vst [vmem:[%s5622_s18 + $0x118] sm:$0xff] %v4734_v61   ;;  %v2910_v50 = vmul.f32 %v2309_v22, %v6632_v53  ;;  %2783 = vperm.xlu0 %5040, %v5221_v62   ;;  %5234 = vrcp.f32 %v2049_v41  ;;  %v6879_v23 = vpop.f32.mrb[90].mxu0 }
 0x278   : > { %v6881_v3 = vpop.f32.mrb[90].mxu1  ;;  %v5225_v42 = vpop.eup %5224  ;;  %v2050_v4 = vmax.f32 %v6879_v23, 1.0  ;;  %5236 = vrcp.f32 %v2113_v63  ;;  %v2973_v34 = vmul.f32 %v2624_v26, %v6625_v45 }
 0x279   : > { %v4579_v7 = vpack.c.bf16 %v2910_v50, %v2909_v35  ;;  %v1675_v31 = vpop.f32.mrb[91].mxu0  ;;  %v1931_v1 = vpop.f32.mrb[91].mxu1  ;;  %v2114_v62 = vmax.f32 %v6881_v3, 1.0 }
 0x27a   : > { %v5227_v61 = vpop.eup %5226  ;;  %v2629_v44 = vpop.permute.xlu1 %2628  ;;  %2788 = vperm.xlu1 %5041, %v5225_v42   ;;  %5238 = vrcp.f32 %v2050_v4 }
 0x27b   : > { %v2314_v53 = vpop.permute.xlu0 %2313  ;;  %4879 = vst [vmem:[%s5622_s18 + $0x20] sm:$0xff] %v4579_v7   ;;  %v2974_v17 = vmul.f32 %v2629_v44, %v6634_v54  ;;  %2473 = vperm.xlu0 %5040, %v5227_v61   ;;  %v5229_v41 = vpop.eup %5228  ;;  %5240 = vrcp.f32 %v2114_v62 }
 0x27c   : > { %v6888_v35 = vpop.f32.mrb[92].mxu0  ;;  %v6890_v50 = vpop.f32.mrb[92].mxu1  ;;  %v2911_v54 = vmul.f32 %v2314_v53, %v6643_v28 }
 0x27d   : > { %v4739_v22 = vpack.c.bf16 %v2974_v17, %v2973_v34  ;;  %v5231_v63 = vpop.eup %5230  ;;  %v2051_v60 = vmax.f32 %v6888_v35, 1.0  ;;  %v2115_v26 = vmax.f32 %v6890_v50, 1.0  ;;  %v1680_v7 = vpop.f32.mrb[93].mxu0 }
 0x27e   : > { %v2319_v45 = vpop.permute.xlu1 %2318  ;;  %2478 = vperm.xlu1 %5041, %v5231_v63   ;;  %v1936_v4 = vpop.f32.mrb[93].mxu1 }
 0x27f   : > { %v2634_v48 = vpop.permute.xlu0 %2633  ;;  %4911 = vst [vmem:[%s5622_s18 + $0x120] sm:$0xff] %v4739_v22   ;;  %v2912_v42 = vmul.f32 %v2319_v45, %v6649_v19  ;;  %2793 = vperm.xlu0 %5040, %v5229_v41   ;;  %5242 = vrcp.f32 %v2051_v60  ;;  %v6897_v31 = vpop.f32.mrb[94].mxu0 }
 0x280   : > { %v6899_v1 = vpop.f32.mrb[94].mxu1  ;;  %v5233_v61 = vpop.eup %5232  ;;  %v2052_v34 = vmax.f32 %v6897_v31, 1.0  ;;  %5244 = vrcp.f32 %v2115_v26  ;;  %v2975_v53 = vmul.f32 %v2634_v48, %v6645_v0 }
 0x281   : > { %v4584_v44 = vpack.c.bf16 %v2912_v42, %v2911_v54  ;;  %v1683_v62 = vpop.f32.mrb[95].mxu0  ;;  %v1939_v17 = vpop.f32.mrb[95].mxu1  ;;  %v2116_v41 = vmax.f32 %v6899_v1, 1.0 }
 0x282   : > { %v5235_v22 = vpop.eup %5234  ;;  %v2639_v28 = vpop.permute.xlu1 %2638  ;;  %2798 = vperm.xlu1 %5041, %v5233_v61   ;;  %5246 = vrcp.f32 %v2052_v34 }
 0x283   : > { %v2324_v19 = vpop.permute.xlu0 %2323  ;;  %4880 = vst [vmem:[%s5622_s18 + $0x28] sm:$0xff] %v4584_v44   ;;  %v2976_v63 = vmul.f32 %v2639_v28, %v6651_v9  ;;  %2483 = vperm.xlu0 %5040, %v5235_v22   ;;  %v5237_v60 = vpop.eup %5236  ;;  %5248 = vrcp.f32 %v2116_v41 }
 0x284   : > { %v6906_v54 = vpop.f32.mrb[96].mxu0  ;;  %v6908_v42 = vpop.f32.mrb[96].mxu1  ;;  %v2913_v9 = vmul.f32 %v2324_v19, %v6655_v18 }
 0x285   : > { %v4744_v45 = vpack.c.bf16 %v2976_v63, %v2975_v53  ;;  %v5239_v26 = vpop.eup %5238  ;;  %v2053_v7 = vmax.f32 %v6906_v54, 1.0  ;;  %v2117_v48 = vmax.f32 %v6908_v42, 1.0  ;;  %v1688_v44 = vpop.f32.mrb[97].mxu0 }
 0x286   : > { %v2329_v0 = vpop.permute.xlu1 %2328  ;;  %2488 = vperm.xlu1 %5041, %v5239_v26   ;;  %v1944_v34 = vpop.f32.mrb[97].mxu1 }
 0x287   : > { %v2644_v4 = vpop.permute.xlu0 %2643  ;;  %4912 = vst [vmem:[%s5622_s18 + $0x128] sm:$0xff] %v4744_v45   ;;  %v2914_v61 = vmul.f32 %v2329_v0, %v6661_v32  ;;  %2803 = vperm.xlu0 %5040, %v5237_v60   ;;  %5250 = vrcp.f32 %v2053_v7  ;;  %v6915_v62 = vpop.f32.mrb[98].mxu0 }
 0x288   : > { %v6917_v17 = vpop.f32.mrb[98].mxu1  ;;  %v5241_v22 = vpop.eup %5240  ;;  %v2054_v53 = vmax.f32 %v6915_v62, 1.0  ;;  %5252 = vrcp.f32 %v2117_v48  ;;  %v2977_v19 = vmul.f32 %v2644_v4, %v6657_v20 }
 0x289   : > { %v4589_v28 = vpack.c.bf16 %v2914_v61, %v2913_v9  ;;  %v1691_v41 = vpop.f32.mrb[99].mxu0  ;;  %v1947_v63 = vpop.f32.mrb[99].mxu1  ;;  %v2118_v60 = vmax.f32 %v6917_v17, 1.0 }
 0x28a   : > { %v5243_v45 = vpop.eup %5242  ;;  %v2649_v18 = vpop.permute.xlu1 %2648  ;;  %2808 = vperm.xlu1 %5041, %v5241_v22   ;;  %5254 = vrcp.f32 %v2054_v53 }
 0x28b   : > { %v2334_v32 = vpop.permute.xlu0 %2333  ;;  %4881 = vst [vmem:[%s5622_s18 + $0x30] sm:$0xff] %v4589_v28   ;;  %v2978_v26 = vmul.f32 %v2649_v18, %v6663_v33  ;;  %2493 = vperm.xlu0 %5040, %v5243_v45   ;;  %v5245_v7 = vpop.eup %5244  ;;  %5256 = vrcp.f32 %v2118_v60 }
 0x28c   : > { %v6924_v9 = vpop.f32.mrb[100].mxu0  ;;  %v6926_v61 = vpop.f32.mrb[100].mxu1  ;;  %v2915_v33 = vmul.f32 %v2334_v32, %v6667_v46 }
 0x28d   : > { %v4749_v0 = vpack.c.bf16 %v2978_v26, %v2977_v19  ;;  %v5247_v48 = vpop.eup %5246  ;;  %v2055_v44 = vmax.f32 %v6924_v9, 1.0  ;;  %v2119_v4 = vmax.f32 %v6926_v61, 1.0  ;;  %v1696_v28 = vpop.f32.mrb[101].mxu0 }
 0x28e   : > { %v2339_v20 = vpop.permute.xlu1 %2338  ;;  %2498 = vperm.xlu1 %5041, %v5247_v48   ;;  %v1952_v53 = vpop.f32.mrb[101].mxu1 }
 0x28f   : > { %v2654_v34 = vpop.permute.xlu0 %2653  ;;  %4913 = vst [vmem:[%s5622_s18 + $0x130] sm:$0xff] %v4749_v0   ;;  %v2916_v22 = vmul.f32 %v2339_v20, %v6673_v57  ;;  %2813 = vperm.xlu0 %5040, %v5245_v7   ;;  %5258 = vrcp.f32 %v2055_v44  ;;  %v6933_v41 = vpop.f32.mrb[102].mxu0 }
 0x290   : > { %v6935_v63 = vpop.f32.mrb[102].mxu1  ;;  %v5249_v45 = vpop.eup %5248  ;;  %v2056_v19 = vmax.f32 %v6933_v41, 1.0  ;;  %5260 = vrcp.f32 %v2119_v4  ;;  %v2979_v32 = vmul.f32 %v2654_v34, %v6669_v47 }
 0x291   : > { %v4594_v18 = vpack.c.bf16 %v2916_v22, %v2915_v33  ;;  %v1699_v60 = vpop.f32.mrb[103].mxu0  ;;  %v1955_v26 = vpop.f32.mrb[103].mxu1  ;;  %v2120_v7 = vmax.f32 %v6935_v63, 1.0 }
 0x292   : > { %v5251_v0 = vpop.eup %5250  ;;  %v2659_v46 = vpop.permute.xlu1 %2658  ;;  %2818 = vperm.xlu1 %5041, %v5249_v45   ;;  %5262 = vrcp.f32 %v2056_v19 }
 0x293   : > { %v2344_v57 = vpop.permute.xlu0 %2343  ;;  %4882 = vst [vmem:[%s5622_s18 + $0x38] sm:$0xff] %v4594_v18   ;;  %v2980_v48 = vmul.f32 %v2659_v46, %v6675_v58  ;;  %2503 = vperm.xlu0 %5040, %v5251_v0   ;;  %v5253_v44 = vpop.eup %5252  ;;  %5264 = vrcp.f32 %v2120_v7 }
 0x294   : > { %v6942_v33 = vpop.f32.mrb[104].mxu0  ;;  %v6944_v22 = vpop.f32.mrb[104].mxu1  ;;  %v2917_v58 = vmul.f32 %v2344_v57, %v6679_v8 }
 0x295   : > { %v4754_v20 = vpack.c.bf16 %v2980_v48, %v2979_v32  ;;  %v5255_v4 = vpop.eup %5254  ;;  %v2057_v28 = vmax.f32 %v6942_v33, 1.0  ;;  %v2121_v34 = vmax.f32 %v6944_v22, 1.0  ;;  %v1704_v18 = vpop.f32.mrb[105].mxu0 }
 0x296   : > { %v2349_v47 = vpop.permute.xlu1 %2348  ;;  %2508 = vperm.xlu1 %5041, %v5255_v4   ;;  %v1960_v19 = vpop.f32.mrb[105].mxu1 }
 0x297   : > { %v2664_v53 = vpop.permute.xlu0 %2663  ;;  %4914 = vst [vmem:[%s5622_s18 + $0x138] sm:$0xff] %v4754_v20   ;;  %v2918_v45 = vmul.f32 %v2349_v47, %v6685_v16  ;;  %2823 = vperm.xlu0 %5040, %v5253_v44   ;;  %5266 = vrcp.f32 %v2057_v28  ;;  %v6951_v60 = vpop.f32.mrb[106].mxu0 }
 0x298   : > { %v6953_v26 = vpop.f32.mrb[106].mxu1  ;;  %v5257_v0 = vpop.eup %5256  ;;  %v2058_v32 = vmax.f32 %v6951_v60, 1.0  ;;  %5268 = vrcp.f32 %v2121_v34  ;;  %v2981_v57 = vmul.f32 %v2664_v53, %v6681_v10 }
 0x299   : > { %v4599_v46 = vpack.c.bf16 %v2918_v45, %v2917_v58  ;;  %v1707_v7 = vpop.f32.mrb[107].mxu0  ;;  %v1963_v48 = vpop.f32.mrb[107].mxu1  ;;  %v2122_v44 = vmax.f32 %v6953_v26, 1.0 }
 0x29a   : > { %v5259_v20 = vpop.eup %5258  ;;  %v2669_v8 = vpop.permute.xlu1 %2668  ;;  %2828 = vperm.xlu1 %5041, %v5257_v0   ;;  %5270 = vrcp.f32 %v2058_v32 }
 0x29b   : > { %v2354_v16 = vpop.permute.xlu0 %2353  ;;  %4883 = vst [vmem:[%s5622_s18 + $0x40] sm:$0xff] %v4599_v46   ;;  %v2982_v4 = vmul.f32 %v2669_v8, %v6687_v21  ;;  %2513 = vperm.xlu0 %5040, %v5259_v20   ;;  %v5261_v28 = vpop.eup %5260  ;;  %5272 = vrcp.f32 %v2122_v44 }
 0x29c   : > { %v6960_v58 = vpop.f32.mrb[108].mxu0  ;;  %v6962_v45 = vpop.f32.mrb[108].mxu1  ;;  %v2919_v21 = vmul.f32 %v2354_v16, %v6691_v39 }
 0x29d   : > { %v4759_v47 = vpack.c.bf16 %v2982_v4, %v2981_v57  ;;  %v5263_v34 = vpop.eup %5262  ;;  %v2059_v18 = vmax.f32 %v6960_v58, 1.0  ;;  %v2123_v53 = vmax.f32 %v6962_v45, 1.0  ;;  %v1712_v46 = vpop.f32.mrb[109].mxu0 }
 0x29e   : > { %v2359_v10 = vpop.permute.xlu1 %2358  ;;  %2518 = vperm.xlu1 %5041, %v5263_v34   ;;  %v1968_v32 = vpop.f32.mrb[109].mxu1 }
 0x29f   : > { %v2674_v19 = vpop.permute.xlu0 %2673  ;;  %4915 = vst [vmem:[%s5622_s18 + $0x140] sm:$0xff] %v4759_v47   ;;  %v2920_v0 = vmul.f32 %v2359_v10, %v6697_v55  ;;  %2833 = vperm.xlu0 %5040, %v5261_v28   ;;  %5274 = vrcp.f32 %v2059_v18  ;;  %v6969_v7 = vpop.f32.mrb[110].mxu0 }
 0x2a0   : > { %v6971_v48 = vpop.f32.mrb[110].mxu1  ;;  %v5265_v20 = vpop.eup %5264  ;;  %v2060_v57 = vmax.f32 %v6969_v7, 1.0  ;;  %5276 = vrcp.f32 %v2123_v53  ;;  %v2983_v16 = vmul.f32 %v2674_v19, %v6693_v40 }
 0x2a1   : > { %v4604_v8 = vpack.c.bf16 %v2920_v0, %v2919_v21  ;;  %v1715_v44 = vpop.f32.mrb[111].mxu0  ;;  %v1971_v4 = vpop.f32.mrb[111].mxu1  ;;  %v2124_v28 = vmax.f32 %v6971_v48, 1.0 }
 0x2a2   : > { %v5267_v47 = vpop.eup %5266  ;;  %v2679_v39 = vpop.permute.xlu1 %2678  ;;  %2838 = vperm.xlu1 %5041, %v5265_v20   ;;  %5278 = vrcp.f32 %v2060_v57 }
 0x2a3   : > { %v2364_v55 = vpop.permute.xlu0 %2363  ;;  %4884 = vst [vmem:[%s5622_s18 + $0x48] sm:$0xff] %v4604_v8   ;;  %v2984_v34 = vmul.f32 %v2679_v39, %v6699_v56  ;;  %2523 = vperm.xlu0 %5040, %v5267_v47   ;;  %v5269_v18 = vpop.eup %5268  ;;  %5280 = vrcp.f32 %v2124_v28 }
 0x2a4   : > { %v6978_v21 = vpop.f32.mrb[112].mxu0  ;;  %v6980_v0 = vpop.f32.mrb[112].mxu1  ;;  %v2921_v56 = vmul.f32 %v2364_v55, %v6703_v11 }
 0x2a5   : > { %v4764_v10 = vpack.c.bf16 %v2984_v34, %v2983_v16  ;;  %v5271_v53 = vpop.eup %5270  ;;  %v2061_v46 = vmax.f32 %v6978_v21, 1.0  ;;  %v2125_v19 = vmax.f32 %v6980_v0, 1.0  ;;  %v1720_v8 = vpop.f32.mrb[113].mxu0 }
 0x2a6   : > { %v2369_v40 = vpop.permute.xlu1 %2368  ;;  %2528 = vperm.xlu1 %5041, %v5271_v53   ;;  %v1976_v57 = vpop.f32.mrb[113].mxu1 }
 0x2a7   : > { %v2684_v32 = vpop.permute.xlu0 %2683  ;;  %4916 = vst [vmem:[%s5622_s18 + $0x148] sm:$0xff] %v4764_v10   ;;  %v2922_v20 = vmul.f32 %v2369_v40, %v6709_v27  ;;  %2843 = vperm.xlu0 %5040, %v5269_v18   ;;  %5282 = vrcp.f32 %v2061_v46  ;;  %v6987_v44 = vpop.f32.mrb[114].mxu0 }
 0x2a8   : > { %v6989_v4 = vpop.f32.mrb[114].mxu1  ;;  %v5273_v47 = vpop.eup %5272  ;;  %v2062_v16 = vmax.f32 %v6987_v44, 1.0  ;;  %5284 = vrcp.f32 %v2125_v19  ;;  %v2985_v55 = vmul.f32 %v2684_v32, %v6705_v12 }
 0x2a9   : > { %v4609_v39 = vpack.c.bf16 %v2922_v20, %v2921_v56  ;;  %v1723_v28 = vpop.f32.mrb[115].mxu0  ;;  %v1979_v34 = vpop.f32.mrb[115].mxu1  ;;  %v2126_v18 = vmax.f32 %v6989_v4, 1.0 }
 0x2aa   : > { %v5275_v10 = vpop.eup %5274  ;;  %v2689_v11 = vpop.permute.xlu1 %2688  ;;  %2848 = vperm.xlu1 %5041, %v5273_v47   ;;  %5286 = vrcp.f32 %v2062_v16 }
 0x2ab   : > { %v2374_v27 = vpop.permute.xlu0 %2373  ;;  %4885 = vst [vmem:[%s5622_s18 + $0x50] sm:$0xff] %v4609_v39   ;;  %v2986_v53 = vmul.f32 %v2689_v11, %v6711_v29  ;;  %2533 = vperm.xlu0 %5040, %v5275_v10   ;;  %v5277_v46 = vpop.eup %5276  ;;  %5288 = vrcp.f32 %v2126_v18 }
 0x2ac   : > { %v6996_v56 = vpop.f32.mrb[116].mxu0  ;;  %v6998_v20 = vpop.f32.mrb[116].mxu1  ;;  %v2923_v29 = vmul.f32 %v2374_v27, %v6715_v52 }
 0x2ad   : > { %v4769_v40 = vpack.c.bf16 %v2986_v53, %v2985_v55  ;;  %7306 = vst [vmem:[#allocation43_spill] sm:$0xff] %v6998_v20  ;;  %v5279_v19 = vpop.eup %5278  ;;  %v2063_v8 = vmax.f32 %v6996_v56, 1.0  ;;  %v2127_v32 = vmax.f32 %v6998_v20, 1.0  ;;  %v1728_v39 = vpop.f32.mrb[117].mxu0 }
 0x2ae   : > { %v2379_v12 = vpop.permute.xlu1 %2378  ;;  %2538 = vperm.xlu1 %5041, %v5279_v19   ;;  %v1984_v16 = vpop.f32.mrb[117].mxu1  ;;  %v7308_v19 = vld [vmem:[#allocation14_spill] sm:$0xff] }
 0x2af   : > { %v2694_v57 = vpop.permute.xlu0 %2693  ;;  %4917 = vst [vmem:[%s5622_s18 + $0x150] sm:$0xff] %v4769_v40   ;;  %v2924_v47 = vmul.f32 %v2379_v12, %v6721_v6  ;;  %2853 = vperm.xlu0 %5040, %v5277_v46   ;;  %5290 = vrcp.f32 %v2063_v8  ;;  %v7005_v28 = vpop.f32.mrb[118].mxu0 }
 0x2b0   : > { %v7007_v34 = vpop.f32.mrb[118].mxu1  ;;  %v5281_v10 = vpop.eup %5280  ;;  %v2064_v55 = vmax.f32 %v7005_v28, 1.0  ;;  %5292 = vrcp.f32 %v2127_v32  ;;  %v2987_v27 = vmul.f32 %v2694_v57, %v6717_v59 }
 0x2b1   : > { %7307 = vst [vmem:[#allocation44_spill] sm:$0xff] %v7007_v34  ;;  %v4614_v11 = vpack.c.bf16 %v2924_v47, %v2923_v29  ;;  %v1731_v18 = vpop.f32.mrb[119].mxu0  ;;  %v1987_v53 = vpop.f32.mrb[119].mxu1  ;;  %v2128_v46 = vmax.f32 %v7007_v34, 1.0 }
 0x2b2   : > { %v5283_v40 = vpop.eup %5282  ;;  %v2699_v52 = vpop.permute.xlu1 %2698  ;;  %2858 = vperm.xlu1 %5041, %v5281_v10   ;;  %5294 = vrcp.f32 %v2064_v55  ;;  %v7312_v10 = vld [vmem:[#allocation17_spill] sm:$0xff] }
 0x2b3   : > { %v2384_v6 = vpop.permute.xlu0 %2383  ;;  %4886 = vst [vmem:[%s5622_s18 + $0x58] sm:$0xff] %v4614_v11   ;;  %v2988_v8 = vmul.f32 %v2699_v52, %v7308_v19  ;;  %2543 = vperm.xlu0 %5040, %v5283_v40   ;;  %v5285_v12 = vpop.eup %5284  ;;  %5296 = vrcp.f32 %v2128_v46  ;;  %v7311_v11 = vld [vmem:[#allocation15_spill] sm:$0xff] }
 0x2b4   : > { %v7014_v47 = vpop.f32.mrb[120].mxu0  ;;  %v7016_v39 = vpop.f32.mrb[120].mxu1  ;;  %v2925_v53 = vmul.f32 %v2384_v6, %v7311_v11  ;;  %v7315_v11 = vld [vmem:[#allocation16_spill] sm:$0xff] }
 0x2b5   : > { %v4774_v29 = vpack.c.bf16 %v2988_v8, %v2987_v27  ;;  %7309 = vst [vmem:[#allocation14_spill] sm:$0xff] %v7014_v47  ;;  %7310 = vst [vmem:[#allocation45_spill] sm:$0xff] %v7016_v39  ;;  %v5287_v32 = vpop.eup %5286  ;;  %v2065_v16 = vmax.f32 %v7014_v47, 1.0  ;;  %v2129_v57 = vmax.f32 %v7016_v39, 1.0  ;;  %v1736_v52 = vpop.f32.mrb[121].mxu0 }
 0x2b6   : > { %v2389_v59 = vpop.permute.xlu1 %2388  ;;  %2548 = vperm.xlu1 %5041, %v5287_v32   ;;  %v1992_v55 = vpop.f32.mrb[121].mxu1 }
 0x2b7   : > { %v2704_v18 = vpop.permute.xlu0 %2703  ;;  %4918 = vst [vmem:[%s5622_s18 + $0x158] sm:$0xff] %v4774_v29   ;;  %v2926_v40 = vmul.f32 %v2389_v59, %v7312_v10  ;;  %2863 = vperm.xlu0 %5040, %v5285_v12   ;;  %5298 = vrcp.f32 %v2065_v16  ;;  %v7023_v27 = vpop.f32.mrb[122].mxu0  ;;  %v7316_v16 = vld [vmem:[#allocation18_spill] sm:$0xff] }
 0x2b8   : > { %7313 = vst [vmem:[#allocation15_spill] sm:$0xff] %v7023_v27  ;;  %v7025_v19 = vpop.f32.mrb[122].mxu1  ;;  %v5289_v8 = vpop.eup %5288  ;;  %v2066_v39 = vmax.f32 %v7023_v27, 1.0  ;;  %5300 = vrcp.f32 %v2129_v57  ;;  %v2989_v12 = vmul.f32 %v2704_v18, %v7315_v11  ;;  %v7319_v11 = vld [vmem:[#allocation19_spill] sm:$0xff] }
 0x2b9   : > { %7314 = vst [vmem:[#allocation17_spill] sm:$0xff] %v7025_v19  ;;  %v4619_v47 = vpack.c.bf16 %v2926_v40, %v2925_v53  ;;  %v1739_v46 = vpop.f32.mrb[123].mxu0  ;;  %v1995_v29 = vpop.f32.mrb[123].mxu1  ;;  %v2130_v32 = vmax.f32 %v7025_v19, 1.0 }
 0x2ba   : > { %v5291_v34 = vpop.eup %5290  ;;  %v2709_v6 = vpop.permute.xlu1 %2708  ;;  %2868 = vperm.xlu1 %5041, %v5289_v8   ;;  %5302 = vrcp.f32 %v2066_v39  ;;  %v7320_v8 = vld [vmem:[#allocation21_spill] sm:$0xff] }
 0x2bb   : > { %v2394_v59 = vpop.permute.xlu0 %2393  ;;  %4887 = vst [vmem:[%s5622_s18 + $0x60] sm:$0xff] %v4619_v47   ;;  %v2990_v10 = vmul.f32 %v2709_v6, %v7316_v16  ;;  %2553 = vperm.xlu0 %5040, %v5291_v34   ;;  %v5293_v52 = vpop.eup %5292  ;;  %5304 = vrcp.f32 %v2130_v32 }
 0x2bc   : > { %v7032_v40 = vpop.f32.mrb[124].mxu0  ;;  %v7034_v55 = vpop.f32.mrb[124].mxu1  ;;  %v2927_v6 = vmul.f32 %v2394_v59, %v7319_v11 }
 0x2bd   : > { %v4779_v53 = vpack.c.bf16 %v2990_v10, %v2989_v12  ;;  %7317 = vst [vmem:[#allocation16_spill] sm:$0xff] %v7032_v40  ;;  %7318 = vst [vmem:[#allocation18_spill] sm:$0xff] %v7034_v55  ;;  %v5295_v57 = vpop.eup %5294  ;;  %v2067_v46 = vmax.f32 %v7032_v40, 1.0  ;;  %v2131_v47 = vmax.f32 %v7034_v55, 1.0  ;;  %v1744_v16 = vpop.f32.mrb[125].mxu0 }
 0x2be   : > { %v2399_v18 = vpop.permute.xlu1 %2398  ;;  %2558 = vperm.xlu1 %5041, %v5295_v57   ;;  %v2000_v39 = vpop.f32.mrb[125].mxu1  ;;  %v7323_v57 = vld [vmem:[#allocation22_spill] sm:$0xff] }
 0x2bf   : > { %v2714_v29 = vpop.permute.xlu0 %2713  ;;  %4919 = vst [vmem:[%s5622_s18 + $0x160] sm:$0xff] %v4779_v53   ;;  %v2928_v34 = vmul.f32 %v2399_v18, %v7320_v8  ;;  %2873 = vperm.xlu0 %5040, %v5293_v52   ;;  %5306 = vrcp.f32 %v2067_v46  ;;  %v7041_v12 = vpop.f32.mrb[126].mxu0  ;;  %v7322_v52 = vld [vmem:[#allocation20_spill] sm:$0xff] }
 0x2c0   : > { %7321 = vst [vmem:[#allocation19_spill] sm:$0xff] %v7041_v12  ;;  %v7043_v10 = vpop.f32.mrb[126].mxu1  ;;  %v5297_v40 = vpop.eup %5296  ;;  %v2068_v55 = vmax.f32 %v7041_v12, 1.0  ;;  %5308 = vrcp.f32 %v2131_v47  ;;  %v2991_v11 = vmul.f32 %v2714_v29, %v7322_v52  ;;  %v7324_v47 = vld [vmem:[#allocation23_spill] sm:$0xff]  ;;  %v7325_v12 = vld [vmem:[#allocation25_spill] sm:$0xff] }
 0x2c1   : > { %v4624_v19 = vpack.c.bf16 %v2928_v34, %v2927_v6  ;;  %v1747_v32 = vpop.f32.mrb[127].mxu0  ;;  %v2003_v53 = vpop.f32.mrb[127].mxu1  ;;  %v2132_v6 = vmax.f32 %v7043_v10, 1.0 }
 0x2c2   : > { %v5299_v27 = vpop.eup %5298  ;;  %v2719_v59 = vpop.permute.xlu1 %2718  ;;  %2878 = vperm.xlu1 %5041, %v5297_v40   ;;  %5310 = vrcp.f32 %v2068_v55 }
 0x2c3   : > { %v2404_v18 = vpop.permute.xlu0 %2403  ;;  %4888 = vst [vmem:[%s5622_s18 + $0x68] sm:$0xff] %v4624_v19   ;;  %v2992_v46 = vmul.f32 %v2719_v59, %v7323_v57  ;;  %2563 = vperm.xlu0 %5040, %v5299_v27   ;;  %v5301_v8 = vpop.eup %5300  ;;  %5312 = vrcp.f32 %v2132_v6  ;;  %v7326_v59 = vld [vmem:[#allocation24_spill] sm:$0xff]  ;;  %v7328_v6 = vld [vmem:[#allocation27_spill] sm:$0xff] }
 0x2c4   : > { %v5303_v16 = vpop.eup %5302  ;;  %v2929_v53 = vmul.f32 %v2404_v18, %v7324_v47 }
 0x2c5   : > { %v4784_v34 = vpack.c.bf16 %v2992_v46, %v2991_v11  ;;  %v5305_v19 = vpop.eup %5304  ;;  %v7327_v11 = vld [vmem:[#allocation26_spill] sm:$0xff] }
 0x2c6   : > { %v2409_v32 = vpop.permute.xlu1 %2408  ;;  %2568 = vperm.xlu1 %5041, %v5303_v16   ;;  %v7329_v16 = vld [vmem:[#allocation29_spill] sm:$0xff] }
 0x2c7   : > { %v2724_v39 = vpop.permute.xlu0 %2723  ;;  %4920 = vst [vmem:[%s5622_s18 + $0x168] sm:$0xff] %v4784_v34   ;;  %v2930_v20 = vmul.f32 %v2409_v32, %v7325_v12  ;;  %2883 = vperm.xlu0 %5040, %v5301_v8  }
 0x2c8   : > { %v2993_v52 = vmul.f32 %v2724_v39, %v7326_v59 }
 0x2c9   : > { %v4629_v27 = vpack.c.bf16 %v2930_v20, %v2929_v53  ;;  %v5307_v40 = vpop.eup %5306 }
 0x2ca   : > { %v2729_v55 = vpop.permute.xlu1 %2728  ;;  %2888 = vperm.xlu1 %5041, %v5305_v19   ;;  %v5309_v18 = vpop.eup %5308 }
 0x2cb   : > { %v2414_v29 = vpop.permute.xlu0 %2413  ;;  %4889 = vst [vmem:[%s5622_s18 + $0x70] sm:$0xff] %v4629_v27   ;;  %v2994_v57 = vmul.f32 %v2729_v55, %v7327_v11  ;;  %2573 = vperm.xlu0 %5040, %v5307_v40   ;;  %v7330_v27 = vld [vmem:[#allocation28_spill] sm:$0xff]  ;;  %v7331_v55 = vld [vmem:[#allocation30_spill] sm:$0xff] }
 0x2cc   : > { %v5311_v12 = vpop.eup %5310  ;;  %v2931_v20 = vmul.f32 %v2414_v29, %v7328_v6  ;;  %v7332_v29 = vld [vmem:[#allocation31_spill] sm:$0xff] }
 0x2cd   : > { %v4789_v46 = vpack.c.bf16 %v2994_v57, %v2993_v52  ;;  %v5313_v47 = vpop.eup %5312 }
 0x2ce   : > { %v2419_v34 = vpop.permute.xlu1 %2418  ;;  %2578 = vperm.xlu1 %5041, %v5311_v12  }
 0x2cf   : > { %v2734_v8 = vpop.permute.xlu0 %2733  ;;  %4921 = vst [vmem:[%s5622_s18 + $0x170] sm:$0xff] %v4789_v46   ;;  %v2932_v32 = vmul.f32 %v2419_v34, %v7329_v16  ;;  %2893 = vperm.xlu0 %5040, %v5309_v18   ;;  %v7333_v18 = vld [vmem:[#allocation33_spill] sm:$0xff]  ;;  %v7334_v16 = vld [vmem:[#allocation32_spill] sm:$0xff] }
 0x2d0   : > { %v2995_v40 = vmul.f32 %v2734_v8, %v7330_v27  ;;  %v7335_v8 = vld [vmem:[#allocation34_spill] sm:$0xff] }
 0x2d1   : > { %v4634_v39 = vpack.c.bf16 %v2932_v32, %v2931_v20 }
 0x2d2   : > { %v2739_v53 = vpop.permute.xlu1 %2738  ;;  %2898 = vperm.xlu1 %5041, %v5313_v47  }
 0x2d3   : > { %v2424_v19 = vpop.permute.xlu0 %2423  ;;  %4890 = vst [vmem:[%s5622_s18 + $0x78] sm:$0xff] %v4634_v39   ;;  %v2996_v59 = vmul.f32 %v2739_v53, %v7331_v55 }
 0x2d4   : > { %v2933_v46 = vmul.f32 %v2424_v19, %v7332_v29 }
 0x2d5   : > { %v4794_v52 = vpack.c.bf16 %v2996_v59, %v2995_v40  ;;  %v7336_v40 = vld [vmem:[#allocation35_spill] sm:$0xff]  ;;  %v7337_v59 = vld [vmem:[#allocation37_spill] sm:$0xff] }
 0x2d6   : > { %v2429_v57 = vpop.permute.xlu1 %2428 }
 0x2d7   : > { %v2744_v11 = vpop.permute.xlu0 %2743  ;;  %4922 = vst [vmem:[%s5622_s18 + $0x178] sm:$0xff] %v4794_v52   ;;  %v2934_v12 = vmul.f32 %v2429_v57, %v7333_v18 }
 0x2d8   : > { %v2997_v32 = vmul.f32 %v2744_v11, %v7334_v16  ;;  %v7339_v11 = vld [vmem:[#allocation38_spill] sm:$0xff] }
 0x2d9   : > { %v4639_v34 = vpack.c.bf16 %v2934_v12, %v2933_v46  ;;  %v7338_v46 = vld [vmem:[#allocation36_spill] sm:$0xff] }
 0x2da   : > { %v2749_v6 = vpop.permute.xlu1 %2748 }
 0x2db   : > { %v2434_v20 = vpop.permute.xlu0 %2433  ;;  %4891 = vst [vmem:[%s5622_s18 + $0x80] sm:$0xff] %v4639_v34   ;;  %v2998_v39 = vmul.f32 %v2749_v6, %v7335_v8 }
 0x2dc   : > { %v2935_v55 = vmul.f32 %v2434_v20, %v7336_v40  ;;  %v7341_v40 = vld [vmem:[#allocation40_spill] sm:$0xff] }
 0x2dd   : > { %v4799_v47 = vpack.c.bf16 %v2998_v39, %v2997_v32  ;;  %v7340_v32 = vld [vmem:[#allocation39_spill] sm:$0xff] }
 0x2de   : > { %v2439_v27 = vpop.permute.xlu1 %2438 }
 0x2df   : > { %v2754_v53 = vpop.permute.xlu0 %2753  ;;  %4923 = vst [vmem:[%s5622_s18 + $0x180] sm:$0xff] %v4799_v47   ;;  %v2936_v19 = vmul.f32 %v2439_v27, %v7337_v59 }
 0x2e0   : > { %v2999_v18 = vmul.f32 %v2754_v53, %v7338_v46 }
 0x2e1   : > { %v4644_v52 = vpack.c.bf16 %v2936_v19, %v2935_v55 }
 0x2e2   : > { %v2759_v57 = vpop.permute.xlu1 %2758 }
 0x2e3   : > { %v2444_v29 = vpop.permute.xlu0 %2443  ;;  %4892 = vst [vmem:[%s5622_s18 + $0x88] sm:$0xff] %v4644_v52   ;;  %v3000_v12 = vmul.f32 %v2759_v57, %v7339_v11  ;;  %v7342_v57 = vld [vmem:[#allocation41_spill] sm:$0xff] }
 0x2e4   : > { %v2937_v8 = vmul.f32 %v2444_v29, %v7340_v32 }
 0x2e5   : > { %v4804_v34 = vpack.c.bf16 %v3000_v12, %v2999_v18  ;;  %v7343_v12 = vld [vmem:[#allocation42_spill] sm:$0xff] }
 0x2e6   : > { %v2449_v16 = vpop.permute.xlu1 %2448 }
 0x2e7   : > { %v2764_v6 = vpop.permute.xlu0 %2763  ;;  %4924 = vst [vmem:[%s5622_s18 + $0x188] sm:$0xff] %v4804_v34   ;;  %v2938_v20 = vmul.f32 %v2449_v16, %v6804_v14 }
 0x2e8   : > { %v3001_v55 = vmul.f32 %v2764_v6, %v7341_v40 }
 0x2e9   : > { %v4649_v39 = vpack.c.bf16 %v2938_v20, %v2937_v8 }
 0x2ea   : > { %v2769_v47 = vpop.permute.xlu1 %2768 }
 0x2eb   : > { %v2454_v27 = vpop.permute.xlu0 %2453  ;;  %4893 = vst [vmem:[%s5622_s18 + $0x90] sm:$0xff] %v4649_v39   ;;  %v3002_v53 = vmul.f32 %v2769_v47, %v6810_v13 }
 0x2ec   : > { %v2939_v46 = vmul.f32 %v2454_v27, %v7342_v57 }
 0x2ed   : > { %v4809_v59 = vpack.c.bf16 %v3002_v53, %v3001_v55 }
 0x2ee   : > { %v2459_v52 = vpop.permute.xlu1 %2458 }
 0x2ef   : > { %v2774_v19 = vpop.permute.xlu0 %2773  ;;  %4925 = vst [vmem:[%s5622_s18 + $0x190] sm:$0xff] %v4809_v59   ;;  %v2940_v29 = vmul.f32 %v2459_v52, %v6825_v24 }
 0x2f0   : > { %v3003_v34 = vmul.f32 %v2774_v19, %v7343_v12 }
 0x2f1   : > { %v4654_v18 = vpack.c.bf16 %v2940_v29, %v2939_v46 }
 0x2f2   : > { %v2779_v14 = vpop.permute.xlu1 %2778 }
 0x2f3   : > { %v2464_v11 = vpop.permute.xlu0 %2463  ;;  %4894 = vst [vmem:[%s5622_s18 + $0x98] sm:$0xff] %v4654_v18   ;;  %v3004_v6 = vmul.f32 %v2779_v14, %v6827_v25 }
 0x2f4   : > { %v2941_v8 = vmul.f32 %v2464_v11, %v6834_v30 }
 0x2f5   : > { %v4814_v13 = vpack.c.bf16 %v3004_v6, %v3003_v34 }
 0x2f6   : > { %v2469_v32 = vpop.permute.xlu1 %2468 }
 0x2f7   : > { %v2784_v16 = vpop.permute.xlu0 %2783  ;;  %4926 = vst [vmem:[%s5622_s18 + $0x198] sm:$0xff] %v4814_v13   ;;  %v2942_v20 = vmul.f32 %v2469_v32, %v6843_v51 }
 0x2f8   : > { %v3005_v27 = vmul.f32 %v2784_v16, %v6836_v43 }
 0x2f9   : > { %v4659_v39 = vpack.c.bf16 %v2942_v20, %v2941_v8 }
 0x2fa   : > { %v2789_v24 = vpop.permute.xlu1 %2788 }
 0x2fb   : > { %v2474_v47 = vpop.permute.xlu0 %2473  ;;  %4895 = vst [vmem:[%s5622_s18 + $0xa0] sm:$0xff] %v4659_v39   ;;  %v3006_v40 = vmul.f32 %v2789_v24, %v6845_v2 }
 0x2fc   : > { %v2943_v59 = vmul.f32 %v2474_v47, %v6852_v49 }
 0x2fd   : > { %v4819_v25 = vpack.c.bf16 %v3006_v40, %v3005_v27 }
 0x2fe   : > { %v2479_v53 = vpop.permute.xlu1 %2478 }
 0x2ff   : > { %v2794_v55 = vpop.permute.xlu0 %2793  ;;  %4927 = vst [vmem:[%s5622_s18 + $0x1a0] sm:$0xff] %v4819_v25   ;;  %v2944_v30 = vmul.f32 %v2479_v53, %v6861_v38 }
 0x300   : > { %v3007_v57 = vmul.f32 %v2794_v55, %v6854_v37 }
 0x301   : > { %v4664_v19 = vpack.c.bf16 %v2944_v30, %v2943_v59 }
 0x302   : > { %v2799_v51 = vpop.permute.xlu1 %2798 }
 0x303   : > { %v2484_v52 = vpop.permute.xlu0 %2483  ;;  %4896 = vst [vmem:[%s5622_s18 + $0xa8] sm:$0xff] %v4664_v19   ;;  %v3008_v43 = vmul.f32 %v2799_v51, %v6863_v36 }
 0x304   : > { %v2945_v18 = vmul.f32 %v2484_v52, %v6870_v5 }
 0x305   : > { %v4824_v2 = vpack.c.bf16 %v3008_v43, %v3007_v57 }
 0x306   : > { %v2489_v29 = vpop.permute.xlu1 %2488 }
 0x307   : > { %v2804_v46 = vpop.permute.xlu0 %2803  ;;  %4928 = vst [vmem:[%s5622_s18 + $0x1a8] sm:$0xff] %v4824_v2   ;;  %v2946_v49 = vmul.f32 %v2489_v29, %v6879_v23 }
 0x308   : > { %v3009_v12 = vmul.f32 %v2804_v46, %v6872_v15 }
 0x309   : > { %v4669_v14 = vpack.c.bf16 %v2946_v49, %v2945_v18 }
 0x30a   : > { %v2809_v38 = vpop.permute.xlu1 %2808 }
 0x30b   : > { %v2494_v11 = vpop.permute.xlu0 %2493  ;;  %4897 = vst [vmem:[%s5622_s18 + $0xb0] sm:$0xff] %v4669_v14   ;;  %v3010_v37 = vmul.f32 %v2809_v38, %v6881_v3 }
 0x30c   : > { %v2947_v13 = vmul.f32 %v2494_v11, %v6888_v35 }
 0x30d   : > { %v4829_v36 = vpack.c.bf16 %v3010_v37, %v3009_v12 }
 0x30e   : > { %v2499_v6 = vpop.permute.xlu1 %2498 }
 0x30f   : > { %v2814_v34 = vpop.permute.xlu0 %2813  ;;  %4929 = vst [vmem:[%s5622_s18 + $0x1b0] sm:$0xff] %v4829_v36   ;;  %v2948_v5 = vmul.f32 %v2499_v6, %v6897_v31 }
 0x310   : > { %v3011_v8 = vmul.f32 %v2814_v34, %v6890_v50 }
 0x311   : > { %v4674_v16 = vpack.c.bf16 %v2948_v5, %v2947_v13 }
 0x312   : > { %v2819_v23 = vpop.permute.xlu1 %2818 }
 0x313   : > { %v2504_v32 = vpop.permute.xlu0 %2503  ;;  %4898 = vst [vmem:[%s5622_s18 + $0xb8] sm:$0xff] %v4674_v16   ;;  %v3012_v15 = vmul.f32 %v2819_v23, %v6899_v1 }
 0x314   : > { %v2949_v24 = vmul.f32 %v2504_v32, %v6906_v54 }
 0x315   : > { %v4834_v3 = vpack.c.bf16 %v3012_v15, %v3011_v8  ;;  %v7344_v15 = vld [vmem:[#allocation43_spill] sm:$0xff] }
 0x316   : > { %v2509_v39 = vpop.permute.xlu1 %2508 }
 0x317   : > { %v2824_v20 = vpop.permute.xlu0 %2823  ;;  %4930 = vst [vmem:[%s5622_s18 + $0x1b8] sm:$0xff] %v4834_v3   ;;  %v2950_v35 = vmul.f32 %v2509_v39, %v6915_v62 }
 0x318   : > { %v3013_v40 = vmul.f32 %v2824_v20, %v6908_v42 }
 0x319   : > { %v4679_v47 = vpack.c.bf16 %v2950_v35, %v2949_v24  ;;  %v7346_v35 = vld [vmem:[#allocation14_spill] sm:$0xff] }
 0x31a   : > { %v2829_v31 = vpop.permute.xlu1 %2828 }
 0x31b   : > { %v2514_v27 = vpop.permute.xlu0 %2513  ;;  %4899 = vst [vmem:[%s5622_s18 + $0xc0] sm:$0xff] %v4679_v47   ;;  %v3014_v50 = vmul.f32 %v2829_v31, %v6917_v17  ;;  %v7347_v31 = vld [vmem:[#allocation15_spill] sm:$0xff] }
 0x31c   : > { %v2951_v53 = vmul.f32 %v2514_v27, %v6924_v9 }
 0x31d   : > { %v4839_v1 = vpack.c.bf16 %v3014_v50, %v3013_v40  ;;  %v7348_v50 = vld [vmem:[#allocation45_spill] sm:$0xff] }
 0x31e   : > { %v2519_v55 = vpop.permute.xlu1 %2518 }
 0x31f   : > { %v2834_v25 = vpop.permute.xlu0 %2833  ;;  %4931 = vst [vmem:[%s5622_s18 + $0x1c0] sm:$0xff] %v4839_v1   ;;  %v2952_v54 = vmul.f32 %v2519_v55, %v6933_v41 }
 0x320   : > { %v3015_v19 = vmul.f32 %v2834_v25, %v6926_v61  ;;  %v7349_v25 = vld [vmem:[#allocation17_spill] sm:$0xff] }
 0x321   : > { %v4684_v59 = vpack.c.bf16 %v2952_v54, %v2951_v53 }
 0x322   : > { %v2839_v62 = vpop.permute.xlu1 %2838 }
 0x323   : > { %v2524_v30 = vpop.permute.xlu0 %2523  ;;  %4900 = vst [vmem:[%s5622_s18 + $0xc8] sm:$0xff] %v4684_v59   ;;  %v3016_v42 = vmul.f32 %v2839_v62, %v6935_v63  ;;  %v7350_v59 = vld [vmem:[#allocation16_spill] sm:$0xff] }
 0x324   : > { %v2953_v57 = vmul.f32 %v2524_v30, %v6942_v33  ;;  %v7351_v30 = vld [vmem:[#allocation19_spill] sm:$0xff] }
 0x325   : > { %v4844_v17 = vpack.c.bf16 %v3016_v42, %v3015_v19 }
 0x326   : > { %v2529_v52 = vpop.permute.xlu1 %2528 }
 0x327   : > { %v2844_v51 = vpop.permute.xlu0 %2843  ;;  %4932 = vst [vmem:[%s5622_s18 + $0x1c8] sm:$0xff] %v4844_v17   ;;  %v2954_v9 = vmul.f32 %v2529_v52, %v6951_v60  ;;  %v7352_v52 = vld [vmem:[#allocation18_spill] sm:$0xff] }
 0x328   : > { %v3017_v46 = vmul.f32 %v2844_v51, %v6944_v22 }
 0x329   : > { %v4689_v43 = vpack.c.bf16 %v2954_v9, %v2953_v57 }
 0x32a   : > { %v2849_v41 = vpop.permute.xlu1 %2848 }
 0x32b   : > { %v2534_v2 = vpop.permute.xlu0 %2533  ;;  %4901 = vst [vmem:[%s5622_s18 + $0xd0] sm:$0xff] %v4689_v43   ;;  %v3018_v61 = vmul.f32 %v2849_v41, %v6953_v26 }
 0x32c   : > { %v2955_v49 = vmul.f32 %v2534_v2, %v6960_v58 }
 0x32d   : > { %v4849_v63 = vpack.c.bf16 %v3018_v61, %v3017_v46 }
 0x32e   : > { %v2539_v18 = vpop.permute.xlu1 %2538 }
 0x32f   : > { %v2854_v29 = vpop.permute.xlu0 %2853  ;;  %4933 = vst [vmem:[%s5622_s18 + $0x1d0] sm:$0xff] %v4849_v63   ;;  %v2956_v33 = vmul.f32 %v2539_v18, %v6969_v7 }
 0x330   : > { %v3019_v11 = vmul.f32 %v2854_v29, %v6962_v45 }
 0x331   : > { %v4694_v14 = vpack.c.bf16 %v2956_v33, %v2955_v49 }
 0x332   : > { %v2859_v60 = vpop.permute.xlu1 %2858 }
 0x333   : > { %v2544_v38 = vpop.permute.xlu0 %2543  ;;  %4902 = vst [vmem:[%s5622_s18 + $0xd8] sm:$0xff] %v4694_v14   ;;  %v3020_v22 = vmul.f32 %v2859_v60, %v6971_v48 }
 0x334   : > { %v2957_v36 = vmul.f32 %v2544_v38, %v6978_v21 }
 0x335   : > { %v4854_v26 = vpack.c.bf16 %v3020_v22, %v3019_v11 }
 0x336   : > { %v2549_v37 = vpop.permute.xlu1 %2548 }
 0x337   : > { %v2864_v12 = vpop.permute.xlu0 %2863  ;;  %4934 = vst [vmem:[%s5622_s18 + $0x1d8] sm:$0xff] %v4854_v26   ;;  %v2958_v58 = vmul.f32 %v2549_v37, %v6987_v44 }
 0x338   : > { %v3021_v13 = vmul.f32 %v2864_v12, %v6980_v0  ;;  %v7345_v0 = vld [vmem:[#allocation44_spill] sm:$0xff] }
 0x339   : > { %v4699_v34 = vpack.c.bf16 %v2958_v58, %v2957_v36 }
 0x33a   : > { %v2869_v7 = vpop.permute.xlu1 %2868 }
 0x33b   : > { %v2554_v6 = vpop.permute.xlu0 %2553  ;;  %4903 = vst [vmem:[%s5622_s18 + $0xe0] sm:$0xff] %v4699_v34   ;;  %v3022_v45 = vmul.f32 %v2869_v7, %v6989_v4 }
 0x33c   : > { %v2959_v23 = vmul.f32 %v2554_v6, %v6996_v56 }
 0x33d   : > { %v4859_v48 = vpack.c.bf16 %v3022_v45, %v3021_v13 }
 0x33e   : > { %v2559_v16 = vpop.permute.xlu1 %2558 }
 0x33f   : > { %v2874_v5 = vpop.permute.xlu0 %2873  ;;  %4935 = vst [vmem:[%s5622_s18 + $0x1e0] sm:$0xff] %v4859_v48   ;;  %v2960_v21 = vmul.f32 %v2559_v16, %v7005_v28 }
 0x340   : > { %v3023_v3 = vmul.f32 %v2874_v5, %v7344_v15 }
 0x341   : > { %v4704_v32 = vpack.c.bf16 %v2960_v21, %v2959_v23 }
 0x342   : > { %v2879_v44 = vpop.permute.xlu1 %2878 }
 0x343   : > { %v2564_v8 = vpop.permute.xlu0 %2563  ;;  %4904 = vst [vmem:[%s5622_s18 + $0xe8] sm:$0xff] %v4704_v32   ;;  %v3024_v20 = vmul.f32 %v2879_v44, %v7345_v0 }
 0x344   : > { %v2961_v47 = vmul.f32 %v2564_v8, %v7346_v35 }
 0x345   : > { %v4864_v4 = vpack.c.bf16 %v3024_v20, %v3023_v3 }
 0x346   : > { %v2569_v24 = vpop.permute.xlu1 %2568 }
 0x347   : > { %v2884_v39 = vpop.permute.xlu0 %2883  ;;  %4936 = vst [vmem:[%s5622_s18 + $0x1e8] sm:$0xff] %v4864_v4   ;;  %v2962_v56 = vmul.f32 %v2569_v24, %v7347_v31 }
 0x348   : > { %v3025_v1 = vmul.f32 %v2884_v39, %v7348_v50 }
 0x349   : > { %v4709_v28 = vpack.c.bf16 %v2962_v56, %v2961_v47 }
 0x34a   : > { %v2889_v27 = vpop.permute.xlu1 %2888 }
 0x34b   : > { %v2574_v40 = vpop.permute.xlu0 %2573  ;;  %4905 = vst [vmem:[%s5622_s18 + $0xf0] sm:$0xff] %v4709_v28   ;;  %v3026_v55 = vmul.f32 %v2889_v27, %v7349_v25 }
 0x34c   : > { %v2963_v62 = vmul.f32 %v2574_v40, %v7350_v59 }
 0x34d   : > { %v4869_v53 = vpack.c.bf16 %v3026_v55, %v3025_v1 }
 0x34e   : > { %v2579_v54 = vpop.permute.xlu1 %2578 }
 0x34f   : > { %4937 = vst [vmem:[%s5622_s18 + $0x1f0] sm:$0xff] %v4869_v53   ;;  %v2964_v19 = vmul.f32 %v2579_v54, %v7351_v30  ;;  %v2894_v42 = vpop.permute.xlu0 %2893 }
 0x350   : > { %v3027_v57 = vmul.f32 %v2894_v42, %v7352_v52 }
 0x351   : > { %v4714_v17 = vpack.c.bf16 %v2964_v19, %v2963_v62 }
 0x352   : > { %v2899_v51 = vpop.permute.xlu1 %2898 }
 0x353   : > { %4906 = vst [vmem:[%s5622_s18 + $0xf8] sm:$0xff] %v4714_v17   ;;  %v3028_v9 = vmul.f32 %v2899_v51, %v7043_v10 }
 0x355   : > { %v4874_v43 = vpack.c.bf16 %v3028_v9, %v3027_v57 }
 0x357   : > { %4938 = vst [vmem:[%s5622_s18 + $0x1f8] sm:$0xff] %v4874_v43  }
 0x358 PF: > { %s4555_s21 = sshll.u32 %s5519_s0, 13  ;;  %s3683_s7 = sshll.u32 %s5622_s18, 4  ;;  %s7166_s7 = int_to_ptr.vmem [resolvable:$true] %s3683_s7 }
 0x359   : > { %s7163_s29 = scalar_lea.hbm %s7214_s3, %s4555_s21  ;;  %s7170_s9 = scalar_lea.sflag [#allocation6], %s152_s11 }
 0x35a   : > { %s5380_s12 = scalar_lea.vmem %s7166_s7, 8192  ;;  %p7353_p5 = scmp.ne.s32.totalorder %s7256_s4, 0 }
 0x35b   : > { %p5381_p4 = scmp.ne.s32.totalorder %s7166_s7, %s5380_s12  ;;  %s5463_s0 = smov [#allocation9]  }
 0x35c   : > { %s5384_s13 = sshll.u32 %s5463_s0, 4  ;;  %s5385_s13 = int_to_ptr.vmem [resolvable:$false] %s5384_s13 }
 0x35d   : > { %p5382_p6 = pnand %p5381_p4, %p7353_p5  ;;  %s5386_s8 = scalar_lea.vmem %s5385_s13, 16384 }
 0x35e   : > { %p5387_p10 = scmp.lt.s32.totalorder %s7166_s7, %s5385_s13  ;;  %p5388_p11 = scmp.lt.s32.totalorder %s5386_s8, %s5380_s12 }
 0x35f   : > { %p5383_p7 = pneg %p5382_p6 }
 0x360   : > { %p5389_p0 = por %p5388_p11, %p5387_p10 }
 0x362   : > { %p5390_p2 = pnand %p5389_p0, %p5383_p7 }
 0x364   : > { %5393 = shalt.err (!%p5390_p2)
}
 0x365   : > { %s5394_s14 = scalar_lea.hbm %s7163_s29, 8192  ;;  %s5398_s17 = scalar_lea.hbm %s7214_s3, 73728 }
 0x366   : > { %p5395_p3 = scmp.ne.s32.totalorder %s7163_s29, %s5394_s14  ;;  %p5399_p12 = scmp.lt.u32.totalorder %s7163_s29, %s7214_s3 }
 0x367   : > { %p5400_p1 = scmp.lt.u32.totalorder %s5398_s17, %s5394_s14  ;;  %p5402_p4 = scmp.lt.u32.totalorder %s5394_s14, %s7163_s29 }
 0x368   : > { %p5396_p9 = pnand %p5395_p3, %p7353_p5 }
 0x369   : > { %p5401_p13 = por %p5400_p1, %p5399_p12 }
 0x36a   : > { %p5397_p8 = pneg %p5396_p9 }
 0x36b   : > { %p5403_p6 = por %p5402_p4, %p5401_p13 }
 0x36d   : > { %p5404_p7 = pnand %p5403_p6, %p5397_p8 }
 0x36f   : > { %5407 = shalt.err (!%p5404_p7)
}
 0x370   : > { %s5464_s6 = smov 64   ;;  %s5465_s18 = smov 4  }
 0x371   : > { %4979 = dma.vmem_to_hbm [thread:$0]  (%p7353_p5), %s7166_s7, 8192, %s7163_s29, %s7170_s9, %s5464_s6, %s5464_s6, %s5465_s18  }
 0x372 PF: > { %p4996_p10 = scmp.ge.s32.totalorder %s5452_s25, 2  ;;  %s3698_s19 = sand.u32 1, %s5440_s22  }
 0x373   : > { %p7354_p11 = scmp.ne.s32.totalorder %s7257_s5, 0  ;;  %s3699_s20 = scalar_lea.sflag [#allocation6], %s3698_s19 }
 0x375   : > { %p4989_p0 = pnand %p4996_p10, %p7354_p11 }
 0x377   : > { %5435 = dma.done.wait (!%p4989_p0), %s3699_s20, 8192  }
 0x378   : > { %5437 = vsyncadd (!%p4989_p0), %s3699_s20, 4294959104  ;;  %p19_p2 = scmp.ge.s32.totalorder %s5523_s27, 11   ;;  %s7355_s22 = smov %s5444_s23 }
 0x379   : > { %s7356_s23 = smov %s5448_s24  ;;  %s7357_s24 = smov %s5534_s30 }
 0x37a   : > { %s7358_s25 = smov %s5523_s27  ;;  %21 = sbr.rel (!%p19_p2) target bundleno = 17 (0x11), region = 77 }
 0x381   :  { %3704 = vsyncpa [#allocation5], 1 }
 0x382   :  { %3706 = vsyncpa [#allocation5 + $0x1], 1 }
 0x383   :  { %3707 = vsyncpa [#allocation8], 1 }
 0x384   :  { %3708 = vsyncpa [#allocation6], 1 }
 0x385   :  { %3710 = vsyncpa [#allocation6 + $0x1], 1 }

</bundles_post_ra>
